<compile_context>
chip_gen: v7x
topology: tpu7x:2x2x1
jax: 0.10.0
libtpu: 0.0.40
codegen_flags: <defaults>
</compile_context>

<pallas_src>
import functools

import jax
import jax.numpy as jnp
from jax.experimental import pallas as pl
from jax.experimental.pallas import tpu as pltpu

EPS = 1e-5     # PyTorch BatchNorm2d default
LANE = 128     # lane padding for the MLP head


# ---------------------------------------------------------------------------
# Fused kernel: cnn1 (3 stages) + flatten + fc1 MLP + fc4 + softmax
# ---------------------------------------------------------------------------
def fused_siamese_kernel(x_ref, cfirst_ref, clast_ref,
                         wc1_ref, bc1_ref, g1_ref, be1_ref,
                         wc2_ref, bc2_ref, g2_ref, be2_ref,
                         wc3_ref, bc3_ref, g3_ref, be3_ref,
                         wf1_ref, bf1_ref, wf2_ref, bf2_ref,
                         wf3_ref, bf3_ref, wf4_ref, bf4_ref,
                         feat_ref, logit_ref, prob_ref,
                         *, B, H, W):
    HW = H * W
    P = B * HW

    # column boundary masks (w == 0 / w == W-1), shape (1, P)
    col_first = cfirst_ref[...] > 0.5
    col_last = clast_ref[...] > 0.5

    # --- lane-shift helpers on the flat (C, P) layout --------------------
    def shift_left(X):    # out[:, p] = X[:, p + 1]  (wrapped lane is masked)
        return jnp.concatenate([X[:, 1:], X[:, :1]], axis=1)

    def shift_right(X):   # out[:, p] = X[:, p - 1]
        return jnp.concatenate([X[:, -1:], X[:, :-1]], axis=1)

    def row_reflect_shift(A, r):
        # out[:, (b,h,w)] = A[:, (b, reflect(h + r), w)]  (ReflectionPad rows)
        if r == 0:
            return A
        parts = []
        for b in range(B):
            base = b * HW
            if r == 1:
                parts.append(A[:, base + W: base + HW])                    # rows 1..H-1
                parts.append(A[:, base + (H - 2) * W: base + (H - 1) * W])  # row H-2
            else:
                parts.append(A[:, base + W: base + 2 * W])                  # row 1
                parts.append(A[:, base: base + (H - 1) * W])                # rows 0..H-2
        return jnp.concatenate(parts, axis=1)

    def col_reflect_shift(X, s):
        # out[:, (b,h,w)] = X[:, (b, h, reflect(w + s))]  (ReflectionPad cols)
        if s == 0:
            return X
        if s == 1:
            return jnp.where(col_last, shift_right(X), shift_left(X))
        return jnp.where(col_first, shift_left(X), shift_right(X))

    # --- one cnn1 stage: reflect-pad + conv3x3 + ReLU + BatchNorm ---------
    def conv_relu_bn(A, wc, bc, gamma, beta):
        # A: (Cin, P) f32, wc: (Cout, 9*Cin) taps ordered (dy, dx) outer / ci inner
        taps = []
        for r in (-1, 0, 1):            # dy - 1
            R = row_reflect_shift(A, r)
            for s in (-1, 0, 1):        # dx - 1
                taps.append(col_reflect_shift(R, s))
        patches = jnp.concatenate(taps, axis=0)                            # (9*Cin, P)
        out = jnp.dot(wc, patches, preferred_element_type=jnp.float32)     # (Cout, P)
        out = jnp.maximum(out + bc, 0.0)                                   # bias + ReLU
        # BatchNorm2d (training mode): one-pass batch stats, biased variance
        inv_n = 1.0 / P
        mean = jnp.sum(out, axis=1, keepdims=True) * inv_n
        var = jnp.sum(out * out, axis=1, keepdims=True) * inv_n - mean * mean
        out = (out - mean) * jax.lax.rsqrt(var + EPS)
        return out * gamma + beta                                          # (Cout, P)

    # input image, already flattened to (1, B*H*W) with (b, h, w) order
    a = x_ref[...].astype(jnp.float32)
    a = conv_relu_bn(a, wc1_ref[...], bc1_ref[...], g1_ref[...], be1_ref[...])   # (4, P)
    a = conv_relu_bn(a, wc2_ref[...], bc2_ref[...], g2_ref[...], be2_ref[...])   # (8, P)
    a = conv_relu_bn(a, wc3_ref[...], bc3_ref[...], g3_ref[...], be3_ref[...])   # (8, P)

    # PyTorch output.view(B, -1): x_flat[b, c*HW + hw] = a[c, b*HW + hw]
    C3 = a.shape[0]
    rows = []
    for b in range(B):
        rows.append(jnp.concatenate(
            [a[c:c + 1, b * HW:(b + 1) * HW] for c in range(C3)], axis=1))   # (1, C3*HW)
    x_flat = jnp.concatenate(rows, axis=0).astype(jnp.bfloat16)              # (B, 2048)

    # fc1: Linear(2048->100) + ReLU, Linear(100->100) + ReLU, Linear(100->5)
    h = jnp.dot(x_flat, wf1_ref[...], preferred_element_type=jnp.float32) + bf1_ref[...]
    h = jnp.maximum(h, 0.0)
    h = jnp.dot(h.astype(jnp.bfloat16), wf2_ref[...],
                preferred_element_type=jnp.float32) + bf2_ref[...]
    h = jnp.maximum(h, 0.0)
    feat = jnp.dot(h.astype(jnp.bfloat16), wf3_ref[...],
                   preferred_element_type=jnp.float32) + bf3_ref[...]        # (B, 128), 5 real

    # fc4: Linear(5->2)
    logits = jnp.dot(feat.astype(jnp.bfloat16), wf4_ref[...],
                     preferred_element_type=jnp.float32) + bf4_ref[...]      # (B, 128), 2 real

    # softmax over the 2 real logits (padded lanes masked out)
    lane = jax.lax.broadcasted_iota(jnp.int32, logits.shape, 1)
    masked = jnp.where(lane < 2, logits, -1e30)
    m = jnp.max(masked, axis=1, keepdims=True)
    e = jnp.exp(masked - m)
    probs = e / jnp.sum(e, axis=1, keepdims=True)

    feat_ref[...] = feat.astype(feat_ref.dtype)
    logit_ref[...] = logits.astype(logit_ref.dtype)
    prob_ref[...] = probs.astype(prob_ref.dtype)


# ---------------------------------------------------------------------------
# Wrapper: one pallas_call, whole-array VMEM operands, lane-dense outputs
# ---------------------------------------------------------------------------
def siamese_forward(x_nchw, params):
    B, cin, H, W = x_nchw.shape
    assert cin == 1
    HW = H * W
    P = B * HW

    # flat (b, h, w) view of the input (free row-major reshape in XLA)
    x_flat0 = x_nchw.reshape(1, P)

    # column boundary masks for the in-kernel reflection shifts (constant-folded)
    w_idx = jnp.arange(P, dtype=jnp.int32) % W
    col_first = (w_idx == 0).astype(jnp.float32).reshape(1, P)
    col_last = (w_idx == W - 1).astype(jnp.float32).reshape(1, P)

    kern = functools.partial(fused_siamese_kernel, B=B, H=H, W=W)
    vspec = pl.BlockSpec(memory_space=pltpu.MemorySpace.VMEM)
    n_in = 3 + len(params)

    feat_p, logit_p, prob_p = pl.pallas_call(
        kern,
        out_shape=(
            jax.ShapeDtypeStruct((B, LANE), jnp.float32),
            jax.ShapeDtypeStruct((B, LANE), jnp.float32),
            jax.ShapeDtypeStruct((B, LANE), jnp.float32),
        ),
        in_specs=[vspec] * n_in,
        out_specs=(vspec, vspec, vspec),
    )(x_flat0, col_first, col_last, *params)

    output = feat_p[:, :5]        # fc1 features
    class_op_1 = logit_p[:, :2]   # fc4 logits
    y1o_softmax = prob_p[:, :2]   # softmax(dim=1)
    return output, class_op_1, y1o_softmax


# ---------------------------------------------------------------------------
# Parameter init (deterministic, PyTorch-like uniform fan-in scaling)
# ---------------------------------------------------------------------------
def init_params(key, H, W):
    keys = jax.random.split(key, 8)
    flat_params = []

    # conv stages: 1->4, 4->8, 8->8
    cin = 1
    for i, cout in enumerate((4, 8, 8)):
        bound = 1.0 / (cin * 9) ** 0.5
        kw, kb = jax.random.split(keys[i])
        w = jax.random.uniform(kw, (cout, cin, 3, 3), jnp.float32, -bound, bound)
        b = jax.random.uniform(kb, (cout,), jnp.float32, -bound, bound)
        # pack to (Cout, 9*Cin) with rows ordered (dy, dx) outer / cin inner,
        # matching the kernel's im2col row order.
        wc = jnp.transpose(w, (2, 3, 1, 0)).reshape(9 * cin, cout).T
        flat_params += [wc,
                        b.reshape(cout, 1),
                        jnp.ones((cout, 1), jnp.float32),    # BN gamma
                        jnp.zeros((cout, 1), jnp.float32)]   # BN beta
        cin = cout

    def linear_padded(k, fin, fout, pad_in, pad_out):
        bound = 1.0 / fin ** 0.5
        kw, kb = jax.random.split(k)
        w = jax.random.uniform(kw, (fin, fout), jnp.float32, -bound, bound)
        b = jax.random.uniform(kb, (fout,), jnp.float32, -bound, bound)
        wp = jnp.zeros((pad_in, pad_out), jnp.float32).at[:fin, :fout].set(w)
        bp = jnp.zeros((1, pad_out), jnp.float32).at[0, :fout].set(b)
        return wp, bp

    flat = 8 * H * W                                  # 8*16*16 = 2048
    w1, b1 = linear_padded(keys[3], flat, 100, flat, LANE)
    w2, b2 = linear_padded(keys[4], 100, 100, LANE, LANE)
    w3, b3 = linear_padded(keys[5], 100, 5, LANE, LANE)
    w4, b4 = linear_padded(keys[6], 5, 2, LANE, LANE)

    flat_params += [w1.astype(jnp.bfloat16), b1,
                    w2.astype(jnp.bfloat16), b2,
                    w3.astype(jnp.bfloat16), b3,
                    w4.astype(jnp.bfloat16), b4]
    return tuple(flat_params)


if __name__ == "__main__":
    B, H, W = 2, 16, 16
    x = jax.random.normal(jax.random.PRNGKey(0), (B, 1, H, W), jnp.float32)
    params = init_params(jax.random.PRNGKey(1), H, W)

    fwd = jax.jit(siamese_forward)
    output, class_op_1, y1o_softmax = fwd(x, params)
    jax.block_until_ready((output, class_op_1, y1o_softmax))

    assert output.shape == (B, 5)
    assert class_op_1.shape == (B, 2)
    assert y1o_softmax.shape == (B, 2)
    assert bool(jnp.all(jnp.isfinite(output)))
    assert bool(jnp.all(jnp.isfinite(class_op_1)))
    assert bool(jnp.allclose(jnp.sum(y1o_softmax, axis=1), 1.0, atol=1e-5))

    print("KERNEL_OK")
</pallas_src>

<mosaic_0001>
module attributes {stable_mosaic.version = 11 : i64} {
  func.func @fused_siamese_kernel(%arg0: memref<1x512xf32, #tpu.memory_space<vmem>>, %arg1: memref<1x512xf32, #tpu.memory_space<vmem>>, %arg2: memref<1x512xf32, #tpu.memory_space<vmem>>, %arg3: memref<4x9xf32, #tpu.memory_space<vmem>>, %arg4: memref<4x1xf32, #tpu.memory_space<vmem>>, %arg5: memref<4x1xf32, #tpu.memory_space<vmem>>, %arg6: memref<4x1xf32, #tpu.memory_space<vmem>>, %arg7: memref<8x36xf32, #tpu.memory_space<vmem>>, %arg8: memref<8x1xf32, #tpu.memory_space<vmem>>, %arg9: memref<8x1xf32, #tpu.memory_space<vmem>>, %arg10: memref<8x1xf32, #tpu.memory_space<vmem>>, %arg11: memref<8x72xf32, #tpu.memory_space<vmem>>, %arg12: memref<8x1xf32, #tpu.memory_space<vmem>>, %arg13: memref<8x1xf32, #tpu.memory_space<vmem>>, %arg14: memref<8x1xf32, #tpu.memory_space<vmem>>, %arg15: memref<2048x128xbf16, #tpu.memory_space<vmem>>, %arg16: memref<1x128xf32, #tpu.memory_space<vmem>>, %arg17: memref<128x128xbf16, #tpu.memory_space<vmem>>, %arg18: memref<1x128xf32, #tpu.memory_space<vmem>>, %arg19: memref<128x128xbf16, #tpu.memory_space<vmem>>, %arg20: memref<1x128xf32, #tpu.memory_space<vmem>>, %arg21: memref<128x128xbf16, #tpu.memory_space<vmem>>, %arg22: memref<1x128xf32, #tpu.memory_space<vmem>>, %arg23: memref<2x128xf32, #tpu.memory_space<vmem>>, %arg24: memref<2x128xf32, #tpu.memory_space<vmem>>, %arg25: memref<2x128xf32, #tpu.memory_space<vmem>>) attributes {dimension_semantics = [], scalar_prefetch = 0 : i64, scratch_operands = 0 : i64, tpu.core_type = #tpu.core_type<tc>} {
    %c0 = arith.constant 0 : index
    %c0_0 = arith.constant 0 : index
    %0 = vector.load %arg1[%c0, %c0_0] : memref<1x512xf32, #tpu.memory_space<vmem>>, vector<1x512xf32>
    %cst = arith.constant 5.000000e-01 : f32
    %1 = vector.broadcast %cst : f32 to vector<1x512xf32>
    %2 = arith.cmpf ogt, %0, %1 : vector<1x512xf32>
    %c0_1 = arith.constant 0 : index
    %c0_2 = arith.constant 0 : index
    %3 = vector.load %arg2[%c0_1, %c0_2] : memref<1x512xf32, #tpu.memory_space<vmem>>, vector<1x512xf32>
    %cst_3 = arith.constant 5.000000e-01 : f32
    %4 = vector.broadcast %cst_3 : f32 to vector<1x512xf32>
    %5 = arith.cmpf ogt, %3, %4 : vector<1x512xf32>
    %c0_4 = arith.constant 0 : index
    %c0_5 = arith.constant 0 : index
    %6 = vector.load %arg0[%c0_4, %c0_5] : memref<1x512xf32, #tpu.memory_space<vmem>>, vector<1x512xf32>
    %c0_6 = arith.constant 0 : index
    %c0_7 = arith.constant 0 : index
    %7 = vector.load %arg3[%c0_6, %c0_7] : memref<4x9xf32, #tpu.memory_space<vmem>>, vector<4x9xf32>
    %c0_8 = arith.constant 0 : index
    %c0_9 = arith.constant 0 : index
    %8 = vector.load %arg4[%c0_8, %c0_9] : memref<4x1xf32, #tpu.memory_space<vmem>>, vector<4x1xf32>
    %c0_10 = arith.constant 0 : index
    %c0_11 = arith.constant 0 : index
    %9 = vector.load %arg5[%c0_10, %c0_11] : memref<4x1xf32, #tpu.memory_space<vmem>>, vector<4x1xf32>
    %c0_12 = arith.constant 0 : index
    %c0_13 = arith.constant 0 : index
    %10 = vector.load %arg6[%c0_12, %c0_13] : memref<4x1xf32, #tpu.memory_space<vmem>>, vector<4x1xf32>
    %11 = vector.extract_strided_slice %6 {offsets = [0, 16], sizes = [1, 16], strides = [1, 1]} : vector<1x512xf32> to vector<1x16xf32>
    %12 = vector.extract_strided_slice %6 {offsets = [0, 0], sizes = [1, 240], strides = [1, 1]} : vector<1x512xf32> to vector<1x240xf32>
    %13 = vector.extract_strided_slice %6 {offsets = [0, 272], sizes = [1, 16], strides = [1, 1]} : vector<1x512xf32> to vector<1x16xf32>
    %14 = vector.extract_strided_slice %6 {offsets = [0, 256], sizes = [1, 240], strides = [1, 1]} : vector<1x512xf32> to vector<1x240xf32>
    %15 = tpu.concatenate %11, %12, %13, %14 in 1 : vector<1x16xf32>, vector<1x240xf32>, vector<1x16xf32>, vector<1x240xf32> -> vector<1x512xf32>
    %16 = vector.extract_strided_slice %15 {offsets = [0, 1], sizes = [1, 511], strides = [1, 1]} : vector<1x512xf32> to vector<1x511xf32>
    %17 = vector.extract_strided_slice %15 {offsets = [0, 0], sizes = [1, 1], strides = [1, 1]} : vector<1x512xf32> to vector<1x1xf32>
    %18 = tpu.concatenate %16, %17 in 1 : vector<1x511xf32>, vector<1x1xf32> -> vector<1x512xf32>
    %19 = vector.extract_strided_slice %15 {offsets = [0, 511], sizes = [1, 1], strides = [1, 1]} : vector<1x512xf32> to vector<1x1xf32>
    %20 = vector.extract_strided_slice %15 {offsets = [0, 0], sizes = [1, 511], strides = [1, 1]} : vector<1x512xf32> to vector<1x511xf32>
    %21 = tpu.concatenate %19, %20 in 1 : vector<1x1xf32>, vector<1x511xf32> -> vector<1x512xf32>
    %22 = arith.select %2, %18, %21 : vector<1x512xi1>, vector<1x512xf32>
    %23 = vector.extract_strided_slice %15 {offsets = [0, 511], sizes = [1, 1], strides = [1, 1]} : vector<1x512xf32> to vector<1x1xf32>
    %24 = vector.extract_strided_slice %15 {offsets = [0, 0], sizes = [1, 511], strides = [1, 1]} : vector<1x512xf32> to vector<1x511xf32>
    %25 = tpu.concatenate %23, %24 in 1 : vector<1x1xf32>, vector<1x511xf32> -> vector<1x512xf32>
    %26 = vector.extract_strided_slice %15 {offsets = [0, 1], sizes = [1, 511], strides = [1, 1]} : vector<1x512xf32> to vector<1x511xf32>
    %27 = vector.extract_strided_slice %15 {offsets = [0, 0], sizes = [1, 1], strides = [1, 1]} : vector<1x512xf32> to vector<1x1xf32>
    %28 = tpu.concatenate %26, %27 in 1 : vector<1x511xf32>, vector<1x1xf32> -> vector<1x512xf32>
    %29 = arith.select %5, %25, %28 : vector<1x512xi1>, vector<1x512xf32>
    %30 = vector.extract_strided_slice %6 {offsets = [0, 1], sizes = [1, 511], strides = [1, 1]} : vector<1x512xf32> to vector<1x511xf32>
    %31 = vector.extract_strided_slice %6 {offsets = [0, 0], sizes = [1, 1], strides = [1, 1]} : vector<1x512xf32> to vector<1x1xf32>
    %32 = tpu.concatenate %30, %31 in 1 : vector<1x511xf32>, vector<1x1xf32> -> vector<1x512xf32>
    %33 = vector.extract_strided_slice %6 {offsets = [0, 511], sizes = [1, 1], strides = [1, 1]} : vector<1x512xf32> to vector<1x1xf32>
    %34 = vector.extract_strided_slice %6 {offsets = [0, 0], sizes = [1, 511], strides = [1, 1]} : vector<1x512xf32> to vector<1x511xf32>
    %35 = tpu.concatenate %33, %34 in 1 : vector<1x1xf32>, vector<1x511xf32> -> vector<1x512xf32>
    %36 = arith.select %2, %32, %35 : vector<1x512xi1>, vector<1x512xf32>
    %37 = vector.extract_strided_slice %6 {offsets = [0, 511], sizes = [1, 1], strides = [1, 1]} : vector<1x512xf32> to vector<1x1xf32>
    %38 = vector.extract_strided_slice %6 {offsets = [0, 0], sizes = [1, 511], strides = [1, 1]} : vector<1x512xf32> to vector<1x511xf32>
    %39 = tpu.concatenate %37, %38 in 1 : vector<1x1xf32>, vector<1x511xf32> -> vector<1x512xf32>
    %40 = vector.extract_strided_slice %6 {offsets = [0, 1], sizes = [1, 511], strides = [1, 1]} : vector<1x512xf32> to vector<1x511xf32>
    %41 = vector.extract_strided_slice %6 {offsets = [0, 0], sizes = [1, 1], strides = [1, 1]} : vector<1x512xf32> to vector<1x1xf32>
    %42 = tpu.concatenate %40, %41 in 1 : vector<1x511xf32>, vector<1x1xf32> -> vector<1x512xf32>
    %43 = arith.select %5, %39, %42 : vector<1x512xi1>, vector<1x512xf32>
    %44 = vector.extract_strided_slice %6 {offsets = [0, 16], sizes = [1, 240], strides = [1, 1]} : vector<1x512xf32> to vector<1x240xf32>
    %45 = vector.extract_strided_slice %6 {offsets = [0, 224], sizes = [1, 16], strides = [1, 1]} : vector<1x512xf32> to vector<1x16xf32>
    %46 = vector.extract_strided_slice %6 {offsets = [0, 272], sizes = [1, 240], strides = [1, 1]} : vector<1x512xf32> to vector<1x240xf32>
    %47 = vector.extract_strided_slice %6 {offsets = [0, 480], sizes = [1, 16], strides = [1, 1]} : vector<1x512xf32> to vector<1x16xf32>
    %48 = tpu.concatenate %44, %45, %46, %47 in 1 : vector<1x240xf32>, vector<1x16xf32>, vector<1x240xf32>, vector<1x16xf32> -> vector<1x512xf32>
    %49 = vector.extract_strided_slice %48 {offsets = [0, 1], sizes = [1, 511], strides = [1, 1]} : vector<1x512xf32> to vector<1x511xf32>
    %50 = vector.extract_strided_slice %48 {offsets = [0, 0], sizes = [1, 1], strides = [1, 1]} : vector<1x512xf32> to vector<1x1xf32>
    %51 = tpu.concatenate %49, %50 in 1 : vector<1x511xf32>, vector<1x1xf32> -> vector<1x512xf32>
    %52 = vector.extract_strided_slice %48 {offsets = [0, 511], sizes = [1, 1], strides = [1, 1]} : vector<1x512xf32> to vector<1x1xf32>
    %53 = vector.extract_strided_slice %48 {offsets = [0, 0], sizes = [1, 511], strides = [1, 1]} : vector<1x512xf32> to vector<1x511xf32>
    %54 = tpu.concatenate %52, %53 in 1 : vector<1x1xf32>, vector<1x511xf32> -> vector<1x512xf32>
    %55 = arith.select %2, %51, %54 : vector<1x512xi1>, vector<1x512xf32>
    %56 = vector.extract_strided_slice %48 {offsets = [0, 511], sizes = [1, 1], strides = [1, 1]} : vector<1x512xf32> to vector<1x1xf32>
    %57 = vector.extract_strided_slice %48 {offsets = [0, 0], sizes = [1, 511], strides = [1, 1]} : vector<1x512xf32> to vector<1x511xf32>
    %58 = tpu.concatenate %56, %57 in 1 : vector<1x1xf32>, vector<1x511xf32> -> vector<1x512xf32>
    %59 = vector.extract_strided_slice %48 {offsets = [0, 1], sizes = [1, 511], strides = [1, 1]} : vector<1x512xf32> to vector<1x511xf32>
    %60 = vector.extract_strided_slice %48 {offsets = [0, 0], sizes = [1, 1], strides = [1, 1]} : vector<1x512xf32> to vector<1x1xf32>
    %61 = tpu.concatenate %59, %60 in 1 : vector<1x511xf32>, vector<1x1xf32> -> vector<1x512xf32>
    %62 = arith.select %5, %58, %61 : vector<1x512xi1>, vector<1x512xf32>
    %63 = tpu.concatenate %22, %15, %29, %36, %6, %43, %55, %48, %62 in 0 : vector<1x512xf32>, vector<1x512xf32>, vector<1x512xf32>, vector<1x512xf32>, vector<1x512xf32>, vector<1x512xf32>, vector<1x512xf32>, vector<1x512xf32>, vector<1x512xf32> -> vector<9x512xf32>
    %cst_14 = arith.constant dense<0.000000e+00> : vector<4x512xf32>
    %64 = tpu.matmul %7, %63, %cst_14 {dimension_numbers = #tpu.dot_dimension_numbers<[1], [0], [0], [1], [0, 0, 1, 1], [], []>} : vector<4x9xf32>, vector<9x512xf32>, vector<4x512xf32> -> vector<4x512xf32>
    %65 = vector.broadcast %8 : vector<4x1xf32> to vector<4x512xf32>
    %66 = arith.addf %64, %65 : vector<4x512xf32>
    %cst_15 = arith.constant 0.000000e+00 : f32
    %67 = vector.broadcast %cst_15 : f32 to vector<4x512xf32>
    %68 = arith.maximumf %66, %67 : vector<4x512xf32>
    %cst_16 = arith.constant dense<0.000000e+00> : vector<4xf32>
    %69 = vector.multi_reduction <add>, %68, %cst_16 [1] : vector<4x512xf32> to vector<4xf32>
    %70 = vector.shape_cast %69 : vector<4xf32> to vector<4x1xf32>
    %cst_17 = arith.constant 0.001953125 : f32
    %71 = vector.broadcast %cst_17 : f32 to vector<4x1xf32>
    %72 = arith.mulf %70, %71 : vector<4x1xf32>
    %73 = arith.mulf %68, %68 : vector<4x512xf32>
    %cst_18 = arith.constant dense<0.000000e+00> : vector<4xf32>
    %74 = vector.multi_reduction <add>, %73, %cst_18 [1] : vector<4x512xf32> to vector<4xf32>
    %75 = vector.shape_cast %74 : vector<4xf32> to vector<4x1xf32>
    %cst_19 = arith.constant 0.001953125 : f32
    %76 = vector.broadcast %cst_19 : f32 to vector<4x1xf32>
    %77 = arith.mulf %75, %76 : vector<4x1xf32>
    %78 = arith.mulf %72, %72 : vector<4x1xf32>
    %79 = arith.subf %77, %78 : vector<4x1xf32>
    %80 = vector.broadcast %72 : vector<4x1xf32> to vector<4x512xf32>
    %81 = arith.subf %68, %80 : vector<4x512xf32>
    %cst_20 = arith.constant 9.99999974E-6 : f32
    %82 = vector.broadcast %cst_20 : f32 to vector<4x1xf32>
    %83 = arith.addf %79, %82 : vector<4x1xf32>
    %84 = math.rsqrt %83 : vector<4x1xf32>
    %85 = vector.broadcast %84 : vector<4x1xf32> to vector<4x512xf32>
    %86 = arith.mulf %81, %85 : vector<4x512xf32>
    %87 = vector.broadcast %9 : vector<4x1xf32> to vector<4x512xf32>
    %88 = arith.mulf %86, %87 : vector<4x512xf32>
    %89 = vector.broadcast %10 : vector<4x1xf32> to vector<4x512xf32>
    %90 = arith.addf %88, %89 : vector<4x512xf32>
    %c0_21 = arith.constant 0 : index
    %c0_22 = arith.constant 0 : index
    %91 = vector.load %arg7[%c0_21, %c0_22] : memref<8x36xf32, #tpu.memory_space<vmem>>, vector<8x36xf32>
    %c0_23 = arith.constant 0 : index
    %c0_24 = arith.constant 0 : index
    %92 = vector.load %arg8[%c0_23, %c0_24] : memref<8x1xf32, #tpu.memory_space<vmem>>, vector<8x1xf32>
    %c0_25 = arith.constant 0 : index
    %c0_26 = arith.constant 0 : index
    %93 = vector.load %arg9[%c0_25, %c0_26] : memref<8x1xf32, #tpu.memory_space<vmem>>, vector<8x1xf32>
    %c0_27 = arith.constant 0 : index
    %c0_28 = arith.constant 0 : index
    %94 = vector.load %arg10[%c0_27, %c0_28] : memref<8x1xf32, #tpu.memory_space<vmem>>, vector<8x1xf32>
    %95 = vector.extract_strided_slice %90 {offsets = [0, 16], sizes = [4, 16], strides = [1, 1]} : vector<4x512xf32> to vector<4x16xf32>
    %96 = vector.extract_strided_slice %90 {offsets = [0, 0], sizes = [4, 240], strides = [1, 1]} : vector<4x512xf32> to vector<4x240xf32>
    %97 = vector.extract_strided_slice %90 {offsets = [0, 272], sizes = [4, 16], strides = [1, 1]} : vector<4x512xf32> to vector<4x16xf32>
    %98 = vector.extract_strided_slice %90 {offsets = [0, 256], sizes = [4, 240], strides = [1, 1]} : vector<4x512xf32> to vector<4x240xf32>
    %99 = tpu.concatenate %95, %96, %97, %98 in 1 : vector<4x16xf32>, vector<4x240xf32>, vector<4x16xf32>, vector<4x240xf32> -> vector<4x512xf32>
    %100 = vector.extract_strided_slice %99 {offsets = [0, 1], sizes = [4, 511], strides = [1, 1]} : vector<4x512xf32> to vector<4x511xf32>
    %101 = vector.extract_strided_slice %99 {offsets = [0, 0], sizes = [4, 1], strides = [1, 1]} : vector<4x512xf32> to vector<4x1xf32>
    %102 = tpu.concatenate %100, %101 in 1 : vector<4x511xf32>, vector<4x1xf32> -> vector<4x512xf32>
    %103 = vector.extract_strided_slice %99 {offsets = [0, 511], sizes = [4, 1], strides = [1, 1]} : vector<4x512xf32> to vector<4x1xf32>
    %104 = vector.extract_strided_slice %99 {offsets = [0, 0], sizes = [4, 511], strides = [1, 1]} : vector<4x512xf32> to vector<4x511xf32>
    %105 = tpu.concatenate %103, %104 in 1 : vector<4x1xf32>, vector<4x511xf32> -> vector<4x512xf32>
    %106 = vector.shape_cast %2 : vector<1x512xi1> to vector<1x512xi1>
    %107 = vector.broadcast %106 : vector<1x512xi1> to vector<4x512xi1>
    %108 = arith.select %107, %102, %105 : vector<4x512xi1>, vector<4x512xf32>
    %109 = vector.extract_strided_slice %99 {offsets = [0, 511], sizes = [4, 1], strides = [1, 1]} : vector<4x512xf32> to vector<4x1xf32>
    %110 = vector.extract_strided_slice %99 {offsets = [0, 0], sizes = [4, 511], strides = [1, 1]} : vector<4x512xf32> to vector<4x511xf32>
    %111 = tpu.concatenate %109, %110 in 1 : vector<4x1xf32>, vector<4x511xf32> -> vector<4x512xf32>
    %112 = vector.extract_strided_slice %99 {offsets = [0, 1], sizes = [4, 511], strides = [1, 1]} : vector<4x512xf32> to vector<4x511xf32>
    %113 = vector.extract_strided_slice %99 {offsets = [0, 0], sizes = [4, 1], strides = [1, 1]} : vector<4x512xf32> to vector<4x1xf32>
    %114 = tpu.concatenate %112, %113 in 1 : vector<4x511xf32>, vector<4x1xf32> -> vector<4x512xf32>
    %115 = vector.shape_cast %5 : vector<1x512xi1> to vector<1x512xi1>
    %116 = vector.broadcast %115 : vector<1x512xi1> to vector<4x512xi1>
    %117 = arith.select %116, %111, %114 : vector<4x512xi1>, vector<4x512xf32>
    %118 = vector.extract_strided_slice %90 {offsets = [0, 1], sizes = [4, 511], strides = [1, 1]} : vector<4x512xf32> to vector<4x511xf32>
    %119 = vector.extract_strided_slice %90 {offsets = [0, 0], sizes = [4, 1], strides = [1, 1]} : vector<4x512xf32> to vector<4x1xf32>
    %120 = tpu.concatenate %118, %119 in 1 : vector<4x511xf32>, vector<4x1xf32> -> vector<4x512xf32>
    %121 = vector.extract_strided_slice %90 {offsets = [0, 511], sizes = [4, 1], strides = [1, 1]} : vector<4x512xf32> to vector<4x1xf32>
    %122 = vector.extract_strided_slice %90 {offsets = [0, 0], sizes = [4, 511], strides = [1, 1]} : vector<4x512xf32> to vector<4x511xf32>
    %123 = tpu.concatenate %121, %122 in 1 : vector<4x1xf32>, vector<4x511xf32> -> vector<4x512xf32>
    %124 = vector.shape_cast %2 : vector<1x512xi1> to vector<1x512xi1>
    %125 = vector.broadcast %124 : vector<1x512xi1> to vector<4x512xi1>
    %126 = arith.select %125, %120, %123 : vector<4x512xi1>, vector<4x512xf32>
    %127 = vector.extract_strided_slice %90 {offsets = [0, 511], sizes = [4, 1], strides = [1, 1]} : vector<4x512xf32> to vector<4x1xf32>
    %128 = vector.extract_strided_slice %90 {offsets = [0, 0], sizes = [4, 511], strides = [1, 1]} : vector<4x512xf32> to vector<4x511xf32>
    %129 = tpu.concatenate %127, %128 in 1 : vector<4x1xf32>, vector<4x511xf32> -> vector<4x512xf32>
    %130 = vector.extract_strided_slice %90 {offsets = [0, 1], sizes = [4, 511], strides = [1, 1]} : vector<4x512xf32> to vector<4x511xf32>
    %131 = vector.extract_strided_slice %90 {offsets = [0, 0], sizes = [4, 1], strides = [1, 1]} : vector<4x512xf32> to vector<4x1xf32>
    %132 = tpu.concatenate %130, %131 in 1 : vector<4x511xf32>, vector<4x1xf32> -> vector<4x512xf32>
    %133 = vector.shape_cast %5 : vector<1x512xi1> to vector<1x512xi1>
    %134 = vector.broadcast %133 : vector<1x512xi1> to vector<4x512xi1>
    %135 = arith.select %134, %129, %132 : vector<4x512xi1>, vector<4x512xf32>
    %136 = vector.extract_strided_slice %90 {offsets = [0, 16], sizes = [4, 240], strides = [1, 1]} : vector<4x512xf32> to vector<4x240xf32>
    %137 = vector.extract_strided_slice %90 {offsets = [0, 224], sizes = [4, 16], strides = [1, 1]} : vector<4x512xf32> to vector<4x16xf32>
    %138 = vector.extract_strided_slice %90 {offsets = [0, 272], sizes = [4, 240], strides = [1, 1]} : vector<4x512xf32> to vector<4x240xf32>
    %139 = vector.extract_strided_slice %90 {offsets = [0, 480], sizes = [4, 16], strides = [1, 1]} : vector<4x512xf32> to vector<4x16xf32>
    %140 = tpu.concatenate %136, %137, %138, %139 in 1 : vector<4x240xf32>, vector<4x16xf32>, vector<4x240xf32>, vector<4x16xf32> -> vector<4x512xf32>
    %141 = vector.extract_strided_slice %140 {offsets = [0, 1], sizes = [4, 511], strides = [1, 1]} : vector<4x512xf32> to vector<4x511xf32>
    %142 = vector.extract_strided_slice %140 {offsets = [0, 0], sizes = [4, 1], strides = [1, 1]} : vector<4x512xf32> to vector<4x1xf32>
    %143 = tpu.concatenate %141, %142 in 1 : vector<4x511xf32>, vector<4x1xf32> -> vector<4x512xf32>
    %144 = vector.extract_strided_slice %140 {offsets = [0, 511], sizes = [4, 1], strides = [1, 1]} : vector<4x512xf32> to vector<4x1xf32>
    %145 = vector.extract_strided_slice %140 {offsets = [0, 0], sizes = [4, 511], strides = [1, 1]} : vector<4x512xf32> to vector<4x511xf32>
    %146 = tpu.concatenate %144, %145 in 1 : vector<4x1xf32>, vector<4x511xf32> -> vector<4x512xf32>
    %147 = vector.shape_cast %2 : vector<1x512xi1> to vector<1x512xi1>
    %148 = vector.broadcast %147 : vector<1x512xi1> to vector<4x512xi1>
    %149 = arith.select %148, %143, %146 : vector<4x512xi1>, vector<4x512xf32>
    %150 = vector.extract_strided_slice %140 {offsets = [0, 511], sizes = [4, 1], strides = [1, 1]} : vector<4x512xf32> to vector<4x1xf32>
    %151 = vector.extract_strided_slice %140 {offsets = [0, 0], sizes = [4, 511], strides = [1, 1]} : vector<4x512xf32> to vector<4x511xf32>
    %152 = tpu.concatenate %150, %151 in 1 : vector<4x1xf32>, vector<4x511xf32> -> vector<4x512xf32>
    %153 = vector.extract_strided_slice %140 {offsets = [0, 1], sizes = [4, 511], strides = [1, 1]} : vector<4x512xf32> to vector<4x511xf32>
    %154 = vector.extract_strided_slice %140 {offsets = [0, 0], sizes = [4, 1], strides = [1, 1]} : vector<4x512xf32> to vector<4x1xf32>
    %155 = tpu.concatenate %153, %154 in 1 : vector<4x511xf32>, vector<4x1xf32> -> vector<4x512xf32>
    %156 = vector.shape_cast %5 : vector<1x512xi1> to vector<1x512xi1>
    %157 = vector.broadcast %156 : vector<1x512xi1> to vector<4x512xi1>
    %158 = arith.select %157, %152, %155 : vector<4x512xi1>, vector<4x512xf32>
    %159 = tpu.concatenate %108, %99, %117, %126, %90, %135, %149, %140, %158 in 0 : vector<4x512xf32>, vector<4x512xf32>, vector<4x512xf32>, vector<4x512xf32>, vector<4x512xf32>, vector<4x512xf32>, vector<4x512xf32>, vector<4x512xf32>, vector<4x512xf32> -> vector<36x512xf32>
    %cst_29 = arith.constant dense<0.000000e+00> : vector<8x512xf32>
    %160 = tpu.matmul %91, %159, %cst_29 {dimension_numbers = #tpu.dot_dimension_numbers<[1], [0], [0], [1], [0, 0, 1, 1], [], []>} : vector<8x36xf32>, vector<36x512xf32>, vector<8x512xf32> -> vector<8x512xf32>
    %161 = vector.broadcast %92 : vector<8x1xf32> to vector<8x512xf32>
    %162 = arith.addf %160, %161 : vector<8x512xf32>
    %cst_30 = arith.constant 0.000000e+00 : f32
    %163 = vector.broadcast %cst_30 : f32 to vector<8x512xf32>
    %164 = arith.maximumf %162, %163 : vector<8x512xf32>
    %cst_31 = arith.constant dense<0.000000e+00> : vector<8xf32>
    %165 = vector.multi_reduction <add>, %164, %cst_31 [1] : vector<8x512xf32> to vector<8xf32>
    %166 = vector.shape_cast %165 : vector<8xf32> to vector<8x1xf32>
    %cst_32 = arith.constant 0.001953125 : f32
    %167 = vector.broadcast %cst_32 : f32 to vector<8x1xf32>
    %168 = arith.mulf %166, %167 : vector<8x1xf32>
    %169 = arith.mulf %164, %164 : vector<8x512xf32>
    %cst_33 = arith.constant dense<0.000000e+00> : vector<8xf32>
    %170 = vector.multi_reduction <add>, %169, %cst_33 [1] : vector<8x512xf32> to vector<8xf32>
    %171 = vector.shape_cast %170 : vector<8xf32> to vector<8x1xf32>
    %cst_34 = arith.constant 0.001953125 : f32
    %172 = vector.broadcast %cst_34 : f32 to vector<8x1xf32>
    %173 = arith.mulf %171, %172 : vector<8x1xf32>
    %174 = arith.mulf %168, %168 : vector<8x1xf32>
    %175 = arith.subf %173, %174 : vector<8x1xf32>
    %176 = vector.broadcast %168 : vector<8x1xf32> to vector<8x512xf32>
    %177 = arith.subf %164, %176 : vector<8x512xf32>
    %cst_35 = arith.constant 9.99999974E-6 : f32
    %178 = vector.broadcast %cst_35 : f32 to vector<8x1xf32>
    %179 = arith.addf %175, %178 : vector<8x1xf32>
    %180 = math.rsqrt %179 : vector<8x1xf32>
    %181 = vector.broadcast %180 : vector<8x1xf32> to vector<8x512xf32>
    %182 = arith.mulf %177, %181 : vector<8x512xf32>
    %183 = vector.broadcast %93 : vector<8x1xf32> to vector<8x512xf32>
    %184 = arith.mulf %182, %183 : vector<8x512xf32>
    %185 = vector.broadcast %94 : vector<8x1xf32> to vector<8x512xf32>
    %186 = arith.addf %184, %185 : vector<8x512xf32>
    %c0_36 = arith.constant 0 : index
    %c0_37 = arith.constant 0 : index
    %187 = vector.load %arg11[%c0_36, %c0_37] : memref<8x72xf32, #tpu.memory_space<vmem>>, vector<8x72xf32>
    %c0_38 = arith.constant 0 : index
    %c0_39 = arith.constant 0 : index
    %188 = vector.load %arg12[%c0_38, %c0_39] : memref<8x1xf32, #tpu.memory_space<vmem>>, vector<8x1xf32>
    %c0_40 = arith.constant 0 : index
    %c0_41 = arith.constant 0 : index
    %189 = vector.load %arg13[%c0_40, %c0_41] : memref<8x1xf32, #tpu.memory_space<vmem>>, vector<8x1xf32>
    %c0_42 = arith.constant 0 : index
    %c0_43 = arith.constant 0 : index
    %190 = vector.load %arg14[%c0_42, %c0_43] : memref<8x1xf32, #tpu.memory_space<vmem>>, vector<8x1xf32>
    %191 = vector.extract_strided_slice %186 {offsets = [0, 16], sizes = [8, 16], strides = [1, 1]} : vector<8x512xf32> to vector<8x16xf32>
    %192 = vector.extract_strided_slice %186 {offsets = [0, 0], sizes = [8, 240], strides = [1, 1]} : vector<8x512xf32> to vector<8x240xf32>
    %193 = vector.extract_strided_slice %186 {offsets = [0, 272], sizes = [8, 16], strides = [1, 1]} : vector<8x512xf32> to vector<8x16xf32>
    %194 = vector.extract_strided_slice %186 {offsets = [0, 256], sizes = [8, 240], strides = [1, 1]} : vector<8x512xf32> to vector<8x240xf32>
    %195 = tpu.concatenate %191, %192, %193, %194 in 1 : vector<8x16xf32>, vector<8x240xf32>, vector<8x16xf32>, vector<8x240xf32> -> vector<8x512xf32>
    %196 = vector.extract_strided_slice %195 {offsets = [0, 1], sizes = [8, 511], strides = [1, 1]} : vector<8x512xf32> to vector<8x511xf32>
    %197 = vector.extract_strided_slice %195 {offsets = [0, 0], sizes = [8, 1], strides = [1, 1]} : vector<8x512xf32> to vector<8x1xf32>
    %198 = tpu.concatenate %196, %197 in 1 : vector<8x511xf32>, vector<8x1xf32> -> vector<8x512xf32>
    %199 = vector.extract_strided_slice %195 {offsets = [0, 511], sizes = [8, 1], strides = [1, 1]} : vector<8x512xf32> to vector<8x1xf32>
    %200 = vector.extract_strided_slice %195 {offsets = [0, 0], sizes = [8, 511], strides = [1, 1]} : vector<8x512xf32> to vector<8x511xf32>
    %201 = tpu.concatenate %199, %200 in 1 : vector<8x1xf32>, vector<8x511xf32> -> vector<8x512xf32>
    %202 = vector.shape_cast %2 : vector<1x512xi1> to vector<1x512xi1>
    %203 = vector.broadcast %202 : vector<1x512xi1> to vector<8x512xi1>
    %204 = arith.select %203, %198, %201 : vector<8x512xi1>, vector<8x512xf32>
    %205 = vector.extract_strided_slice %195 {offsets = [0, 511], sizes = [8, 1], strides = [1, 1]} : vector<8x512xf32> to vector<8x1xf32>
    %206 = vector.extract_strided_slice %195 {offsets = [0, 0], sizes = [8, 511], strides = [1, 1]} : vector<8x512xf32> to vector<8x511xf32>
    %207 = tpu.concatenate %205, %206 in 1 : vector<8x1xf32>, vector<8x511xf32> -> vector<8x512xf32>
    %208 = vector.extract_strided_slice %195 {offsets = [0, 1], sizes = [8, 511], strides = [1, 1]} : vector<8x512xf32> to vector<8x511xf32>
    %209 = vector.extract_strided_slice %195 {offsets = [0, 0], sizes = [8, 1], strides = [1, 1]} : vector<8x512xf32> to vector<8x1xf32>
    %210 = tpu.concatenate %208, %209 in 1 : vector<8x511xf32>, vector<8x1xf32> -> vector<8x512xf32>
    %211 = vector.shape_cast %5 : vector<1x512xi1> to vector<1x512xi1>
    %212 = vector.broadcast %211 : vector<1x512xi1> to vector<8x512xi1>
    %213 = arith.select %212, %207, %210 : vector<8x512xi1>, vector<8x512xf32>
    %214 = vector.extract_strided_slice %186 {offsets = [0, 1], sizes = [8, 511], strides = [1, 1]} : vector<8x512xf32> to vector<8x511xf32>
    %215 = vector.extract_strided_slice %186 {offsets = [0, 0], sizes = [8, 1], strides = [1, 1]} : vector<8x512xf32> to vector<8x1xf32>
    %216 = tpu.concatenate %214, %215 in 1 : vector<8x511xf32>, vector<8x1xf32> -> vector<8x512xf32>
    %217 = vector.extract_strided_slice %186 {offsets = [0, 511], sizes = [8, 1], strides = [1, 1]} : vector<8x512xf32> to vector<8x1xf32>
    %218 = vector.extract_strided_slice %186 {offsets = [0, 0], sizes = [8, 511], strides = [1, 1]} : vector<8x512xf32> to vector<8x511xf32>
    %219 = tpu.concatenate %217, %218 in 1 : vector<8x1xf32>, vector<8x511xf32> -> vector<8x512xf32>
    %220 = vector.shape_cast %2 : vector<1x512xi1> to vector<1x512xi1>
    %221 = vector.broadcast %220 : vector<1x512xi1> to vector<8x512xi1>
    %222 = arith.select %221, %216, %219 : vector<8x512xi1>, vector<8x512xf32>
    %223 = vector.extract_strided_slice %186 {offsets = [0, 511], sizes = [8, 1], strides = [1, 1]} : vector<8x512xf32> to vector<8x1xf32>
    %224 = vector.extract_strided_slice %186 {offsets = [0, 0], sizes = [8, 511], strides = [1, 1]} : vector<8x512xf32> to vector<8x511xf32>
    %225 = tpu.concatenate %223, %224 in 1 : vector<8x1xf32>, vector<8x511xf32> -> vector<8x512xf32>
    %226 = vector.extract_strided_slice %186 {offsets = [0, 1], sizes = [8, 511], strides = [1, 1]} : vector<8x512xf32> to vector<8x511xf32>
    %227 = vector.extract_strided_slice %186 {offsets = [0, 0], sizes = [8, 1], strides = [1, 1]} : vector<8x512xf32> to vector<8x1xf32>
    %228 = tpu.concatenate %226, %227 in 1 : vector<8x511xf32>, vector<8x1xf32> -> vector<8x512xf32>
    %229 = vector.shape_cast %5 : vector<1x512xi1> to vector<1x512xi1>
    %230 = vector.broadcast %229 : vector<1x512xi1> to vector<8x512xi1>
    %231 = arith.select %230, %225, %228 : vector<8x512xi1>, vector<8x512xf32>
    %232 = vector.extract_strided_slice %186 {offsets = [0, 16], sizes = [8, 240], strides = [1, 1]} : vector<8x512xf32> to vector<8x240xf32>
    %233 = vector.extract_strided_slice %186 {offsets = [0, 224], sizes = [8, 16], strides = [1, 1]} : vector<8x512xf32> to vector<8x16xf32>
    %234 = vector.extract_strided_slice %186 {offsets = [0, 272], sizes = [8, 240], strides = [1, 1]} : vector<8x512xf32> to vector<8x240xf32>
    %235 = vector.extract_strided_slice %186 {offsets = [0, 480], sizes = [8, 16], strides = [1, 1]} : vector<8x512xf32> to vector<8x16xf32>
    %236 = tpu.concatenate %232, %233, %234, %235 in 1 : vector<8x240xf32>, vector<8x16xf32>, vector<8x240xf32>, vector<8x16xf32> -> vector<8x512xf32>
    %237 = vector.extract_strided_slice %236 {offsets = [0, 1], sizes = [8, 511], strides = [1, 1]} : vector<8x512xf32> to vector<8x511xf32>
    %238 = vector.extract_strided_slice %236 {offsets = [0, 0], sizes = [8, 1], strides = [1, 1]} : vector<8x512xf32> to vector<8x1xf32>
    %239 = tpu.concatenate %237, %238 in 1 : vector<8x511xf32>, vector<8x1xf32> -> vector<8x512xf32>
    %240 = vector.extract_strided_slice %236 {offsets = [0, 511], sizes = [8, 1], strides = [1, 1]} : vector<8x512xf32> to vector<8x1xf32>
    %241 = vector.extract_strided_slice %236 {offsets = [0, 0], sizes = [8, 511], strides = [1, 1]} : vector<8x512xf32> to vector<8x511xf32>
    %242 = tpu.concatenate %240, %241 in 1 : vector<8x1xf32>, vector<8x511xf32> -> vector<8x512xf32>
    %243 = vector.shape_cast %2 : vector<1x512xi1> to vector<1x512xi1>
    %244 = vector.broadcast %243 : vector<1x512xi1> to vector<8x512xi1>
    %245 = arith.select %244, %239, %242 : vector<8x512xi1>, vector<8x512xf32>
    %246 = vector.extract_strided_slice %236 {offsets = [0, 511], sizes = [8, 1], strides = [1, 1]} : vector<8x512xf32> to vector<8x1xf32>
    %247 = vector.extract_strided_slice %236 {offsets = [0, 0], sizes = [8, 511], strides = [1, 1]} : vector<8x512xf32> to vector<8x511xf32>
    %248 = tpu.concatenate %246, %247 in 1 : vector<8x1xf32>, vector<8x511xf32> -> vector<8x512xf32>
    %249 = vector.extract_strided_slice %236 {offsets = [0, 1], sizes = [8, 511], strides = [1, 1]} : vector<8x512xf32> to vector<8x511xf32>
    %250 = vector.extract_strided_slice %236 {offsets = [0, 0], sizes = [8, 1], strides = [1, 1]} : vector<8x512xf32> to vector<8x1xf32>
    %251 = tpu.concatenate %249, %250 in 1 : vector<8x511xf32>, vector<8x1xf32> -> vector<8x512xf32>
    %252 = vector.shape_cast %5 : vector<1x512xi1> to vector<1x512xi1>
    %253 = vector.broadcast %252 : vector<1x512xi1> to vector<8x512xi1>
    %254 = arith.select %253, %248, %251 : vector<8x512xi1>, vector<8x512xf32>
    %255 = tpu.concatenate %204, %195, %213, %222, %186, %231, %245, %236, %254 in 0 : vector<8x512xf32>, vector<8x512xf32>, vector<8x512xf32>, vector<8x512xf32>, vector<8x512xf32>, vector<8x512xf32>, vector<8x512xf32>, vector<8x512xf32>, vector<8x512xf32> -> vector<72x512xf32>
    %cst_44 = arith.constant dense<0.000000e+00> : vector<8x512xf32>
    %256 = tpu.matmul %187, %255, %cst_44 {dimension_numbers = #tpu.dot_dimension_numbers<[1], [0], [0], [1], [0, 0, 1, 1], [], []>} : vector<8x72xf32>, vector<72x512xf32>, vector<8x512xf32> -> vector<8x512xf32>
    %257 = vector.broadcast %188 : vector<8x1xf32> to vector<8x512xf32>
    %258 = arith.addf %256, %257 : vector<8x512xf32>
    %cst_45 = arith.constant 0.000000e+00 : f32
    %259 = vector.broadcast %cst_45 : f32 to vector<8x512xf32>
    %260 = arith.maximumf %258, %259 : vector<8x512xf32>
    %cst_46 = arith.constant dense<0.000000e+00> : vector<8xf32>
    %261 = vector.multi_reduction <add>, %260, %cst_46 [1] : vector<8x512xf32> to vector<8xf32>
    %262 = vector.shape_cast %261 : vector<8xf32> to vector<8x1xf32>
    %cst_47 = arith.constant 0.001953125 : f32
    %263 = vector.broadcast %cst_47 : f32 to vector<8x1xf32>
    %264 = arith.mulf %262, %263 : vector<8x1xf32>
    %265 = arith.mulf %260, %260 : vector<8x512xf32>
    %cst_48 = arith.constant dense<0.000000e+00> : vector<8xf32>
    %266 = vector.multi_reduction <add>, %265, %cst_48 [1] : vector<8x512xf32> to vector<8xf32>
    %267 = vector.shape_cast %266 : vector<8xf32> to vector<8x1xf32>
    %cst_49 = arith.constant 0.001953125 : f32
    %268 = vector.broadcast %cst_49 : f32 to vector<8x1xf32>
    %269 = arith.mulf %267, %268 : vector<8x1xf32>
    %270 = arith.mulf %264, %264 : vector<8x1xf32>
    %271 = arith.subf %269, %270 : vector<8x1xf32>
    %272 = vector.broadcast %264 : vector<8x1xf32> to vector<8x512xf32>
    %273 = arith.subf %260, %272 : vector<8x512xf32>
    %cst_50 = arith.constant 9.99999974E-6 : f32
    %274 = vector.broadcast %cst_50 : f32 to vector<8x1xf32>
    %275 = arith.addf %271, %274 : vector<8x1xf32>
    %276 = math.rsqrt %275 : vector<8x1xf32>
    %277 = vector.broadcast %276 : vector<8x1xf32> to vector<8x512xf32>
    %278 = arith.mulf %273, %277 : vector<8x512xf32>
    %279 = vector.broadcast %189 : vector<8x1xf32> to vector<8x512xf32>
    %280 = arith.mulf %278, %279 : vector<8x512xf32>
    %281 = vector.broadcast %190 : vector<8x1xf32> to vector<8x512xf32>
    %282 = arith.addf %280, %281 : vector<8x512xf32>
    %283 = vector.extract_strided_slice %282 {offsets = [0, 0], sizes = [1, 256], strides = [1, 1]} : vector<8x512xf32> to vector<1x256xf32>
    %284 = vector.extract_strided_slice %282 {offsets = [1, 0], sizes = [1, 256], strides = [1, 1]} : vector<8x512xf32> to vector<1x256xf32>
    %285 = vector.extract_strided_slice %282 {offsets = [2, 0], sizes = [1, 256], strides = [1, 1]} : vector<8x512xf32> to vector<1x256xf32>
    %286 = vector.extract_strided_slice %282 {offsets = [3, 0], sizes = [1, 256], strides = [1, 1]} : vector<8x512xf32> to vector<1x256xf32>
    %287 = vector.extract_strided_slice %282 {offsets = [4, 0], sizes = [1, 256], strides = [1, 1]} : vector<8x512xf32> to vector<1x256xf32>
    %288 = vector.extract_strided_slice %282 {offsets = [5, 0], sizes = [1, 256], strides = [1, 1]} : vector<8x512xf32> to vector<1x256xf32>
    %289 = vector.extract_strided_slice %282 {offsets = [6, 0], sizes = [1, 256], strides = [1, 1]} : vector<8x512xf32> to vector<1x256xf32>
    %290 = vector.extract_strided_slice %282 {offsets = [7, 0], sizes = [1, 256], strides = [1, 1]} : vector<8x512xf32> to vector<1x256xf32>
    %291 = tpu.concatenate %283, %284, %285, %286, %287, %288, %289, %290 in 1 : vector<1x256xf32>, vector<1x256xf32>, vector<1x256xf32>, vector<1x256xf32>, vector<1x256xf32>, vector<1x256xf32>, vector<1x256xf32>, vector<1x256xf32> -> vector<1x2048xf32>
    %292 = vector.extract_strided_slice %282 {offsets = [0, 256], sizes = [1, 256], strides = [1, 1]} : vector<8x512xf32> to vector<1x256xf32>
    %293 = vector.extract_strided_slice %282 {offsets = [1, 256], sizes = [1, 256], strides = [1, 1]} : vector<8x512xf32> to vector<1x256xf32>
    %294 = vector.extract_strided_slice %282 {offsets = [2, 256], sizes = [1, 256], strides = [1, 1]} : vector<8x512xf32> to vector<1x256xf32>
    %295 = vector.extract_strided_slice %282 {offsets = [3, 256], sizes = [1, 256], strides = [1, 1]} : vector<8x512xf32> to vector<1x256xf32>
    %296 = vector.extract_strided_slice %282 {offsets = [4, 256], sizes = [1, 256], strides = [1, 1]} : vector<8x512xf32> to vector<1x256xf32>
    %297 = vector.extract_strided_slice %282 {offsets = [5, 256], sizes = [1, 256], strides = [1, 1]} : vector<8x512xf32> to vector<1x256xf32>
    %298 = vector.extract_strided_slice %282 {offsets = [6, 256], sizes = [1, 256], strides = [1, 1]} : vector<8x512xf32> to vector<1x256xf32>
    %299 = vector.extract_strided_slice %282 {offsets = [7, 256], sizes = [1, 256], strides = [1, 1]} : vector<8x512xf32> to vector<1x256xf32>
    %300 = tpu.concatenate %292, %293, %294, %295, %296, %297, %298, %299 in 1 : vector<1x256xf32>, vector<1x256xf32>, vector<1x256xf32>, vector<1x256xf32>, vector<1x256xf32>, vector<1x256xf32>, vector<1x256xf32>, vector<1x256xf32> -> vector<1x2048xf32>
    %301 = tpu.concatenate %291, %300 in 0 : vector<1x2048xf32>, vector<1x2048xf32> -> vector<2x2048xf32>
    %302 = arith.truncf %301 : vector<2x2048xf32> to vector<2x2048xbf16>
    %c0_51 = arith.constant 0 : index
    %c0_52 = arith.constant 0 : index
    %303 = vector.load %arg15[%c0_51, %c0_52] : memref<2048x128xbf16, #tpu.memory_space<vmem>>, vector<2048x128xbf16>
    %cst_53 = arith.constant dense<0.000000e+00> : vector<2x128xf32>
    %304 = tpu.matmul %302, %303, %cst_53 {dimension_numbers = #tpu.dot_dimension_numbers<[1], [0], [0], [1], [0, 0, 1, 1], [], []>} : vector<2x2048xbf16>, vector<2048x128xbf16>, vector<2x128xf32> -> vector<2x128xf32>
    %c0_54 = arith.constant 0 : index
    %c0_55 = arith.constant 0 : index
    %305 = vector.load %arg16[%c0_54, %c0_55] : memref<1x128xf32, #tpu.memory_space<vmem>>, vector<1x128xf32>
    %306 = vector.broadcast %305 : vector<1x128xf32> to vector<2x128xf32>
    %307 = arith.addf %304, %306 : vector<2x128xf32>
    %cst_56 = arith.constant 0.000000e+00 : f32
    %308 = vector.broadcast %cst_56 : f32 to vector<2x128xf32>
    %309 = arith.maximumf %307, %308 : vector<2x128xf32>
    %310 = arith.truncf %309 : vector<2x128xf32> to vector<2x128xbf16>
    %c0_57 = arith.constant 0 : index
    %c0_58 = arith.constant 0 : index
    %311 = vector.load %arg17[%c0_57, %c0_58] : memref<128x128xbf16, #tpu.memory_space<vmem>>, vector<128x128xbf16>
    %cst_59 = arith.constant dense<0.000000e+00> : vector<2x128xf32>
    %312 = tpu.matmul %310, %311, %cst_59 {dimension_numbers = #tpu.dot_dimension_numbers<[1], [0], [0], [1], [0, 0, 1, 1], [], []>} : vector<2x128xbf16>, vector<128x128xbf16>, vector<2x128xf32> -> vector<2x128xf32>
    %c0_60 = arith.constant 0 : index
    %c0_61 = arith.constant 0 : index
    %313 = vector.load %arg18[%c0_60, %c0_61] : memref<1x128xf32, #tpu.memory_space<vmem>>, vector<1x128xf32>
    %314 = vector.broadcast %313 : vector<1x128xf32> to vector<2x128xf32>
    %315 = arith.addf %312, %314 : vector<2x128xf32>
    %cst_62 = arith.constant 0.000000e+00 : f32
    %316 = vector.broadcast %cst_62 : f32 to vector<2x128xf32>
    %317 = arith.maximumf %315, %316 : vector<2x128xf32>
    %318 = arith.truncf %317 : vector<2x128xf32> to vector<2x128xbf16>
    %c0_63 = arith.constant 0 : index
    %c0_64 = arith.constant 0 : index
    %319 = vector.load %arg19[%c0_63, %c0_64] : memref<128x128xbf16, #tpu.memory_space<vmem>>, vector<128x128xbf16>
    %cst_65 = arith.constant dense<0.000000e+00> : vector<2x128xf32>
    %320 = tpu.matmul %318, %319, %cst_65 {dimension_numbers = #tpu.dot_dimension_numbers<[1], [0], [0], [1], [0, 0, 1, 1], [], []>} : vector<2x128xbf16>, vector<128x128xbf16>, vector<2x128xf32> -> vector<2x128xf32>
    %c0_66 = arith.constant 0 : index
    %c0_67 = arith.constant 0 : index
    %321 = vector.load %arg20[%c0_66, %c0_67] : memref<1x128xf32, #tpu.memory_space<vmem>>, vector<1x128xf32>
    %322 = vector.broadcast %321 : vector<1x128xf32> to vector<2x128xf32>
    %323 = arith.addf %320, %322 : vector<2x128xf32>
    %324 = arith.truncf %323 : vector<2x128xf32> to vector<2x128xbf16>
    %c0_68 = arith.constant 0 : index
    %c0_69 = arith.constant 0 : index
    %325 = vector.load %arg21[%c0_68, %c0_69] : memref<128x128xbf16, #tpu.memory_space<vmem>>, vector<128x128xbf16>
    %cst_70 = arith.constant dense<0.000000e+00> : vector<2x128xf32>
    %326 = tpu.matmul %324, %325, %cst_70 {dimension_numbers = #tpu.dot_dimension_numbers<[1], [0], [0], [1], [0, 0, 1, 1], [], []>} : vector<2x128xbf16>, vector<128x128xbf16>, vector<2x128xf32> -> vector<2x128xf32>
    %c0_71 = arith.constant 0 : index
    %c0_72 = arith.constant 0 : index
    %327 = vector.load %arg22[%c0_71, %c0_72] : memref<1x128xf32, #tpu.memory_space<vmem>>, vector<1x128xf32>
    %328 = vector.broadcast %327 : vector<1x128xf32> to vector<2x128xf32>
    %329 = arith.addf %326, %328 : vector<2x128xf32>
    %330 = tpu.iota {dimensions = array<i32: 1>} : vector<2x128xi32>
    %c2_i32 = arith.constant 2 : i32
    %331 = vector.broadcast %c2_i32 : i32 to vector<2x128xi32>
    %332 = arith.cmpi slt, %330, %331 : vector<2x128xi32>
    %cst_73 = arith.constant -1.000000e+30 : f32
    %333 = vector.broadcast %cst_73 : f32 to vector<2x128xf32>
    %334 = arith.select %332, %329, %333 : vector<2x128xi1>, vector<2x128xf32>
    %cst_74 = arith.constant dense<0xFF800000> : vector<2xf32>
    %335 = vector.multi_reduction <maximumf>, %334, %cst_74 [1] : vector<2x128xf32> to vector<2xf32>
    %336 = vector.shape_cast %335 : vector<2xf32> to vector<2x1xf32>
    %337 = vector.broadcast %336 : vector<2x1xf32> to vector<2x128xf32>
    %338 = arith.subf %334, %337 : vector<2x128xf32>
    %339 = math.exp %338 : vector<2x128xf32>
    %cst_75 = arith.constant dense<0.000000e+00> : vector<2xf32>
    %340 = vector.multi_reduction <add>, %339, %cst_75 [1] : vector<2x128xf32> to vector<2xf32>
    %341 = vector.shape_cast %340 : vector<2xf32> to vector<2x1xf32>
    %342 = vector.broadcast %341 : vector<2x1xf32> to vector<2x128xf32>
    %343 = arith.divf %339, %342 : vector<2x128xf32>
    %c0_76 = arith.constant 0 : index
    %c0_77 = arith.constant 0 : index
    %344 = vector.load %arg23[%c0_76, %c0_77] : memref<2x128xf32, #tpu.memory_space<vmem>>, vector<2x128xf32>
    tpu.vector_store %arg23[%c0_76, %c0_77], %323 {strides = array<i32>} : memref<2x128xf32, #tpu.memory_space<vmem>>, vector<2x128xf32>,
    %c0_78 = arith.constant 0 : index
    %c0_79 = arith.constant 0 : index
    %345 = vector.load %arg24[%c0_78, %c0_79] : memref<2x128xf32, #tpu.memory_space<vmem>>, vector<2x128xf32>
    tpu.vector_store %arg24[%c0_78, %c0_79], %329 {strides = array<i32>} : memref<2x128xf32, #tpu.memory_space<vmem>>, vector<2x128xf32>,
    %c0_80 = arith.constant 0 : index
    %c0_81 = arith.constant 0 : index
    %346 = vector.load %arg25[%c0_80, %c0_81] : memref<2x128xf32, #tpu.memory_space<vmem>>, vector<2x128xf32>
    tpu.vector_store %arg25[%c0_80, %c0_81], %343 {strides = array<i32>} : memref<2x128xf32, #tpu.memory_space<vmem>>, vector<2x128xf32>,
    return
  }
}

</mosaic_0001>

<bundles_post_ra>
// kernel: siamese_forward.1
= control target key start
LH: loop header
LB: loop body
LE: loop exit
PB: predicated region body
PF: predicated region fallthrough
CT: control target
= control target key end

     0   :  { %s5827_s0 = inlined_call_operand.vmem [shape: f32[1,512], index: 0, kind: input, shape index: {}]   ;;  %s5828_s1 = inlined_call_operand.vmem [shape: f32[1,512], index: 1, kind: input, shape index: {}]   ;;  %s5829_s2 = inlined_call_operand.vmem [shape: f32[1,512], index: 2, kind: input, shape index: {}]   ;;  %s5830_s3 = inlined_call_operand.hbm [shape: f32[4,9], index: 3, kind: input, shape index: {}]   ;;  %s5831_s4 = inlined_call_operand.vmem [shape: f32[4,1], index: 4, kind: input, shape index: {}]   ;;  %s5832_s5 = inlined_call_operand.vmem [shape: f32[4,1], index: 5, kind: input, shape index: {}]   ;;  %s5833_s6 = inlined_call_operand.vmem [shape: f32[4,1], index: 6, kind: input, shape index: {}]   ;;  %s5834_s7 = inlined_call_operand.hbm [shape: f32[8,36], index: 7, kind: input, shape index: {}]   ;;  %s5835_s8 = inlined_call_operand.vmem [shape: f32[8,1], index: 8, kind: input, shape index: {}]   ;;  %s5836_s9 = inlined_call_operand.vmem [shape: f32[8,1], index: 9, kind: input, shape index: {}]   ;;  %s5837_s10 = inlined_call_operand.vmem [shape: f32[8,1], index: 10, kind: input, shape index: {}]   ;;  %s5838_s11 = inlined_call_operand.hbm [shape: f32[8,72], index: 11, kind: input, shape index: {}]   ;;  %s5839_s12 = inlined_call_operand.vmem [shape: f32[8,1], index: 12, kind: input, shape index: {}]   ;;  %s5840_s13 = inlined_call_operand.vmem [shape: f32[8,1], index: 13, kind: input, shape index: {}]   ;;  %s5841_s14 = inlined_call_operand.vmem [shape: f32[8,1], index: 14, kind: input, shape index: {}]   ;;  %s5842_s15 = inlined_call_operand.hbm [shape: bf16[2048,128], index: 15, kind: input, shape index: {}]   ;;  %s5843_s16 = inlined_call_operand.hbm [shape: f32[1,128], index: 16, kind: input, shape index: {}]   ;;  %s5844_s17 = inlined_call_operand.vmem [shape: bf16[128,128], index: 17, kind: input, shape index: {}]   ;;  %s5845_s18 = inlined_call_operand.hbm [shape: f32[1,128], index: 18, kind: input, shape index: {}]   ;;  %s5846_s19 = inlined_call_operand.vmem [shape: bf16[128,128], index: 19, kind: input, shape index: {}]   ;;  %s5847_s20 = inlined_call_operand.hbm [shape: f32[1,128], index: 20, kind: input, shape index: {}]   ;;  %s5848_s21 = inlined_call_operand.vmem [shape: bf16[128,128], index: 21, kind: input, shape index: {}]   ;;  %s5849_s22 = inlined_call_operand.vmem [shape: f32[1,128], index: 22, kind: input, shape index: {}]   ;;  %s5850_s23 = inlined_call_operand.hbm [shape: f32[2,128], index: 23, kind: output, shape index: {0}]   ;;  %s5851_s24 = inlined_call_operand.hbm [shape: f32[2,128], index: 24, kind: output, shape index: {1}]   ;;  %s5852_s25 = inlined_call_operand.hbm [shape: f32[2,128], index: 25, kind: output, shape index: {2}]  }
   0x1   :  { %5856 = sst [smem:[#allocation24_spill]] %s5827_s0 }
   0x2   :  { %5857 = sst [smem:[#allocation25_spill]] %s5828_s1 }
   0x3   :  { %5858 = sst [smem:[#allocation26_spill]] %s5829_s2 }
   0x4   :  { %5859 = sst [smem:[#allocation27_spill]] %s5830_s3 }
   0x5   :  { %5860 = sst [smem:[#allocation28_spill]] %s5831_s4 }
   0x6   :  { %5861 = sst [smem:[#allocation29_spill]] %s5832_s5 }
   0x7   :  { %5862 = sst [smem:[#allocation30_spill]] %s5833_s6 }
   0x8   :  { %5863 = sst [smem:[#allocation31_spill]] %s5834_s7 }
   0x9   :  { %5864 = sst [smem:[#allocation32_spill]] %s5835_s8 }
   0xa   :  { %5865 = sst [smem:[#allocation33_spill]] %s5836_s9 }
   0xb   :  { %5866 = sst [smem:[#allocation34_spill]] %s5852_s25 }
   0xc   :  { %31 = vsyncpa [#allocation3], 0 }
   0xd   :  { %32 = vsyncpa [#allocation6], 0 }
   0xe   :  { %33 = vsyncpa [#allocation9], 0 }
   0xf   :  { %34 = vsyncpa [#allocation12], 0 }
  0x10   :  { %35 = vsyncpa [#allocation4], 0 }
  0x11   :  { %36 = vsyncpa [#allocation16], 0  ;;  %s4587_s29 = smov [#allocation5]   ;;  %s4588_s6 = smov [#allocation8]  }
  0x12   :  { %s65_s2 = sshll.u32 %s4587_s29, 4  ;;  %s96_s30 = sshll.u32 %s4588_s6, 4  ;;  %s66_s2 = int_to_ptr.vmem [resolvable:$true] %s65_s2  ;;  %s4738_s30 = int_to_ptr.vmem [resolvable:$true] %s96_s30 }
  0x13   :  { %s5867_s26 = sld [smem:[#allocation31_spill]] }
  0x19   :  { %s4355_s1 = scalar_lea.hbm %s5867_s26, 128 }
  0x1a   :  { %p4356_p0 = scmp.ne.s32.totalorder %s5867_s26, %s4355_s1  ;;  %p4359_p1 = scmp.lt.u32.totalorder %s4355_s1, %s5867_s26 }
  0x1c   :  { %p4361_p2 = pnand %p4359_p1, %p4356_p0 }
  0x1e   :  { %4364 = shalt.err (!%p4361_p2)
}
  0x1f   :  { %s4365_s9 = scalar_lea.vmem %s66_s2, 128  ;;  %p4370_p4 = scmp.lt.s32.totalorder %s66_s2, %s66_s2 }
  0x20   :  { %p4366_p3 = scmp.ne.s32.totalorder %s66_s2, %s4365_s9  ;;  %p4371_p5 = scmp.lt.s32.totalorder %s4365_s9, %s4365_s9 }
  0x22   :  { %p4372_p6 = por %p4371_p5, %p4370_p4 }
  0x24   :  { %p4373_p7 = pnand %p4372_p6, %p4366_p3 }
  0x26   :  { %4376 = shalt.err (!%p4373_p7)
}
  0x27   :  { %68 = dma.hbm_to_vmem [thread:$0]  %s5867_s26, 128, %s66_s2, [#allocation6]  }
  0x28   :  { %s4377_s7 = scalar_lea.hbm %s5842_s15, 16384 }
  0x29   :  { %p4378_p8 = scmp.ne.s32.totalorder %s5842_s15, %s4377_s7  ;;  %p4381_p9 = scmp.lt.u32.totalorder %s4377_s7, %s5842_s15 }
  0x2b   :  { %p4383_p10 = pnand %p4381_p9, %p4378_p8 }
  0x2d   :  { %4386 = shalt.err (!%p4383_p10)
}
  0x2e   :  { %s4387_s4 = scalar_lea.vmem %s4738_s30, 16384  ;;  %p4392_p12 = scmp.lt.s32.totalorder %s4738_s30, %s4738_s30 }
  0x2f   :  { %p4388_p11 = scmp.ne.s32.totalorder %s4738_s30, %s4387_s4  ;;  %p4393_p13 = scmp.lt.s32.totalorder %s4387_s4, %s4387_s4 }
  0x31   :  { %p4394_p0 = por %p4393_p13, %p4392_p12 }
  0x33   :  { %p4395_p1 = pnand %p4394_p0, %p4388_p11 }
  0x35   :  { %4398 = shalt.err (!%p4395_p1)
}
  0x36   :  { %s4589_s2 = smov 64   ;;  %s4590_s26 = smov 4  }
  0x37   :  { %102 = dma.hbm_to_vmem [thread:$0]  %s5842_s15, 16384, %s4738_s30, [#allocation9], %s4589_s2, %s4589_s2, %s4590_s26  }
  0x38   :  { %s4591_s5 = smov [#allocation11]   ;;  %s4592_s29 = smov [#allocation2]  }
  0x39   :  { %s121_s0 = sshll.u32 %s4591_s5, 4  ;;  %s49_s6 = sshll.u32 %s4592_s29, 4  ;;  %s122_s0 = int_to_ptr.vmem [resolvable:$true] %s121_s0  ;;  %s50_s6 = int_to_ptr.vmem [resolvable:$true] %s49_s6 }
  0x3a   :  { %s4399_s8 = scalar_lea.hbm %s5845_s18, 16 }
  0x3b   :  { %p4400_p2 = scmp.ne.s32.totalorder %s5845_s18, %s4399_s8  ;;  %p4403_p3 = scmp.lt.u32.totalorder %s4399_s8, %s5845_s18 }
  0x3d   :  { %p4405_p4 = pnand %p4403_p3, %p4400_p2 }
  0x3f   :  { %4408 = shalt.err (!%p4405_p4)
}
  0x40   :  { %s4409_s15 = scalar_lea.vmem %s122_s0, 16  ;;  %s4413_s30 = scalar_lea.vmem %s122_s0, 32 }
  0x41   :  { %p4410_p5 = scmp.ne.s32.totalorder %s122_s0, %s4409_s15  ;;  %p4414_p6 = scmp.lt.s32.totalorder %s122_s0, %s122_s0 }
  0x42   :  { %p4415_p7 = scmp.lt.s32.totalorder %s4413_s30, %s4409_s15 }
  0x44   :  { %p4416_p8 = por %p4415_p7, %p4414_p6 }
  0x46   :  { %p4417_p9 = pnand %p4416_p8, %p4410_p5 }
  0x48   :  { %4420 = shalt.err (!%p4417_p9)
}
  0x49   :  { %124 = dma.hbm_to_vmem [thread:$0]  %s5845_s18, 16, %s122_s0, [#allocation12]  }
  0x4a   :  { %s5868_s5 = sld [smem:[#allocation27_spill]] }
  0x50   :  { %s4421_s29 = scalar_lea.hbm %s5868_s5, 64 }
  0x51   :  { %p4422_p10 = scmp.ne.s32.totalorder %s5868_s5, %s4421_s29  ;;  %p4425_p11 = scmp.lt.u32.totalorder %s4421_s29, %s5868_s5 }
  0x53   :  { %p4427_p12 = pnand %p4425_p11, %p4422_p10 }
  0x55   :  { %4430 = shalt.err (!%p4427_p12)
}
  0x56   :  { %s4431_s1 = scalar_lea.vmem %s50_s6, 64  ;;  %p4436_p0 = scmp.lt.s32.totalorder %s50_s6, %s50_s6 }
  0x57   :  { %p4432_p13 = scmp.ne.s32.totalorder %s50_s6, %s4431_s1  ;;  %p4437_p1 = scmp.lt.s32.totalorder %s4431_s1, %s4431_s1 }
  0x59   :  { %p4438_p2 = por %p4437_p1, %p4436_p0 }
  0x5b   :  { %p4439_p3 = pnand %p4438_p2, %p4432_p13 }
  0x5d   :  { %4442 = shalt.err (!%p4439_p3)
}
  0x5e   :  { %52 = dma.hbm_to_vmem [thread:$0]  %s5868_s5, 64, %s50_s6, [#allocation3]  }
  0x5f   :  { %s4593_s27 = smov [#allocation7]   ;;  %s4594_s15 = smov [#allocation10]  }
  0x60   :  { %s81_s4 = sshll.u32 %s4593_s27, 4  ;;  %s109_s30 = sshll.u32 %s4594_s15, 4  ;;  %s82_s4 = int_to_ptr.vmem [resolvable:$true] %s81_s4  ;;  %s110_s30 = int_to_ptr.vmem [resolvable:$true] %s109_s30 }
  0x61   :  { %s4443_s28 = scalar_lea.hbm %s5838_s11, 128 }
  0x62   :  { %p4444_p4 = scmp.ne.s32.totalorder %s5838_s11, %s4443_s28  ;;  %p4447_p5 = scmp.lt.u32.totalorder %s4443_s28, %s5838_s11 }
  0x64   :  { %p4449_p6 = pnand %p4447_p5, %p4444_p4 }
  0x66   :  { %4452 = shalt.err (!%p4449_p6)
}
  0x67   :  { %s4453_s6 = scalar_lea.vmem %s82_s4, 128  ;;  %p4458_p8 = scmp.lt.s32.totalorder %s82_s4, %s82_s4 }
  0x68   :  { %p4454_p7 = scmp.ne.s32.totalorder %s82_s4, %s4453_s6  ;;  %p4459_p9 = scmp.lt.s32.totalorder %s4453_s6, %s4453_s6 }
  0x6a   :  { %p4460_p10 = por %p4459_p9, %p4458_p8 }
  0x6c   :  { %p4461_p11 = pnand %p4460_p10, %p4454_p7 }
  0x6e   :  { %4464 = shalt.err (!%p4461_p11)
}
  0x6f   :  { %84 = dma.hbm_to_vmem [thread:$0]  %s5838_s11, 128, %s82_s4, [#allocation6]  }
  0x70   :  { %s4465_s18 = scalar_lea.hbm %s5843_s16, 16 }
  0x71   :  { %p4466_p12 = scmp.ne.s32.totalorder %s5843_s16, %s4465_s18  ;;  %p4469_p13 = scmp.lt.u32.totalorder %s4465_s18, %s5843_s16 }
  0x73   :  { %p4471_p0 = pnand %p4469_p13, %p4466_p12 }
  0x75   :  { %4474 = shalt.err (!%p4471_p0)
}
  0x76   :  { %s4475_s26 = scalar_lea.vmem %s110_s30, 16  ;;  %s4479_s28 = scalar_lea.vmem %s110_s30, 32 }
  0x77   :  { %p4476_p1 = scmp.ne.s32.totalorder %s110_s30, %s4475_s26  ;;  %p4480_p2 = scmp.lt.s32.totalorder %s110_s30, %s110_s30 }
  0x78   :  { %p4481_p3 = scmp.lt.s32.totalorder %s4479_s28, %s4475_s26 }
  0x7a   :  { %p4482_p4 = por %p4481_p3, %p4480_p2 }
  0x7c   :  { %p4483_p5 = pnand %p4482_p4, %p4476_p1 }
  0x7e   :  { %4486 = shalt.err (!%p4483_p5)
}
  0x7f   :  { %112 = dma.hbm_to_vmem [thread:$0]  %s5843_s16, 16, %s110_s30, [#allocation9]  }
  0x80   :  { %s4595_s9 = smov [#allocation13]   ;;  %s4487_s6 = scalar_lea.hbm %s5847_s20, 16 }
  0x81   :  { %s133_s29 = sshll.u32 %s4595_s9, 4  ;;  %p4488_p6 = scmp.ne.s32.totalorder %s5847_s20, %s4487_s6  ;;  %s134_s29 = int_to_ptr.vmem [resolvable:$true] %s133_s29 }
  0x82   :  { %p4491_p7 = scmp.lt.u32.totalorder %s4487_s6, %s5847_s20 }
  0x84   :  { %p4493_p8 = pnand %p4491_p7, %p4488_p6 }
  0x86   :  { %4496 = shalt.err (!%p4493_p8)
}
  0x87   :  { %s4497_s18 = scalar_lea.vmem %s134_s29, 16  ;;  %s4501_s16 = scalar_lea.vmem %s134_s29, 32 }
  0x88   :  { %p4498_p9 = scmp.ne.s32.totalorder %s134_s29, %s4497_s18  ;;  %p4502_p10 = scmp.lt.s32.totalorder %s134_s29, %s134_s29 }
  0x89   :  { %p4503_p11 = scmp.lt.s32.totalorder %s4501_s16, %s4497_s18 }
  0x8b   :  { %p4504_p12 = por %p4503_p11, %p4502_p10 }
  0x8d   :  { %p4505_p13 = pnand %p4504_p12, %p4498_p9 }
  0x8f   :  { %4508 = shalt.err (!%p4505_p13)
}
  0x90   :  { %136 = dma.hbm_to_vmem [thread:$0]  %s5847_s20, 16, %s134_s29, [#allocation12]  }
  0x91   :  { %4575 = dma.done.wait [#allocation3], 64  }
  0x92   :  { %4576 = vsyncadd [#allocation3], 4294967232 }
  0x93   :  { %4577 = dma.done.wait [#allocation6], 256  }
  0x94   :  { %4578 = vsyncadd [#allocation6], 4294967040 }
  0x95   :  { %4579 = dma.done.wait [#allocation9], 16400  }
  0x96   :  { %4580 = vsyncadd [#allocation9], 4294950896 }
  0x97   :  { %4581 = dma.done.wait [#allocation12], 32  }
  0x98   :  { %4582 = vsyncadd [#allocation12], 4294967264  ;;  %v173_v0 = vlaneseq  ;;  %s5869_s15 = sld [smem:[#allocation24_spill]]  ;;  %s4596_s2 = smov 16   ;;  %vm188_vm0 = vcmask 130048   ;;  %vm380_vm1 = vcmask 916480  }
  0x99   :  { %s4597_s26 = smov 112   ;;  %s4598_s28 = smov 127   ;;  %v4600_v27 = vmov 0.0   ;;  %v4601_v29 = vmov 0   ;;  %v4602_v36 = vmov 1966171168  }
  0x9a   :  { %v4830_v1 = vshrl.u32 %v173_v0, 7  ;;  %s4599_s11 = smov 1   ;;  %733 = vmatprep.mubr.f32.mxu0 %v4600_v27  ;;  %804 = vmatprep.mubr.f32.mxu1 %v4600_v27  ;;  %s5870_s29 = sld [smem:[#allocation28_spill]]  ;;  %v246_v37 = vunpack.c.l.s4 %v4602_v36  ;;  %vm220_vm2 = vcmask 1039360   ;;  %vm236_vm3 = vcmask 7168  }
  0x9b   :  { %4111 = vset.pattern.permute.xlu0 %v4601_v29  ;;  %4112 = vset.pattern.permute.xlu1 %v4601_v29  ;;  %s5871_s6 = sld [smem:[#allocation25_spill]]  ;;  %s5872_s8 = sld [smem:[#allocation26_spill]]  ;;  %vm617_vm6 = vcmask 1040384   ;;  %vm622_vm7 = vcmask 1041408   ;;  %vm627_vm8 = vcmask 1042432   ;;  %vm632_vm9 = vcmask 1043456  }
  0x9c   :  { %v4833_v2 = vsub.s32 1, %v4830_v1  ;;  %v4836_v3 = vsub.s32 0, %v4830_v1  ;;  %v4839_v4 = vsub.s32 2, %v4830_v1  ;;  %v4851_v8 = vsub.s32 3, %v4830_v1  ;;  %s5873_s16 = sld [smem:[#allocation29_spill]]  ;;  %s5874_s20 = sld [smem:[#allocation30_spill]] }
  0x9d   :  { %v247_v40 = vunpack.c.0.s8 %v246_v37  ;;  %vm637_vm10 = vcmask 1044480   ;;  %vm642_vm11 = vcmask 1045504   ;;  %vm647_vm12 = vcmask 1046528   ;;  %s5875_s4 = sld [smem:[#allocation32_spill]] }
  0x9e   :  { %v167_v5 = vld [vmem:[%s5869_s15] sm:$0xf]  ;;  %vm4603_vm13 = vmmov 1   ;;  %vm657_vm15 = vcmask 72704  }
  0x9f   :  { %v4845_v6 = vrot.slane %v167_v5, %v4833_v2  ;;  %v4848_v7 = vrot.slane %v167_v5, %v4836_v3  ;;  %v4858_v9 = vrot.slane %v167_v5, %v4839_v4  ;;  %v4865_v10 = vrot.slane %v167_v5, %v4851_v8  ;;  %vm4031_vm14 = vmpackc.low %vm617_vm6, %vm4603_vm13 }
  0xa0   :  { %v169_v28 = vld [vmem:[%s5870_s29] sm:$0xf]  ;;  %v4963_v49 = vsub.s32 %v247_v40, %v4830_v1 }
  0xa1   :  { %186 = vrot.lane.b32.xlu1 %v4845_v6, %s4596_s2  ;;  %177 = vrot.lane.b32.xlu0 %v4848_v7, %s4597_s26 }
  0xa5   :  { %195 = vrot.lane.b32.xlu1 %v4858_v9, %s4597_s26  ;;  %184 = vrot.lane.b32.xlu0 %v4848_v7, %s4596_s2 }
  0xa9   :  { %204 = vrot.lane.b32.xlu1 %v4865_v10, %s4596_s2  ;;  %202 = vrot.lane.b32.xlu0 %v4858_v9, %s4596_s2 }
  0xad   :  { %384 = vrot.lane.b32.xlu1 %v4865_v10, %s4597_s26  ;;  %378 = vrot.lane.b32.xlu0 %v4845_v6, %s4597_s26 }
  0xb1   :  { %298 = vrot.lane.b32.xlu1 %v4845_v6, %s4598_s28  ;;  %296 = vrot.lane.b32.xlu0 %v4848_v7, %s4598_s28 }
  0xb5   :  { %302 = vrot.lane.b32.xlu1 %v4865_v10, %s4598_s28  ;;  %300 = vrot.lane.b32.xlu0 %v4858_v9, %s4598_s28 }
  0xb9   :  { %313 = vrot.lane.b32.xlu1 %v4848_v7, %s4599_s11  ;;  %310 = vrot.lane.b32.xlu0 %v4865_v10, %s4599_s11 }
  0xbd   :  { %317 = vrot.lane.b32.xlu1 %v4858_v9, %s4599_s11  ;;  %315 = vrot.lane.b32.xlu0 %v4845_v6, %s4599_s11 }
 0x113   :  { %v187_v11 = vpop.permute.xlu1 %186  ;;  %v178_v12 = vpop.permute.xlu0 %177 }
 0x117   :  { %v196_v13 = vpop.permute.xlu1 %195  ;;  %v185_v14 = vpop.permute.xlu0 %184 }
 0x118   :  { %v4892_v15 = vsel %vm188_vm0, %v178_v12, %v185_v14  ;;  %v4895_v16 = vsel %vm188_vm0, %v185_v14, %v187_v11 }
 0x119   :  { %212 = vrot.lane.b32.xlu0 %v4892_v15, %s4598_s28  ;;  %214 = vrot.lane.b32.xlu1 %v4895_v16, %s4598_s28 }
 0x11b   :  { %v205_v17 = vpop.permute.xlu1 %204  ;;  %v203_v18 = vpop.permute.xlu0 %202 }
 0x11c   :  { %v4902_v19 = vsel %vm188_vm0, %v196_v13, %v203_v18  ;;  %v4905_v20 = vsel %vm188_vm0, %v203_v18, %v205_v17 }
 0x11d   :  { %216 = vrot.lane.b32.xlu0 %v4902_v19, %s4598_s28  ;;  %218 = vrot.lane.b32.xlu1 %v4905_v20, %s4598_s28 }
 0x11f   :  { %v379_v21 = vpop.permute.xlu0 %378  ;;  %v385_v24 = vpop.permute.xlu1 %384 }
 0x120   :  { %v4920_v22 = vsel %vm380_vm1, %v379_v21, %v187_v11  ;;  %v4923_v23 = vsel %vm380_vm1, %v178_v12, %v379_v21  ;;  %v4930_v25 = vsel %vm380_vm1, %v385_v24, %v205_v17  ;;  %v4933_v26 = vsel %vm380_vm1, %v196_v13, %v385_v24  ;;  %v4976_v12 = vld [vmem:[%s5871_s6] sm:$0xf]  ;;  %s5892_s6 = sld [smem:[#allocation33_spill]] }
 0x121   :  { %227 = vrot.lane.b32.xlu0 %v4905_v20, %s4599_s11  ;;  %230 = vrot.lane.b32.xlu1 %v4892_v15, %s4599_s11  ;;  %vm164_vm4 = vcmp.gt.f32.partialorder %v4976_v12, 0.5  ;;  %v4982_v24 = vld [vmem:[%s5872_s8] sm:$0xf] }
 0x122   :  { %vm166_vm5 = vcmp.gt.f32.partialorder %v4982_v24, 0.5 }
 0x123   :  { %v299_v30 = vpop.permute.xlu1 %298  ;;  %v297_v31 = vpop.permute.xlu0 %296 }
 0x124   :  { %v304_v41 = vsel %vm220_vm2, %v297_v31, %v299_v30 }
 0x125   :  { %232 = vrot.lane.b32.xlu0 %v4895_v16, %s4599_s11  ;;  %234 = vrot.lane.b32.xlu1 %v4902_v19, %s4599_s11 }
 0x127   :  { %v303_v32 = vpop.permute.xlu1 %302  ;;  %v301_v33 = vpop.permute.xlu0 %300 }
 0x128   :  { %v309_v42 = vsel %vm220_vm2, %v303_v32, %v297_v31  ;;  %v305_v43 = vsel %vm220_vm2, %v299_v30, %v301_v33  ;;  %v306_v44 = vsel %vm220_vm2, %v301_v33, %v303_v32 }
 0x129   :  { %395 = vrot.lane.b32.xlu1 %v4920_v22, %s4598_s28  ;;  %393 = vrot.lane.b32.xlu0 %v4923_v23, %s4598_s28  ;;  %v325_v50 = vcombine.low %v304_v41, %v305_v43  ;;  %v326_v51 = vcombine.low %v306_v44, %v309_v42  ;;  %v496_v41 = vrot.slane %v4892_v15, 7  ;;  %v497_v42 = vrot.slane %v4895_v16, 7 }
 0x12b   :  { %v314_v34 = vpop.permute.xlu1 %313  ;;  %v311_v35 = vpop.permute.xlu0 %310  ;;  %v333_v56 = vrot.slane %v325_v50, %v4963_v49  ;;  %v340_v57 = vrot.slane %v326_v51, %v4963_v49  ;;  %v498_v50 = vrot.slane %v4902_v19, 7  ;;  %v499_v51 = vrot.slane %v4905_v20, 7 }
 0x12c   :  { %v323_v45 = vsel %vm236_vm3, %v311_v35, %v314_v34 }
 0x12d   :  { %399 = vrot.lane.b32.xlu1 %v4930_v25, %s4598_s28  ;;  %397 = vrot.lane.b32.xlu0 %v4933_v26, %s4598_s28  ;;  %v341_v11 = vcombine.low %v333_v56, %v340_v57 }
 0x12f   :  { %v318_v38 = vpop.permute.xlu1 %317  ;;  %v316_v39 = vpop.permute.xlu0 %315 }
 0x130   :  { %v321_v46 = vsel %vm236_vm3, %v318_v38, %v311_v35  ;;  %v319_v47 = vsel %vm236_vm3, %v314_v34, %v316_v39  ;;  %v320_v48 = vsel %vm236_vm3, %v316_v39, %v318_v38 }
 0x131   :  { %410 = vrot.lane.b32.xlu1 %v4923_v23, %s4599_s11  ;;  %407 = vrot.lane.b32.xlu0 %v4930_v25, %s4599_s11  ;;  %v351_v52 = vcombine.low %v323_v45, %v319_v47  ;;  %v352_v53 = vcombine.low %v320_v48, %v321_v46 }
 0x133   :  { %v359_v58 = vrot.slane %v351_v52, %v4963_v49  ;;  %v366_v59 = vrot.slane %v352_v53, %v4963_v49 }
 0x135   :  { %414 = vrot.lane.b32.xlu1 %v4933_v26, %s4599_s11  ;;  %412 = vrot.lane.b32.xlu0 %v4920_v22, %s4599_s11  ;;  %v367_v13 = vcombine.low %v359_v58, %v366_v59 }
 0x137   :  { %v374_v30 = vrot.slane %v367_v13, %v4963_v49 }
 0x139   :  { %654 = vperm.xlu0 %4111, %v169_v28   ;;  %v348_v28 = vrot.slane %v341_v11, %v4963_v49 }
 0x13b   :  { %v4997_v43 = vsel %vm164_vm4, %v348_v28, %v374_v30  ;;  %v5005_v15 = vsel %vm166_vm5, %v374_v30, %v348_v28 }
 0x13c   :  { %v529_v52 = vrot.slane %v4997_v43, %v4836_v3  ;;  %v537_v53 = vrot.slane %v4997_v43, %v4839_v4  ;;  %v533_v19 = vrot.slane %v4997_v43, %v4833_v2  ;;  %v558_v57 = vrot.slane %v5005_v15, %v4833_v2 }
 0x13d   :  { %v541_v58 = vrot.slane %v4997_v43, %v4851_v8 }
 0x18b   :  { %v215_v54 = vpop.permute.xlu1 %214  ;;  %v213_v55 = vpop.permute.xlu0 %212 }
 0x18c   :  { %v221_v5 = vsel %vm220_vm2, %v213_v55, %v215_v54 }
 0x18f   :  { %v219_v60 = vpop.permute.xlu1 %218  ;;  %v217_v61 = vpop.permute.xlu0 %216 }
 0x190   :  { %v226_v62 = vsel %vm220_vm2, %v219_v60, %v213_v55  ;;  %v222_v63 = vsel %vm220_vm2, %v215_v54, %v217_v61  ;;  %v223_v1 = vsel %vm220_vm2, %v217_v61, %v219_v60 }
 0x191   :  { %v243_v14 = vcombine.low %v221_v5, %v222_v63  ;;  %v244_v17 = vcombine.low %v223_v1, %v226_v62 }
 0x193   :  { %v231_v18 = vpop.permute.xlu1 %230  ;;  %v228_v21 = vpop.permute.xlu0 %227  ;;  %v251_v31 = vrot.slane %v243_v14, %v4963_v49  ;;  %v258_v32 = vrot.slane %v244_v17, %v4963_v49 }
 0x194   :  { %v241_v35 = vsel %vm236_vm3, %v228_v21, %v231_v18 }
 0x195   :  { %v259_v44 = vcombine.low %v251_v31, %v258_v32  ;;  %v566_v32 = vrot.slane %v5005_v15, %v4851_v8 }
 0x197   :  { %v235_v33 = vpop.permute.xlu1 %234  ;;  %v233_v34 = vpop.permute.xlu0 %232  ;;  %v266_v20 = vrot.slane %v259_v44, %v4963_v49 }
 0x198   :  { %v239_v36 = vsel %vm236_vm3, %v235_v33, %v228_v21  ;;  %v237_v37 = vsel %vm236_vm3, %v231_v18, %v233_v34  ;;  %v238_v38 = vsel %vm236_vm3, %v233_v34, %v235_v33  ;;  %v554_v33 = vrot.slane %v5005_v15, %v4836_v3 }
 0x199   :  { %v269_v39 = vcombine.low %v241_v35, %v237_v37  ;;  %v270_v40 = vcombine.low %v238_v38, %v239_v36 }
 0x19b   :  { %v277_v45 = vrot.slane %v269_v39, %v4963_v49  ;;  %v284_v46 = vrot.slane %v270_v40, %v4963_v49  ;;  %v396_v47 = vpop.permute.xlu1 %395  ;;  %v394_v48 = vpop.permute.xlu0 %393 }
 0x19c   :  { %v401_v59 = vsel %vm220_vm2, %v394_v48, %v396_v47 }
 0x19d   :  { %v285_v16 = vcombine.low %v277_v45, %v284_v46 }
 0x19f   :  { %v292_v54 = vrot.slane %v285_v16, %v4963_v49  ;;  %v400_v55 = vpop.permute.xlu1 %399  ;;  %v398_v56 = vpop.permute.xlu0 %397 }
 0x1a0   :  { %v406_v60 = vsel %vm220_vm2, %v400_v55, %v394_v48  ;;  %v402_v61 = vsel %vm220_vm2, %v396_v47, %v398_v56  ;;  %v403_v62 = vsel %vm220_vm2, %v398_v56, %v400_v55 }
 0x1a1   :  { %v294_v63 = vsel %vm164_vm4, %v266_v20, %v292_v54  ;;  %v422_v1 = vcombine.low %v401_v59, %v402_v61  ;;  %v423_v5 = vcombine.low %v403_v62, %v406_v60  ;;  %v295_v11 = vsel %vm166_vm5, %v292_v54, %v266_v20 }
 0x1a2   :  { %v479_v13 = vrot.slane %v294_v63, %v4836_v3  ;;  %v483_v14 = vrot.slane %v294_v63, %v4833_v2  ;;  %v487_v17 = vrot.slane %v294_v63, %v4839_v4  ;;  %v491_v18 = vrot.slane %v294_v63, %v4851_v8 }
 0x1a3   :  { %v411_v21 = vpop.permute.xlu1 %410  ;;  %v408_v28 = vpop.permute.xlu0 %407  ;;  %v508_v30 = vrot.slane %v295_v11, %v4836_v3  ;;  %v512_v31 = vrot.slane %v295_v11, %v4833_v2  ;;  %v430_v34 = vrot.slane %v422_v1, %v4963_v49  ;;  %v437_v35 = vrot.slane %v423_v5, %v4963_v49 }
 0x1a4   :  { %v619_v36 = vsel %vm617_vm6, %v483_v14, %v497_v42  ;;  %v520_v37 = vrot.slane %v295_v11, %v4851_v8  ;;  %v516_v38 = vrot.slane %v295_v11, %v4839_v4  ;;  %v621_v40 = vsel %vm617_vm6, %v491_v18, %v499_v51 }
 0x1a5   :  { %v624_v39 = vsel %vm622_vm7, %v619_v36, %v512_v31  ;;  %v618_v43 = vsel %vm617_vm6, %v479_v13, %v496_v41  ;;  %v620_v47 = vsel %vm617_vm6, %v487_v17, %v498_v50  ;;  %v420_v42 = vsel %vm236_vm3, %v408_v28, %v411_v21 }
 0x1a6   :  { %v629_v44 = vsel %vm627_vm8, %v624_v39, %v533_v19  ;;  %v626_v45 = vsel %vm622_vm7, %v621_v40, %v520_v37  ;;  %v623_v46 = vsel %vm622_vm7, %v618_v43, %v508_v30  ;;  %v562_v61 = vrot.slane %v5005_v15, %v4839_v4 }
 0x1a7   :  { %v415_v48 = vpop.permute.xlu1 %414  ;;  %v413_v16 = vpop.permute.xlu0 %412  ;;  %v634_v20 = vsel %vm632_vm9, %v629_v44, %v4845_v6  ;;  %v631_v54 = vsel %vm627_vm8, %v626_v45, %v541_v58  ;;  %v628_v51 = vsel %vm627_vm8, %v623_v46, %v529_v52  ;;  %v625_v62 = vsel %vm622_vm7, %v620_v47, %v516_v38  ;;  %v168_v46 = vld [vmem:[#allocation2] sm:$0xf] }
 0x1a8   :  { %v418_v41 = vsel %vm236_vm3, %v415_v48, %v408_v28  ;;  %v416_v19 = vsel %vm236_vm3, %v411_v21, %v413_v16  ;;  %v417_v55 = vsel %vm236_vm3, %v413_v16, %v415_v48  ;;  %v639_v56 = vsel %vm637_vm10, %v634_v20, %v558_v57 }
 0x1a9   :  { %v448_v50 = vcombine.low %v420_v42, %v416_v19  ;;  %v449_v59 = vcombine.low %v417_v55, %v418_v41  ;;  %v636_v60 = vsel %vm632_vm9, %v631_v54, %v4865_v10  ;;  %v633_v6 = vsel %vm632_vm9, %v628_v51, %v4848_v7 }
 0x1aa   :  { %v641_v58 = vsel %vm637_vm10, %v636_v60, %v566_v32  ;;  %v638_v52 = vsel %vm637_vm10, %v633_v6, %v554_v33  ;;  %v438_v63 = vcombine.low %v430_v34, %v437_v35  ;;  %v630_v5 = vsel %vm627_vm8, %v625_v62, %v537_v53 }
 0x1ab   :  { %v456_v57 = vrot.slane %v448_v50, %v4963_v49  ;;  %v463_v1 = vrot.slane %v449_v59, %v4963_v49  ;;  %v635_v10 = vsel %vm632_vm9, %v630_v5, %v4858_v9  ;;  %v593_v15 = vrot.slane %v4920_v22, 1 }
 0x1ac   :  { %v640_v11 = vsel %vm637_vm10, %v635_v10, %v562_v61  ;;  %v445_v13 = vrot.slane %v438_v63, %v4963_v49  ;;  %v592_v17 = vrot.slane %v4923_v23, 1  ;;  %v595_v18 = vrot.slane %v4930_v25, 1 }
 0x1ad   :  { %v464_v7 = vcombine.low %v456_v57, %v463_v1  ;;  %v594_v21 = vrot.slane %v4933_v26, 1 }
 0x1af   :  { %v471_v14 = vrot.slane %v464_v7, %v4963_v49 }
 0x1b1   :  { %v473_v53 = vsel %vm164_vm4, %v445_v13, %v471_v14  ;;  %v474_v9 = vsel %vm166_vm5, %v471_v14, %v445_v13 }
 0x1b2   :  { %v579_v28 = vrot.slane %v473_v53, %v4833_v2  ;;  %v587_v49 = vrot.slane %v473_v53, %v4851_v8  ;;  %v608_v22 = vrot.slane %v474_v9, %v4833_v2  ;;  %v616_v23 = vrot.slane %v474_v9, %v4851_v8 }
 0x1b3   :  { %v575_v25 = vrot.slane %v473_v53, %v4836_v3  ;;  %v583_v26 = vrot.slane %v473_v53, %v4839_v4  ;;  %v604_v32 = vrot.slane %v474_v9, %v4836_v3  ;;  %v612_v33 = vrot.slane %v474_v9, %v4839_v4  ;;  %v171_v53 = vld [vmem:[%s5874_s20] sm:$0xf] }
 0x1b4   :  { %v644_v30 = vsel %vm642_vm11, %v639_v56, %v579_v28  ;;  %v646_v31 = vsel %vm642_vm11, %v641_v58, %v587_v49 }
 0x1b5   :  { %v649_v34 = vsel %vm647_vm12, %v644_v30, %v593_v15  ;;  %v651_v35 = vsel %vm647_vm12, %v646_v31, %v595_v18  ;;  %v643_v36 = vsel %vm642_vm11, %v638_v52, %v575_v25  ;;  %v645_v37 = vsel %vm642_vm11, %v640_v11, %v583_v26 }
 0x1b6   :  { %v4030_v38 = vpack.c.bf16 %v608_v22, %v649_v34  ;;  %v4036_v39 = vpack.c.bf16 %v616_v23, %v651_v35  ;;  %v648_v40 = vsel %vm647_vm12, %v643_v36, %v592_v17  ;;  %v650_v43 = vsel %vm647_vm12, %v645_v37, %v594_v21  ;;  %v170_v21 = vld [vmem:[%s5873_s16] sm:$0xf] }
 0x1b7   :  { %v4033_v44 = vpack.c.bf16 %v604_v32, %v648_v40  ;;  %v4039_v45 = vpack.c.bf16 %v612_v33, %v650_v43 }
 0x1b8   :  { %4032 = vmatprep.subr.msk.bf16.mxu0 %vm4031_vm14, %v4030_v38  ;;  %4038 = vmatprep.subr.msk.bf16.mxu1 %vm4031_vm14, %v4036_v39  ;;  %v655_v47 = vpop.permute.xlu0 %654 }
 0x1b9   :  { %4035 = vmatpush1.bf16.msk.msra.mxu0 %vm4031_vm14, %v4033_v44  ;;  %4041 = vmatpush1.bf16.msk.msra.mxu1 %vm4031_vm14, %v4039_v45 }
 0x1bc   :  { %3587 = vmatmul.mubr.msk.f32.vlgmr.msra.gmra.mrb[0].mxu0 %vm657_vm15, %v168_v46  ;;  %3590 = vmatmul.mubr.msk.f32.vlgmr.msra.gmra.mrb[0].mxu1 %vm657_vm15, %v168_v46  ;;  %vm1142_vm15 = vcmask 293888  }
 0x1bd   :  { %1222 = vmatprep.mubr.f32.mxu0 %v4600_v27  ;;  %1293 = vmatprep.mubr.f32.mxu1 %v4600_v27 }
 0x28f   :  { %v735_v42 = vpop.f32.mrb[0].mxu0  ;;  %v806_v48 = vpop.f32.mrb[0].mxu1 }
 0x290   :  { %v736_v16 = vadd.f32 %v735_v42, %v655_v47  ;;  %v807_v20 = vadd.f32 %v806_v48, %v655_v47  ;;  %v737_v54 = vpop.f32.mrb[1].mxu0  ;;  %v808_v51 = vpop.f32.mrb[1].mxu1 }
 0x291   :  { %v738_v41 = vadd.f32 %v737_v54, %v655_v47  ;;  %v809_v19 = vadd.f32 %v808_v51, %v655_v47 }
 0x292   :  { %v811_v55 = vmax.f32 %v736_v16, 0.0  ;;  %v813_v56 = vmax.f32 %v807_v20, 0.0 }
 0x293   :  { %v812_v50 = vmax.f32 %v738_v41, 0.0  ;;  %v814_v59 = vmax.f32 %v809_v19, 0.0 }
 0x294   :  { %v815_v60 = vsel %vm632_vm9, %v811_v55, 0.0  ;;  %v825_v6 = vmul.f32 %v811_v55, %v811_v55  ;;  %v827_v58 = vmul.f32 %v813_v56, %v813_v56  ;;  %v818_v57 = vsel %vm632_vm9, %v813_v56, 0.0 }
 0x295   :  { %v816_v52 = vsel %vm632_vm9, %v812_v50, 0.0  ;;  %v826_v61 = vmul.f32 %v812_v50, %v812_v50  ;;  %v828_v1 = vmul.f32 %v814_v59, %v814_v59  ;;  %v820_v11 = vsel %vm632_vm9, %v814_v59, 0.0 }
 0x296   :  { %v817_v62 = vadd.f32 %v816_v52, %v815_v60  ;;  %v829_v63 = vsel %vm632_vm9, %v825_v6, 0.0  ;;  %v832_v13 = vsel %vm632_vm9, %v827_v58, 0.0 }
 0x297   :  { %v830_v5 = vsel %vm632_vm9, %v826_v61, 0.0  ;;  %v834_v17 = vsel %vm632_vm9, %v828_v1, 0.0 }
 0x298   :  { %v819_v10 = vadd.f32 %v818_v57, %v817_v62  ;;  %v831_v7 = vadd.f32 %v830_v5, %v829_v63 }
 0x29a   :  { %v821_v14 = vadd.f32 %v820_v11, %v819_v10  ;;  %v833_v15 = vadd.f32 %v832_v13, %v831_v7 }
 0x29c   :  { %822 = vadd.xlane.f32.xlu1 %v821_v14  ;;  %v835_v18 = vadd.f32 %v834_v17, %v833_v15 }
 0x29e   :  { %836 = vadd.xlane.f32.xlu0 %v835_v18  ;;  %v870_v18 = vld [vmem:[%s5875_s4] sm:$0xff] }
 0x2ad   :  { %853 = vperm.xlu1 %4112, %v170_v21   ;;  %v933_v21 = vsel %vm164_vm4, 1, %v4601_v29 }
 0x2ae   :  { %v945_v12 = vrot.slane %v933_v21, %v4839_v4 }
 0x2b0   :  { %vm5239_vm10 = vcmp.eq.s32.totalorder %v945_v12, 1 }
 0x2b4   :  { %862 = vperm.xlu0 %4111, %v171_v53   ;;  %v958_v53 = vsel %vm166_vm5, 1, %v4601_v29 }
 0x2b5   :  { %v962_v24 = vrot.slane %v958_v53, %v4836_v3 }
 0x2b7   :  { %vm5247_vm12 = vcmp.eq.s32.totalorder %v962_v24, 1 }
 0x329   :  { %v823_v9 = vpop.xlane.xlu1 %822 }
 0x32a   :  { %v824_v28 = vmul.f32 0.001953125, %v823_v9 }
 0x32b   :  { %v837_v49 = vpop.xlane.xlu0 %836 }
 0x32c   :  { %v838_v22 = vmul.f32 0.001953125, %v837_v49  ;;  %v839_v23 = vmul.f32 %v824_v28, %v824_v28  ;;  %v841_v30 = vsub.f32 %v811_v55, %v824_v28  ;;  %v842_v31 = vsub.f32 %v812_v50, %v824_v28 }
 0x32d   :  { %v843_v32 = vsub.f32 %v813_v56, %v824_v28  ;;  %v844_v33 = vsub.f32 %v814_v59, %v824_v28  ;;  %v854_v35 = vpop.permute.xlu1 %853  ;;  %v941_v49 = vrot.slane %v933_v21, %v4833_v2 }
 0x32e   :  { %v840_v25 = vsub.f32 %v838_v22, %v839_v23  ;;  %v966_v22 = vrot.slane %v958_v53, %v4833_v2 }
 0x32f   :  { %vm5223_vm4 = vcmp.eq.s32.totalorder %v941_v49, 1 }
 0x330   :  { %v845_v26 = vadd.f32 1e-05, %v840_v25  ;;  %vm5228_vm5 = vcmp.eq.s32.totalorder %v966_v22, 1 }
 0x332   :  { %4345 = vrsqrt.f32 %v845_v26  ;;  %v937_v26 = vrot.slane %v933_v21, %v4836_v3 }
 0x333   :  { %v863_v45 = vpop.permute.xlu0 %862 }
 0x334   :  { %vm5235_vm8 = vcmp.eq.s32.totalorder %v937_v26, 1 }
 0x33c   :  { %v4346_v34 = vpop.eup %4345 }
 0x33d   :  { %v847_v36 = vmul.f32 %v4346_v34, %v841_v30  ;;  %v848_v37 = vmul.f32 %v4346_v34, %v842_v31  ;;  %v849_v38 = vmul.f32 %v4346_v34, %v843_v32  ;;  %v850_v39 = vmul.f32 %v4346_v34, %v844_v33 }
 0x33e   :  { %v949_v30 = vrot.slane %v933_v21, %v4851_v8  ;;  %v970_v32 = vrot.slane %v958_v53, %v4839_v4  ;;  %v4194_v4 = vld [vmem:[#allocation8 + $0xc0] sm:$0xff]  }
 0x33f   :  { %v856_v40 = vmul.f32 %v854_v35, %v847_v36  ;;  %v857_v43 = vmul.f32 %v854_v35, %v848_v37  ;;  %v858_v44 = vmul.f32 %v854_v35, %v849_v38  ;;  %v859_v46 = vmul.f32 %v854_v35, %v850_v39 }
 0x340   :  { %v974_v35 = vrot.slane %v958_v53, %v4851_v8  ;;  %vm5243_vm11 = vcmp.eq.s32.totalorder %v949_v30, 1  ;;  %vm5265_vm14 = vcmp.eq.s32.totalorder %v970_v32, 1 }
 0x341   :  { %v5116_v47 = vadd.f32 %v863_v45, %v856_v40  ;;  %v5118_v42 = vadd.f32 %v863_v45, %v857_v43  ;;  %v5120_v48 = vadd.f32 %v863_v45, %v858_v44  ;;  %v5126_v16 = vadd.f32 %v863_v45, %v859_v46 }
 0x342   :  { %vm5259_vm13 = vcmp.eq.s32.totalorder %v974_v35, 1 }
 0x343   :  { %880 = vrot.lane.b32.xlu0 %v5118_v42, %s4596_s2  ;;  %874 = vrot.lane.b32.xlu1 %v5116_v47, %s4597_s26  ;;  %v4113_v20 = vpack.i.bf16 %v5120_v48, %v5116_v47  ;;  %v4123_v54 = vpack.i.bf16 %v5118_v42, %v5116_v47  ;;  %v4118_v51 = vpack.i.bf16 %v5120_v48, %v5118_v42 }
 0x347   :  { %891 = vrot.lane.b32.xlu0 %v5126_v16, %s4596_s2  ;;  %4114 = vrot.lane.b32.xlu1 %v4113_v20, %s4596_s2 }
 0x34b   :  { %1030 = vrot.lane.b32.xlu0 %v5126_v16, %s4597_s26  ;;  %885 = vrot.lane.b32.xlu1 %v5120_v48, %s4597_s26 }
 0x34f   :  { %4124 = vrot.lane.b32.xlu0 %v4123_v54, %s4599_s11  ;;  %1025 = vrot.lane.b32.xlu1 %v5118_v42, %s4597_s26 }
 0x353   :  { %4119 = vrot.lane.b32.xlu1 %v4118_v51, %s4598_s28 }
 0x3b5   :  { %v875_v41 = vpop.permute.xlu1 %874  ;;  %v881_v19 = vpop.permute.xlu0 %880 }
 0x3b9   :  { %v4115_v55 = vpop.permute.xlu1 %4114  ;;  %v892_v6 = vpop.permute.xlu0 %891 }
 0x3ba   :  { %v4117_v56 = vunpack.i.h.bf16 %v4115_v55  ;;  %v4116_v50 = vunpack.i.l.bf16 %v4115_v55 }
 0x3bc   :  { %v5146_v59 = vsel %vm188_vm0, %v875_v41, %v4116_v50  ;;  %v5149_v60 = vsel %vm188_vm0, %v4116_v50, %v881_v19  ;;  %v5159_v63 = vsel %vm188_vm0, %v4117_v56, %v892_v6 }
 0x3bd   :  { %v886_v58 = vpop.permute.xlu1 %885  ;;  %v4133_v52 = vpack.i.bf16 %v5146_v59, %v5126_v16  ;;  %v4128_v61 = vpack.i.bf16 %v5149_v60, %v5116_v47  ;;  %v4143_v57 = vpack.i.bf16 %v5159_v63, %v5149_v60  ;;  %v4148_v10 = vpack.i.bf16 %v5159_v63, %v5126_v16  ;;  %v1031_v7 = vpop.permute.xlu0 %1030 }
 0x3be   :  { %v5156_v62 = vsel %vm188_vm0, %v886_v58, %v4117_v56  ;;  %v5176_v13 = vsel %vm380_vm1, %v886_v58, %v1031_v7  ;;  %v5193_v17 = vsel %vm380_vm1, %v1031_v7, %v892_v6  ;;  %v1081_v43 = vrot.slane %v5146_v59, 4 }
 0x3bf   :  { %4134 = vrot.lane.b32.xlu0 %v4133_v52, %s4599_s11  ;;  %4129 = vrot.lane.b32.xlu1 %v4128_v61, %s4598_s28  ;;  %v4138_v1 = vpack.i.bf16 %v5146_v59, %v5156_v62  ;;  %v4153_v5 = vpack.i.bf16 %v5156_v62, %v5120_v48  ;;  %v1082_v45 = vrot.slane %v5149_v60, 4  ;;  %v1084_v46 = vrot.slane %v5159_v63, 4 }
 0x3c1   :  { %v1026_v11 = vpop.permute.xlu1 %1025  ;;  %v4125_v28 = vpop.permute.xlu0 %4124 }
 0x3c2   :  { %v5179_v14 = vsel %vm380_vm1, %v1026_v11, %v881_v19  ;;  %v5186_v15 = vsel %vm380_vm1, %v875_v41, %v1026_v11  ;;  %v4127_v29 = vunpack.i.h.bf16 %v4125_v28  ;;  %v4126_v31 = vunpack.i.l.bf16 %v4125_v28 }
 0x3c3   :  { %4144 = vrot.lane.b32.xlu0 %v4143_v57, %s4599_s11  ;;  %4139 = vrot.lane.b32.xlu1 %v4138_v1, %s4598_s28  ;;  %v1083_v57 = vrot.slane %v5156_v62, 4 }
 0x3c4   :  { %v1009_v44 = vsel %vm236_vm3, %v4126_v31, %v4127_v29 }
 0x3c5   :  { %v5212_v9 = vpop.permute.xlu1 %4119 }
 0x3c6   :  { %v4122_v23 = vunpack.i.h.bf16 %v5212_v9  ;;  %v4121_v25 = vunpack.i.l.bf16 %v5212_v9 }
 0x3c7   :  { %4154 = vrot.lane.b32.xlu0 %v4153_v5, %s4599_s11  ;;  %4149 = vrot.lane.b32.xlu1 %v4148_v10, %s4598_s28  ;;  %v1114_v5 = vrot.slane %v5179_v14, 4 }
 0x3c8   :  { %v992_v3 = vsel %vm220_vm2, %v4121_v25, %v4122_v23 }
 0x3c9   :  { %v1018_v20 = vsel %vm5223_vm4, %v992_v3, %v1009_v44  ;;  %v1022_v54 = vsel %vm5228_vm5, %v1009_v44, %v992_v3 }
 0x3ca   :  { %v1094_v1 = vrot.slane %v1018_v20, 4  ;;  %v1106_v7 = vrot.slane %v1022_v54, 4 }
 0x3cb   :  { %1043 = vrot.lane.b32.xlu0 %v5176_v13, %s4598_s28  ;;  %1041 = vrot.lane.b32.xlu1 %v5179_v14, %s4598_s28 }
 0x3cc   :  { %v1130_v9 = vsel %vm632_vm9, %v5118_v42, %v1106_v7 }
 0x3cf   :  { %1061 = vrot.lane.b32.xlu0 %v5179_v14, %s4599_s11  ;;  %1059 = vrot.lane.b32.xlu1 %v5186_v15, %s4599_s11 }
 0x3d3   :  { %1056 = vrot.lane.b32.xlu0 %v5193_v17, %s4599_s11  ;;  %1039 = vrot.lane.b32.xlu1 %v5186_v15, %s4598_s28 }
 0x3d7   :  { %1063 = vrot.lane.b32.xlu0 %v5176_v13, %s4599_s11  ;;  %1045 = vrot.lane.b32.xlu1 %v5193_v17, %s4598_s28 }
 0x3db   :  { %1139 = vperm.xlu1 %4112, %v870_v18  }
 0x431   :  { %v4135_v33 = vpop.permute.xlu0 %4134  ;;  %v4130_v34 = vpop.permute.xlu1 %4129 }
 0x432   :  { %v4136_v38 = vunpack.i.l.bf16 %v4135_v33  ;;  %v4131_v39 = vunpack.i.l.bf16 %v4130_v34  ;;  %v4137_v19 = vunpack.i.h.bf16 %v4135_v33  ;;  %v4132_v55 = vunpack.i.h.bf16 %v4130_v34 }
 0x434   :  { %v1016_v60 = vsel %vm236_vm3, %v4136_v38, %v4126_v31  ;;  %v991_v6 = vsel %vm220_vm2, %v4131_v39, %v4121_v25 }
 0x435   :  { %v4145_v51 = vpop.permute.xlu0 %4144  ;;  %v4140_v41 = vpop.permute.xlu1 %4139  ;;  %v1017_v49 = vsel %vm5235_vm8, %v991_v6, %v1016_v60  ;;  %v1021_v62 = vsel %vm5247_vm12, %v1016_v60, %v991_v6 }
 0x436   :  { %v4147_v56 = vunpack.i.h.bf16 %v4145_v51  ;;  %v4146_v50 = vunpack.i.l.bf16 %v4145_v51  ;;  %v4142_v58 = vunpack.i.h.bf16 %v4140_v41  ;;  %v4141_v52 = vunpack.i.l.bf16 %v4140_v41 }
 0x438   :  { %v932_v10 = vsel %vm236_vm3, %v4147_v56, %v4137_v19  ;;  %v925_v11 = vsel %vm236_vm3, %v4137_v19, %v4146_v50  ;;  %v907_v18 = vsel %vm220_vm2, %v4142_v58, %v4132_v55  ;;  %v908_v21 = vsel %vm220_vm2, %v4132_v55, %v4141_v52 }
 0x439   :  { %v4155_v53 = vpop.permute.xlu0 %4154  ;;  %v4150_v28 = vpop.permute.xlu1 %4149  ;;  %v954_v14 = vsel %vm5235_vm8, %v907_v18, %v932_v10  ;;  %v979_v26 = vsel %vm5247_vm12, %v932_v10, %v907_v18  ;;  %v955_v32 = vsel %vm5223_vm4, %v908_v21, %v925_v11  ;;  %v980_v33 = vsel %vm5228_vm5, %v925_v11, %v908_v21 }
 0x43a   :  { %v4157_v22 = vunpack.i.h.bf16 %v4155_v53  ;;  %v4156_v25 = vunpack.i.l.bf16 %v4155_v53  ;;  %v4152_v12 = vunpack.i.h.bf16 %v4150_v28  ;;  %v4151_v30 = vunpack.i.l.bf16 %v4150_v28 }
 0x43b   :  { %v1093_v19 = vrot.slane %v1017_v49, 4  ;;  %v1105_v55 = vrot.slane %v1021_v62, 4  ;;  %v1122_v60 = vsel %vm632_vm9, %v955_v32, %v1082_v45  ;;  %v1126_v6 = vsel %vm632_vm9, %v980_v33, %v1094_v1 }
 0x43c   :  { %v1010_v24 = vsel %vm236_vm3, %v4127_v29, %v4156_v25  ;;  %v1011_v31 = vsel %vm236_vm3, %v4156_v25, %v4136_v38  ;;  %v926_v34 = vsel %vm236_vm3, %v4146_v50, %v4157_v22  ;;  %v909_v35 = vsel %vm220_vm2, %v4141_v52, %v4152_v12 }
 0x43d   :  { %v993_v3 = vsel %vm220_vm2, %v4122_v23, %v4151_v30  ;;  %v999_v44 = vsel %vm220_vm2, %v4151_v30, %v4131_v39  ;;  %v1044_v20 = vpop.permute.xlu0 %1043  ;;  %v1042_v29 = vpop.permute.xlu1 %1041  ;;  %v927_v38 = vsel %vm236_vm3, %v4157_v22, %v4147_v56  ;;  %v915_v54 = vsel %vm220_vm2, %v4152_v12, %v4142_v58 }
 0x43e   :  { %v1019_v51 = vsel %vm5239_vm10, %v993_v3, %v1010_v24  ;;  %v1020_v41 = vsel %vm5243_vm11, %v999_v44, %v1011_v31  ;;  %v956_v23 = vsel %vm5239_vm10, %v909_v35, %v926_v34  ;;  %v1048_v56 = vsel %vm220_vm2, %v1042_v29, %v1044_v20 }
 0x43f   :  { %v1096_v50 = vrot.slane %v1020_v41, 4  ;;  %v1095_v39 = vrot.slane %v1019_v51, 4  ;;  %v1121_v58 = vsel %vm632_vm9, %v954_v14, %v1081_v43  ;;  %v1125_v52 = vsel %vm632_vm9, %v979_v26, %v1093_v19 }
 0x440   :  { %v957_v18 = vsel %vm5243_vm11, %v915_v54, %v927_v38  ;;  %v4042_v42 = vpack.c.bf16 %v1126_v6, %v1122_v60  ;;  %v4044_v7 = vpack.c.bf16 %v1125_v52, %v1121_v58  ;;  %v982_v53 = vsel %vm5259_vm13, %v927_v38, %v915_v54  ;;  %v869_v60 = vld [vmem:[#allocation5] sm:$0xff] }
 0x441   :  { %v1062_v10 = vpop.permute.xlu0 %1061  ;;  %v1060_v11 = vpop.permute.xlu1 %1059  ;;  %v981_v45 = vsel %vm5265_vm14, %v926_v34, %v909_v35  ;;  %v1124_v1 = vsel %vm632_vm9, %v957_v18, %v1084_v46  ;;  %v1128_v28 = vsel %vm632_vm9, %v982_v53, %v1096_v50  ;;  %v1123_v62 = vsel %vm632_vm9, %v956_v23, %v1083_v57 }
 0x442   :  { %v1065_v21 = vsel %vm236_vm3, %v1060_v11, %v1062_v10  ;;  %4043 = vmatprep.subr.bf16.mxu0 %v4042_v42  ;;  %v4050_v49 = vpack.c.bf16 %v1128_v28, %v1124_v1  ;;  %v1127_v22 = vsel %vm632_vm9, %v981_v45, %v1095_v39  ;;  %v1023_v14 = vsel %vm5265_vm14, %v1010_v24, %v993_v3 }
 0x443   :  { %v1074_v43 = vsel %vm5223_vm4, %v1048_v56, %v1065_v21  ;;  %v1024_v26 = vsel %vm5259_vm13, %v1011_v31, %v999_v44  ;;  %4045 = vmatpush1.bf16.msra.mxu0 %v4044_v7  ;;  %v4052_v63 = vpack.c.bf16 %v1127_v22, %v1123_v62  ;;  %v1113_v32 = vrot.slane %v5186_v15, 4 }
 0x444   :  { %v1134_v25 = vsel %vm632_vm9, %v1074_v43, %v1114_v5  ;;  %4051 = vmatprep.subr.bf16.mxu1 %v4050_v49  ;;  %v1107_v24 = vrot.slane %v1023_v14, 4  ;;  %v1108_v34 = vrot.slane %v1024_v26, 4  ;;  %v1129_v31 = vsel %vm632_vm9, %v5116_v47, %v1105_v55 }
 0x445   :  { %v1057_v12 = vpop.permute.xlu0 %1056  ;;  %v1040_v46 = vpop.permute.xlu1 %1039  ;;  %v4046_v30 = vpack.c.bf16 %v1134_v25, %v1130_v9  ;;  %4053 = vmatpush1.bf16.msra.mxu1 %v4052_v63  ;;  %v1115_v3 = vrot.slane %v5176_v13, 4  ;;  %v1116_v15 = vrot.slane %v5193_v17, 4  ;;  %v1078_v13 = vsel %vm5228_vm5, %v1065_v21, %v1048_v56 }
 0x446   :  { %v1072_v57 = vsel %vm236_vm3, %v1057_v12, %v1060_v11  ;;  %v1047_v33 = vsel %vm220_vm2, %v1040_v46, %v1042_v29  ;;  %v1131_v17 = vsel %vm632_vm9, %v5120_v48, %v1107_v24 }
 0x447   :  { %v1073_v5 = vsel %vm5235_vm8, %v1047_v33, %v1072_v57  ;;  %4047 = vmatprep.subr.bf16.mxu0 %v4046_v30  ;;  %v1077_v6 = vsel %vm5247_vm12, %v1072_v57, %v1047_v33  ;;  %v872_v30 = vld [vmem:[%s5837_s10] sm:$0xff] }
 0x448   :  { %v1133_v35 = vsel %vm632_vm9, %v1073_v5, %v1113_v32  ;;  %v871_v32 = vld [vmem:[%s5892_s6] sm:$0xff] }
 0x449   :  { %v4048_v44 = vpack.c.bf16 %v1133_v35, %v1129_v31  ;;  %v1064_v38 = vpop.permute.xlu0 %1063  ;;  %v1046_v54 = vpop.permute.xlu1 %1045 }
 0x44a   :  { %v1066_v29 = vsel %vm236_vm3, %v1062_v10, %v1064_v38  ;;  %v1067_v51 = vsel %vm236_vm3, %v1064_v38, %v1057_v12  ;;  %v1049_v41 = vsel %vm220_vm2, %v1044_v20, %v1046_v54  ;;  %v1055_v19 = vsel %vm220_vm2, %v1046_v54, %v1040_v46 }
 0x44b   :  { %v1075_v47 = vsel %vm5239_vm10, %v1049_v41, %v1066_v29  ;;  %v1076_v55 = vsel %vm5243_vm11, %v1055_v19, %v1067_v51  ;;  %4049 = vmatpush1.bf16.msra.mxu0 %v4048_v44  ;;  %v1132_v20 = vsel %vm632_vm9, %v5126_v16, %v1108_v34  ;;  %v1080_v48 = vsel %vm5259_vm13, %v1067_v51, %v1055_v19 }
 0x44c   :  { %v1135_v50 = vsel %vm632_vm9, %v1075_v47, %v1115_v3  ;;  %3591 = vmatprep.subr.msk.mxu0 %vm632_vm9, %v1078_v13  ;;  %v1136_v9 = vsel %vm632_vm9, %v1076_v55, %v1116_v15  ;;  %v1079_v16 = vsel %vm5265_vm14, %v1066_v29, %v1049_v41 }
 0x44d   :  { %v4056_v23 = vpack.c.bf16 %v1135_v50, %v1131_v17  ;;  %v4054_v39 = vpack.c.bf16 %v1136_v9, %v1132_v20 }
 0x44f   :  { %3592 = vmatpush1.msk.msra.mxu0 %vm632_vm9, %v1077_v6  ;;  %4055 = vmatprep.subr.bf16.mxu1 %v4054_v39 }
 0x450   :  { %3593 = vmatmul.mubr.msk.f32.vlgmr.msra.gmra.mrb[2].mxu0 %vm1142_vm15, %v869_v60  ;;  %4057 = vmatpush1.bf16.msra.mxu1 %v4056_v23 }
 0x451   :  { %3594 = vmatprep.subr.msk.mxu1 %vm632_vm9, %v1080_v48 }
 0x454   :  { %3595 = vmatpush1.msk.msra.mxu1 %vm632_vm9, %v1079_v16 }
 0x455   :  { %3596 = vmatmul.mubr.msk.f32.vlgmr.msra.gmra.mrb[2].mxu1 %vm1142_vm15, %v869_v60 }
 0x456   :  { %1597 = vmatprep.mubr.f32.mxu1 %v4600_v27 }
 0x45a   :  { %v1140_v56 = vpop.permute.xlu1 %1139 }
 0x523   :  { %v1224_v58 = vpop.f32.mrb[2].mxu0 }
 0x524   :  { %v1225_v52 = vadd.f32 %v1224_v58, %v1140_v56  ;;  %v1226_v10 = vpop.f32.mrb[3].mxu0 }
 0x525   :  { %v1227_v11 = vadd.f32 %v1226_v10, %v1140_v56 }
 0x526   :  { %v1300_v18 = vmax.f32 %v1225_v52, 0.0 }
 0x527   :  { %v1301_v42 = vmax.f32 %v1227_v11, 0.0 }
 0x528   :  { %v1295_v7 = vpop.f32.mrb[2].mxu1  ;;  %v1310_v21 = vmul.f32 %v1300_v18, %v1300_v18 }
 0x529   :  { %v1311_v53 = vmul.f32 %v1301_v42, %v1301_v42  ;;  %v1296_v45 = vadd.f32 %v1295_v7, %v1140_v56  ;;  %v1297_v43 = vpop.f32.mrb[3].mxu1  ;;  %v1304_v49 = vadd.f32 %v1301_v42, %v1300_v18 }
 0x52a   :  { %v1298_v1 = vadd.f32 %v1297_v43, %v1140_v56 }
 0x52b   :  { %v1302_v28 = vmax.f32 %v1296_v45, 0.0  ;;  %v1314_v14 = vadd.f32 %v1311_v53, %v1310_v21 }
 0x52c   :  { %v1303_v62 = vmax.f32 %v1298_v1, 0.0 }
 0x52d   :  { %v1305_v22 = vadd.f32 %v1304_v49, %v1302_v28  ;;  %v1312_v25 = vmul.f32 %v1302_v28, %v1302_v28 }
 0x52e   :  { %v1313_v26 = vmul.f32 %v1303_v62, %v1303_v62 }
 0x52f   :  { %v1306_v63 = vadd.f32 %v1305_v22, %v1303_v62  ;;  %v1315_v12 = vadd.f32 %v1314_v14, %v1312_v25 }
 0x531   :  { %1307 = vadd.xlane.f32.xlu0 %v1306_v63  ;;  %v1316_v46 = vadd.f32 %v1315_v12, %v1313_v26  ;;  %v1351_v12 = vld [vmem:[%s5839_s12] sm:$0xff] }
 0x533   :  { %1317 = vadd.xlane.f32.xlu1 %v1316_v46 }
 0x544   :  { %1343 = vperm.xlu1 %4112, %v872_v30  }
 0x547   :  { %1334 = vperm.xlu0 %4111, %v871_v32  }
 0x5be   :  { %v1308_v57 = vpop.xlane.xlu0 %1307 }
 0x5bf   :  { %v1309_v33 = vmul.f32 0.001953125, %v1308_v57 }
 0x5c0   :  { %v1318_v5 = vpop.xlane.xlu1 %1317 }
 0x5c1   :  { %v1319_v24 = vmul.f32 0.001953125, %v1318_v5  ;;  %v1320_v34 = vmul.f32 %v1309_v33, %v1309_v33  ;;  %v1322_v3 = vsub.f32 %v1300_v18, %v1309_v33  ;;  %v1323_v15 = vsub.f32 %v1301_v42, %v1309_v33 }
 0x5c2   :  { %v1324_v44 = vsub.f32 %v1302_v28, %v1309_v33  ;;  %v1325_v19 = vsub.f32 %v1303_v62, %v1309_v33 }
 0x5c3   :  { %v1321_v31 = vsub.f32 %v1319_v24, %v1320_v34 }
 0x5c4   :  { %v1344_v13 = vpop.permute.xlu1 %1343 }
 0x5c5   :  { %v1326_v35 = vadd.f32 1e-05, %v1321_v31 }
 0x5c6   :  { %v1335_v41 = vpop.permute.xlu0 %1334 }
 0x5c7   :  { %4347 = vrsqrt.f32 %v1326_v35 }
 0x5d1   :  { %v4348_v38 = vpop.eup %4347 }
 0x5d2   :  { %v1328_v54 = vmul.f32 %v4348_v38, %v1322_v3  ;;  %v1329_v29 = vmul.f32 %v4348_v38, %v1323_v15  ;;  %v1330_v51 = vmul.f32 %v4348_v38, %v1324_v44  ;;  %v1331_v17 = vmul.f32 %v4348_v38, %v1325_v19 }
 0x5d4   :  { %v1337_v47 = vmul.f32 %v1335_v41, %v1328_v54  ;;  %v1339_v55 = vmul.f32 %v1335_v41, %v1330_v51  ;;  %v1338_v50 = vmul.f32 %v1335_v41, %v1329_v29  ;;  %v1340_v39 = vmul.f32 %v1335_v41, %v1331_v17 }
 0x5d6   :  { %v5373_v20 = vadd.f32 %v1344_v13, %v1337_v47  ;;  %v5375_v9 = vadd.f32 %v1344_v13, %v1339_v55  ;;  %v5381_v60 = vadd.f32 %v1344_v13, %v1338_v50  ;;  %v5386_v6 = vadd.f32 %v1344_v13, %v1340_v39 }
 0x5d8   :  { %1355 = vrot.lane.b32.xlu0 %v5373_v20, %s4597_s26  ;;  %v4158_v23 = vpack.i.bf16 %v5375_v9, %v5373_v20  ;;  %v4163_v48 = vpack.i.bf16 %v5373_v20, %v5375_v9  ;;  %v4168_v16 = vpack.i.bf16 %v5386_v6, %v5381_v60 }
 0x5da   :  { %4159 = vrot.lane.b32.xlu1 %v4158_v23, %s4596_s2 }
 0x5dc   :  { %1361 = vrot.lane.b32.xlu0 %v5381_v60, %s4596_s2 }
 0x5de   :  { %1367 = vrot.lane.b32.xlu1 %v5375_v9, %s4597_s26 }
 0x5e0   :  { %1373 = vrot.lane.b32.xlu0 %v5386_v6, %s4596_s2 }
 0x5e2   :  { %1466 = vrot.lane.b32.xlu1 %v5381_v60, %s4597_s26 }
 0x5e4   :  { %1472 = vrot.lane.b32.xlu0 %v5386_v6, %s4597_s26 }
 0x5e6   :  { %4164 = vrot.lane.b32.xlu1 %v4163_v48, %s4598_s28 }
 0x5e8   :  { %4169 = vrot.lane.b32.xlu0 %v4168_v16, %s4599_s11 }
 0x64a   :  { %v1356_v56 = vpop.permute.xlu0 %1355 }
 0x64c   :  { %v4160_v58 = vpop.permute.xlu1 %4159 }
 0x64d   :  { %v4161_v52 = vunpack.i.l.bf16 %v4160_v58  ;;  %v4162_v11 = vunpack.i.h.bf16 %v4160_v58 }
 0x64e   :  { %v1362_v10 = vpop.permute.xlu0 %1361 }
 0x64f   :  { %v1363_v18 = vsel %vm188_vm0, %v4161_v52, %v1362_v10  ;;  %v5404_v42 = vsel %vm188_vm0, %v1356_v56, %v4161_v52 }
 0x650   :  { %v1368_v7 = vpop.permute.xlu1 %1367  ;;  %v4178_v21 = vpack.i.bf16 %v1363_v18, %v5404_v42  ;;  %v4183_v62 = vpack.i.bf16 %v5381_v60, %v5404_v42 }
 0x651   :  { %v5408_v53 = vsel %vm188_vm0, %v1368_v7, %v4162_v11 }
 0x652   :  { %4179 = vrot.lane.b32.xlu0 %v4178_v21, %s4599_s11  ;;  %v1374_v45 = vpop.permute.xlu0 %1373  ;;  %v4173_v43 = vpack.i.bf16 %v5408_v53, %v1363_v18 }
 0x653   :  { %v5413_v1 = vsel %vm188_vm0, %v4162_v11, %v1374_v45  ;;  %vm1529_vm0 = vcmask 588800  }
 0x654   :  { %4174 = vrot.lane.b32.xlu1 %v4173_v43, %s4598_s28  ;;  %v4188_v28 = vpack.i.bf16 %v5373_v20, %v5413_v1  ;;  %v1467_v22 = vpop.permute.xlu1 %1466 }
 0x655   :  { %v5428_v14 = vsel %vm380_vm1, %v1467_v22, %v1362_v10  ;;  %v5435_v26 = vsel %vm380_vm1, %v1356_v56, %v1467_v22 }
 0x656   :  { %4189 = vrot.lane.b32.xlu0 %v4188_v28, %s4599_s11  ;;  %v1473_v49 = vpop.permute.xlu0 %1472 }
 0x657   :  { %v5423_v25 = vsel %vm380_vm1, %v1368_v7, %v1473_v49  ;;  %v5440_v63 = vsel %vm380_vm1, %v1473_v49, %v1374_v45  ;;  %vm4604_vm1 = vmmov 0  }
 0x658   :  { %4184 = vrot.lane.b32.xlu1 %v4183_v62, %s4598_s28  ;;  %v5463_v30 = vpop.permute.xlu1 %4164 }
 0x659   :  { %v4166_v29 = vunpack.i.l.bf16 %v5463_v30  ;;  %v4167_v19 = vunpack.i.h.bf16 %v5463_v30 }
 0x65a   :  { %1486 = vrot.lane.b32.xlu0 %v5423_v25, %s4598_s28  ;;  %v5461_v46 = vpop.permute.xlu0 %4169 }
 0x65b   :  { %v4171_v51 = vunpack.i.l.bf16 %v5461_v46  ;;  %v4172_v17 = vunpack.i.h.bf16 %v5461_v46 }
 0x65c   :  { %1484 = vrot.lane.b32.xlu1 %v5428_v14, %s4598_s28 }
 0x65e   :  { %1504 = vrot.lane.b32.xlu0 %v5428_v14, %s4599_s11 }
 0x660   :  { %1502 = vrot.lane.b32.xlu1 %v5435_v26, %s4599_s11 }
 0x662   :  { %1499 = vrot.lane.b32.xlu0 %v5440_v63, %s4599_s11 }
 0x664   :  { %1482 = vrot.lane.b32.xlu1 %v5435_v26, %s4598_s28 }
 0x666   :  { %1406 = vrot.lane.b32.xlu0 %v5408_v53, %s4599_s11 }
 0x668   :  { %1388 = vrot.lane.b32.xlu1 %v5413_v1, %s4598_s28 }
 0x66a   :  { %1448 = vrot.lane.b32.xlu0 %v5375_v9, %s4599_s11 }
 0x66c   :  { %1430 = vrot.lane.b32.xlu1 %v5386_v6, %s4598_s28 }
 0x66e   :  { %1506 = vrot.lane.b32.xlu0 %v5423_v25, %s4599_s11 }
 0x670   :  { %1488 = vrot.lane.b32.xlu1 %v5440_v63, %s4598_s28  ;;  %s4606_s28 = smov [#allocation14]  }
 0x674   :  { %1526 = vperm.xlu1 %4112, %v1351_v12  }
 0x6c4   :  { %v5465_v32 = vpop.permute.xlu0 %4179 }
 0x6c5   :  { %v4182_v57 = vunpack.i.h.bf16 %v5465_v32  ;;  %v4181_v33 = vunpack.i.l.bf16 %v5465_v32 }
 0x6c6   :  { %v4175_v5 = vpop.permute.xlu1 %4174 }
 0x6c7   :  { %v4177_v24 = vunpack.i.h.bf16 %v4175_v5  ;;  %v4176_v34 = vunpack.i.l.bf16 %v4175_v5  ;;  %v1408_v35 = vsel %vm236_vm3, %v4181_v33, %v4182_v57 }
 0x6c8   :  { %v4190_v31 = vpop.permute.xlu0 %4189 }
 0x6c9   :  { %v1391_v3 = vsel %vm220_vm2, %v4176_v34, %v4177_v24  ;;  %v4192_v15 = vunpack.i.h.bf16 %v4190_v31  ;;  %v4191_v44 = vunpack.i.l.bf16 %v4190_v31 }
 0x6ca   :  { %v4185_v38 = vpop.permute.xlu1 %4184  ;;  %v1417_v54 = vsel %vm5223_vm4, %v1391_v3, %v1408_v35  ;;  %v1421_v39 = vsel %vm5228_vm5, %v1408_v35, %v1391_v3 }
 0x6cb   :  { %v4187_v41 = vunpack.i.h.bf16 %v4185_v38  ;;  %v4186_v47 = vunpack.i.l.bf16 %v4185_v38  ;;  %v4058_v13 = vpack.c.bf16 %v1363_v18, %v1417_v54  ;;  %v1450_v50 = vsel %vm236_vm3, %v4192_v15, %v4171_v51 }
 0x6cc   :  { %v5478_v55 = vpop.permute.xlu0 %1486  ;;  %v1415_v48 = vsel %vm236_vm3, %v4191_v44, %v4181_v33  ;;  %v1457_v18 = vsel %vm236_vm3, %v4172_v17, %v4192_v15 }
 0x6cd   :  { %v1433_v23 = vsel %vm220_vm2, %v4187_v41, %v4166_v29  ;;  %v1432_v16 = vsel %vm220_vm2, %v4167_v19, %v4187_v41  ;;  %v1390_v56 = vsel %vm220_vm2, %v4186_v47, %v4176_v34  ;;  %4059 = vmatprep.subr.bf16.mxu1 %v4058_v13 }
 0x6ce   :  { %v1485_v58 = vpop.permute.xlu1 %1484  ;;  %v1459_v52 = vsel %vm5223_vm4, %v1433_v23, %v1450_v50  ;;  %v1416_v10 = vsel %vm5235_vm8, %v1390_v56, %v1415_v48  ;;  %v1420_v45 = vsel %vm5247_vm12, %v1415_v48, %v1390_v56  ;;  %v1458_v43 = vsel %vm5235_vm8, %v1432_v16, %v1457_v18 }
 0x6cf   :  { %v4062_v11 = vpack.c.bf16 %v1459_v52, %v1421_v39  ;;  %v4060_v21 = vpack.c.bf16 %v5404_v42, %v1416_v10  ;;  %v1463_v49 = vsel %vm5228_vm5, %v1450_v50, %v1433_v23  ;;  %v4064_v12 = vpack.c.bf16 %v1458_v43, %v1420_v45 }
 0x6d0   :  { %v5495_v7 = vpop.permute.xlu0 %1504  ;;  %v1491_v42 = vsel %vm220_vm2, %v1485_v58, %v5478_v55  ;;  %v4066_v30 = vpack.c.bf16 %v1463_v49, %v5381_v60  ;;  %v1462_v33 = vsel %vm5247_vm12, %v1457_v18, %v1432_v16 }
 0x6d1   :  { %4061 = vmatpush1.bf16.msra.mxu1 %v4060_v21  ;;  %v4068_v15 = vpack.c.bf16 %v1462_v33, %v5373_v20 }
 0x6d2   :  { %v1503_v28 = vpop.permute.xlu1 %1502  ;;  %4063 = vmatprep.subr.bf16.mxu1 %v4062_v11 }
 0x6d3   :  { %v1508_v62 = vsel %vm236_vm3, %v1503_v28, %v5495_v7 }
 0x6d4   :  { %v1500_v22 = vpop.permute.xlu0 %1499  ;;  %v1517_v5 = vsel %vm5223_vm4, %v1491_v42, %v1508_v62 }
 0x6d5   :  { %4065 = vmatpush1.bf16.msra.mxu1 %v4064_v12  ;;  %v1515_v35 = vsel %vm236_vm3, %v1500_v22, %v1503_v28  ;;  %v4070_v60 = vpack.c.bf16 %v5428_v14, %v1517_v5 }
 0x6d6   :  { %v1483_v34 = vpop.permute.xlu1 %1482  ;;  %4067 = vmatprep.subr.bf16.mxu1 %v4066_v30 }
 0x6d7   :  { %v1490_v31 = vsel %vm220_vm2, %v1483_v34, %v1485_v58 }
 0x6d8   :  { %v1407_v3 = vpop.permute.xlu0 %1406  ;;  %v1516_v38 = vsel %vm5235_vm8, %v1490_v31, %v1515_v35  ;;  %v1520_v36 = vsel %vm5247_vm12, %v1515_v35, %v1490_v31 }
 0x6d9   :  { %4069 = vmatpush1.bf16.msra.mxu1 %v4068_v15  ;;  %v4072_v41 = vpack.c.bf16 %v5435_v26, %v1516_v38  ;;  %v1410_v23 = vsel %vm236_vm3, %v1407_v3, %v4191_v44  ;;  %v1409_v20 = vsel %vm236_vm3, %v4182_v57, %v1407_v3  ;;  %v1350_v44 = vld [vmem:[#allocation7] sm:$0xff] }
 0x6da   :  { %v1389_v54 = vpop.permute.xlu1 %1388  ;;  %4071 = vmatprep.subr.bf16.mxu1 %v4070_v60 }
 0x6db   :  { %v1398_v2 = vsel %vm220_vm2, %v1389_v54, %v4186_v47  ;;  %v1392_v13 = vsel %vm220_vm2, %v4177_v24, %v1389_v54  ;;  %v1521_v47 = vsel %vm5228_vm5, %v1508_v62, %v1491_v42  ;;  %v4196_v62 = vld [vmem:[#allocation8 + $0x80] sm:$0xff]  }
 0x6dc   :  { %v1449_v50 = vpop.permute.xlu0 %1448  ;;  %v1419_v37 = vsel %vm5243_vm11, %v1398_v2, %v1410_v23  ;;  %v1418_v26 = vsel %vm5239_vm10, %v1392_v13, %v1409_v20  ;;  %v1423_v48 = vsel %vm5259_vm13, %v1410_v23, %v1398_v2 }
 0x6dd   :  { %4073 = vmatpush1.bf16.msra.mxu1 %v4072_v41  ;;  %v1452_v24 = vsel %vm236_vm3, %v1449_v50, %v4172_v17  ;;  %v4074_v16 = vpack.c.bf16 %v5413_v1, %v1419_v37  ;;  %v4076_v17 = vpack.c.bf16 %v5408_v53, %v1418_v26  ;;  %v1422_v53 = vsel %vm5265_vm14, %v1409_v20, %v1392_v13  ;;  %v1353_v20 = vld [vmem:[%s5841_s14] sm:$0xff] }
 0x6de   :  { %v1431_v14 = vpop.permute.xlu1 %1430  ;;  %1549 = vmatprep.subr.mxu1 %v1521_v47  ;;  %v1352_v37 = vld [vmem:[%s5840_s13] sm:$0xff] }
 0x6df   :  { %v1440_v39 = vsel %vm220_vm2, %v1431_v14, %v4167_v19  ;;  %v1434_v32 = vsel %vm220_vm2, %v4166_v29, %v1431_v14  ;;  %v1451_v19 = vsel %vm236_vm3, %v4171_v51, %v1449_v50  ;;  %v4197_v14 = vld [vmem:[#allocation8 + $0x48] sm:$0xff]  }
 0x6e0   :  { %v1461_v57 = vsel %vm5243_vm11, %v1440_v39, %v1452_v24  ;;  %v1460_v58 = vsel %vm5239_vm10, %v1434_v32, %v1451_v19  ;;  %v1465_v40 = vsel %vm5259_vm13, %v1452_v24, %v1440_v39  ;;  %v1507_v52 = vpop.permute.xlu0 %1506  ;;  %v1464_v51 = vsel %vm5265_vm14, %v1451_v19, %v1434_v32  ;;  %v4198_v47 = vld [vmem:[#allocation8 + $0xc8] sm:$0xff]   ;;  %v4201_v39 = vld [vmem:[#allocation8 + $0x50] sm:$0xff]   ;;  %v4209_v19 = vld [vmem:[#allocation8 + $0x60] sm:$0xff]  }
 0x6e1   :  { %1550 = vmatpush1.msra.mxu1 %v1520_v36  ;;  %v4078_v56 = vpack.c.bf16 %v1461_v57, %v1423_v48  ;;  %v4080_v46 = vpack.c.bf16 %v1460_v58, %v1422_v53  ;;  %v1510_v10 = vsel %vm236_vm3, %v1507_v52, %v1500_v22  ;;  %v4082_v11 = vpack.c.bf16 %v1465_v40, %v5386_v6  ;;  %v4199_v26 = vld [vmem:[#allocation8 + $0x8] sm:$0xff]   ;;  %v4202_v32 = vld [vmem:[#allocation8 + $0xd0] sm:$0xff]   ;;  %v4205_v48 = vld [vmem:[#allocation8 + $0x58] sm:$0xff]  }
 0x6e2   :  { %v1489_v29 = vpop.permute.xlu1 %1488  ;;  %3597 = vmatmul.mubr.msk.f32.vlgmr.msra.gmra.mrb[4].mxu1 %vm1529_vm0, %v1350_v44  ;;  %4075 = vmatprep.subr.bf16.mxu1 %v4074_v16  ;;  %v4084_v45 = vpack.c.bf16 %v1464_v51, %v5375_v9  ;;  %v1509_v43 = vsel %vm236_vm3, %v5495_v7, %v1507_v52  ;;  %v4195_v7 = vld [vmem:[#allocation8] sm:$0xff]   ;;  %v4200_v24 = vld [vmem:[#allocation8 + $0x88] sm:$0xff]   ;;  %v4203_v57 = vld [vmem:[#allocation8 + $0x10] sm:$0xff]  }
 0x6e3   :  { %4077 = vmatpush1.bf16.msra.mxu1 %v4076_v17  ;;  %v1498_v1 = vsel %vm220_vm2, %v1489_v29, %v1483_v34  ;;  %1668 = vmatprep.mubr.f32.mxu1 %v4600_v27  ;;  %v1492_v18 = vsel %vm220_vm2, %v5478_v55, %v1489_v29  ;;  %v4193_v55 = vld [vmem:[#allocation8 + $0x40] sm:$0xff]   ;;  %v4206_v36 = vld [vmem:[#allocation8 + $0xd8] sm:$0xff]   ;;  %v4213_v40 = vld [vmem:[#allocation8 + $0x68] sm:$0xff]  }
 0x6e4   :  { %4079 = vmatprep.subr.bf16.mxu1 %v4078_v56  ;;  %v1519_v21 = vsel %vm5243_vm11, %v1498_v1, %v1510_v10  ;;  %v1518_v28 = vsel %vm5239_vm10, %v1492_v18, %v1509_v43  ;;  %v1523_v8 = vsel %vm5259_vm13, %v1510_v10, %v1498_v1  ;;  %v1522_v9 = vsel %vm5265_vm14, %v1509_v43, %v1492_v18  ;;  %v4207_v16 = vld [vmem:[#allocation8 + $0x18] sm:$0xff]   ;;  %v4210_v29 = vld [vmem:[#allocation8 + $0xe0] sm:$0xff]   ;;  %v4214_v52 = vld [vmem:[#allocation8 + $0xe8] sm:$0xff]  }
 0x6e5   :  { %v4086_v49 = vpack.c.bf16 %v5440_v63, %v1519_v21  ;;  %v4088_v6 = vpack.c.bf16 %v5423_v25, %v1518_v28  ;;  %3767 = vmatprep.subr.bf16.mxu0 %v4193_v55  ;;  %v4208_v17 = vld [vmem:[#allocation8 + $0x98] sm:$0xff]   ;;  %v4211_v56 = vld [vmem:[#allocation8 + $0x20] sm:$0xff]   ;;  %v4215_v53 = vld [vmem:[#allocation8 + $0x28] sm:$0xff]  }
 0x6e6   :  { %3768 = vmatpush3.bf16.msra.mxu0 %v4195_v7  ;;  %v4212_v58 = vld [vmem:[#allocation8 + $0xa0] sm:$0xff]   ;;  %v4216_v1 = vld [vmem:[#allocation8 + $0xa8] sm:$0xff]   ;;  %v4218_v51 = vld [vmem:[#allocation8 + $0xf0] sm:$0xff]  }
 0x6e7   :  { %4081 = vmatpush1.bf16.msra.mxu1 %v4080_v46  ;;  %3769 = vmatprep.subr.bf16.mxu0 %v4197_v14  ;;  %v4217_v46 = vld [vmem:[#allocation8 + $0x70] sm:$0xff]   ;;  %v4221_v18 = vld [vmem:[#allocation8 + $0x78] sm:$0xff]   ;;  %v4225_v28 = vld [vmem:[#allocation8 + $0x140] sm:$0xff]  }
 0x6e8   :  { %4083 = vmatprep.subr.bf16.mxu1 %v4082_v11  ;;  %v4219_v10 = vld [vmem:[#allocation8 + $0x30] sm:$0xff]   ;;  %v4222_v21 = vld [vmem:[#allocation8 + $0xf8] sm:$0xff]  }
 0x6e9   :  { %v4220_v11 = vld [vmem:[#allocation8 + $0xb0] sm:$0xff]   ;;  %v4224_v43 = vld [vmem:[#allocation8 + $0xb8] sm:$0xff]  }
 0x6ea   :  { %3770 = vmatpush3.bf16.msra.mxu0 %v4199_v26 }
 0x6eb   :  { %4085 = vmatpush1.bf16.msra.mxu1 %v4084_v45  ;;  %3771 = vmatprep.subr.bf16.mxu0 %v4201_v39  ;;  %v4223_v45 = vld [vmem:[#allocation8 + $0x38] sm:$0xff]  }
 0x6ec   :  { %4087 = vmatprep.subr.bf16.mxu1 %v4086_v49  ;;  %v4226_v49 = vld [vmem:[#allocation8 + $0x1c0] sm:$0xff]  }
 0x6ee   :  { %3772 = vmatpush3.bf16.msra.mxu0 %v4203_v57 }
 0x6ef   :  { %4089 = vmatpush1.bf16.msra.mxu1 %v4088_v6  ;;  %3773 = vmatprep.subr.bf16.mxu0 %v4205_v48 }
 0x6f0   :  { %1620 = vmatprep.subr.mxu1 %v1523_v8 }
 0x6f2   :  { %3774 = vmatpush3.bf16.msra.mxu0 %v4207_v16  ;;  %v4227_v16 = vld [vmem:[#allocation8 + $0x100] sm:$0xff]  }
 0x6f3   :  { %1621 = vmatpush1.msra.mxu1 %v1522_v9  ;;  %v1527_v22 = vpop.permute.xlu1 %1526  ;;  %3775 = vmatprep.subr.bf16.mxu0 %v4209_v19 }
 0x6f4   :  { %3598 = vmatmul.mubr.msk.f32.vlgmr.msra.gmra.mrb[6].mxu1 %vm1529_vm0, %v1350_v44  ;;  %3789 = vmatprep.subr.bf16.mxu1 %v4194_v4  ;;  %v4204_v44 = vld [vmem:[#allocation8 + $0x90] sm:$0xff]  }
 0x6f5   :  { %3790 = vmatpush3.bf16.msra.mxu1 %v4196_v62 }
 0x6f6   :  { %3791 = vmatprep.subr.bf16.mxu1 %v4198_v47  ;;  %3776 = vmatpush3.bf16.msra.mxu0 %v4211_v56  ;;  %v4229_v56 = vld [vmem:[#allocation8 + $0x148] sm:$0xff]  }
 0x6f7   :  { %3777 = vmatprep.subr.bf16.mxu0 %v4213_v40 }
 0x6f9   :  { %3792 = vmatpush3.bf16.msra.mxu1 %v4200_v24 }
 0x6fa   :  { %3793 = vmatprep.subr.bf16.mxu1 %v4202_v32  ;;  %3778 = vmatpush3.bf16.msra.mxu0 %v4215_v53  ;;  %v4231_v53 = vld [vmem:[#allocation8 + $0x108] sm:$0xff]  }
 0x6fb   :  { %3779 = vmatprep.subr.bf16.mxu0 %v4217_v46 }
 0x6fd   :  { %3794 = vmatpush3.bf16.msra.mxu1 %v4204_v44 }
 0x6fe   :  { %3795 = vmatprep.subr.bf16.mxu1 %v4206_v36  ;;  %3780 = vmatpush3.bf16.msra.mxu0 %v4219_v10  ;;  %v4234_v10 = vld [vmem:[#allocation8 + $0x1d0] sm:$0xff]  }
 0x6ff   :  { %3781 = vmatprep.subr.bf16.mxu0 %v4221_v18 }
 0x701   :  { %3796 = vmatpush3.bf16.msra.mxu1 %v4208_v17  ;;  %v4228_v17 = vld [vmem:[#allocation8 + $0x180] sm:$0xff]  }
 0x702   :  { %3797 = vmatprep.subr.bf16.mxu1 %v4210_v29  ;;  %3782 = vmatpush3.bf16.msra.mxu0 %v4223_v45 }
 0x703   :  { %3811 = vmatprep.subr.bf16.mxu0 %v4225_v28 }
 0x705   :  { %3798 = vmatpush3.bf16.msra.mxu1 %v4212_v58  ;;  %v4230_v58 = vld [vmem:[#allocation8 + $0x1c8] sm:$0xff]  }
 0x706   :  { %3799 = vmatprep.subr.bf16.mxu1 %v4214_v52 }
 0x709   :  { %3800 = vmatpush3.bf16.msra.mxu1 %v4216_v1  ;;  %v4232_v1 = vld [vmem:[#allocation8 + $0x188] sm:$0xff]  }
 0x70a   :  { %3801 = vmatprep.subr.bf16.mxu1 %v4218_v51  ;;  %v4233_v51 = vld [vmem:[#allocation8 + $0x150] sm:$0xff]  }
 0x70d   :  { %3802 = vmatpush3.bf16.msra.mxu1 %v4220_v11 }
 0x70e   :  { %3803 = vmatprep.subr.bf16.mxu1 %v4222_v21 }
 0x711   :  { %3804 = vmatpush3.bf16.msra.mxu1 %v4224_v43 }
 0x712   :  { %3833 = vmatprep.subr.bf16.mxu1 %v4226_v49  ;;  %v4235_v49 = vld [vmem:[#allocation8 + $0x110] sm:$0xff]  }
 0x7b5   :  { %v1599_v25 = vpop.f32.mrb[4].mxu1 }
 0x7b6   :  { %v1601_v63 = vpop.f32.mrb[5].mxu1  ;;  %v1600_v59 = vadd.f32 %v1599_v25, %v1527_v22 }
 0x7b7   :  { %v1602_v12 = vadd.f32 %v1601_v63, %v1527_v22 }
 0x7b8   :  { %v5575_v42 = vmax.f32 %v1600_v59, 0.0 }
 0x7b9   :  { %v5577_v61 = vmax.f32 %v1602_v12, 0.0 }
 0x7ba   :  { %v1685_v33 = vmul.f32 %v5575_v42, %v5575_v42 }
 0x7bb   :  { %v1686_v5 = vmul.f32 %v5577_v61, %v5577_v61  ;;  %v1679_v15 = vadd.f32 %v5577_v61, %v5575_v42 }
 0x7bd   :  { %v1689_v2 = vadd.f32 %v1686_v5, %v1685_v33 }
 0x7c7   :  { %v1670_v30 = vpop.f32.mrb[6].mxu1 }
 0x7c8   :  { %v1671_v34 = vadd.f32 %v1670_v30, %v1527_v22  ;;  %v1672_v31 = vpop.f32.mrb[7].mxu1 }
 0x7c9   :  { %v1673_v35 = vadd.f32 %v1672_v31, %v1527_v22 }
 0x7ca   :  { %v5583_v3 = vmax.f32 %v1671_v34, 0.0 }
 0x7cb   :  { %v5587_v38 = vmax.f32 %v1673_v35, 0.0 }
 0x7cc   :  { %v1680_v60 = vadd.f32 %v1679_v15, %v5583_v3  ;;  %v1687_v54 = vmul.f32 %v5583_v3, %v5583_v3 }
 0x7cd   :  { %v1688_v41 = vmul.f32 %v5587_v38, %v5587_v38 }
 0x7ce   :  { %v1681_v13 = vadd.f32 %v1680_v60, %v5587_v38  ;;  %v1690_v50 = vadd.f32 %v1689_v2, %v1687_v54 }
 0x7d0   :  { %1682 = vadd.xlane.f32.xlu0 %v1681_v13  ;;  %v1691_v23 = vadd.f32 %v1690_v50, %v1688_v41 }
 0x7d2   :  { %1692 = vadd.xlane.f32.xlu1 %v1691_v23 }
 0x7e3   :  { %1718 = vperm.xlu1 %4112, %v1353_v20  }
 0x7e6   :  { %1709 = vperm.xlu0 %4111, %v1352_v37  }
 0x85d   :  { %v1683_v6 = vpop.xlane.xlu0 %1682 }
 0x85e   :  { %v1684_v8 = vmul.f32 0.001953125, %v1683_v6  ;;  %v4236_v6 = vld [vmem:[#allocation8 + $0x190] sm:$0xff]  }
 0x85f   :  { %v1693_v9 = vpop.xlane.xlu1 %1692 }
 0x860   :  { %v1694_v55 = vmul.f32 0.001953125, %v1693_v9  ;;  %v1695_v4 = vmul.f32 %v1684_v8, %v1684_v8  ;;  %v1697_v25 = vsub.f32 %v5575_v42, %v1684_v8  ;;  %v1698_v63 = vsub.f32 %v5577_v61, %v1684_v8 }
 0x861   :  { %v1699_v22 = vsub.f32 %v5583_v3, %v1684_v8  ;;  %v1700_v59 = vsub.f32 %v5587_v38, %v1684_v8 }
 0x862   :  { %v1696_v7 = vsub.f32 %v1694_v55, %v1695_v4 }
 0x863   :  { %v1719_v2 = vpop.permute.xlu1 %1718 }
 0x864   :  { %v1701_v62 = vadd.f32 1e-05, %v1696_v7  ;;  %v4237_v7 = vld [vmem:[#allocation8 + $0x158] sm:$0xff]  }
 0x865   :  { %v1710_v31 = vpop.permute.xlu0 %1709 }
 0x866   :  { %4349 = vrsqrt.f32 %v1701_v62  ;;  %v4238_v62 = vld [vmem:[#allocation8 + $0x1d8] sm:$0xff]  }
 0x870   :  { %v4350_v12 = vpop.eup %4349 }
 0x871   :  { %v1703_v30 = vmul.f32 %v4350_v12, %v1697_v25  ;;  %v1704_v33 = vmul.f32 %v4350_v12, %v1698_v63  ;;  %v1705_v5 = vmul.f32 %v4350_v12, %v1699_v22  ;;  %v1706_v34 = vmul.f32 %v4350_v12, %v1700_v59 }
 0x873   :  { %v1712_v35 = vmul.f32 %v1710_v31, %v1703_v30  ;;  %v1713_v15 = vmul.f32 %v1710_v31, %v1704_v33  ;;  %v1714_v60 = vmul.f32 %v1710_v31, %v1705_v5  ;;  %v1715_v54 = vmul.f32 %v1710_v31, %v1706_v34  ;;  %v4239_v33 = vld [vmem:[#allocation8 + $0x118] sm:$0xff]   ;;  %v4241_v31 = vld [vmem:[#allocation8 + $0x160] sm:$0xff]  }
 0x874   :  { %v4240_v5 = vld [vmem:[#allocation8 + $0x198] sm:$0xff]  }
 0x875   :  { %v5605_v41 = vadd.f32 %v1719_v2, %v1712_v35  ;;  %v5607_v42 = vadd.f32 %v1719_v2, %v1713_v15  ;;  %v5609_v61 = vadd.f32 %v1719_v2, %v1714_v60  ;;  %v5611_v3 = vadd.f32 %v1719_v2, %v1715_v54  ;;  %v4242_v35 = vld [vmem:[#allocation8 + $0x1e0] sm:$0xff]   ;;  %v4245_v54 = vld [vmem:[#allocation8 + $0x168] sm:$0xff]  }
 0x876   :  { %v4243_v15 = vld [vmem:[#allocation8 + $0x120] sm:$0xff]   ;;  %v4246_v2 = vld [vmem:[#allocation8 + $0x1e8] sm:$0xff]  }
 0x877   :  { %v1770_v38 = vrot.slane %v5611_v3, 7  ;;  %v1728_v13 = vrot.slane %v5607_v42, 1  ;;  %v1769_v50 = vrot.slane %v5609_v61, 7  ;;  %v1727_v23 = vrot.slane %v5605_v41, 1  ;;  %v4244_v60 = vld [vmem:[#allocation8 + $0x1a0] sm:$0xff]  }
 0x878   :  { %v1732_v20 = vrot.slane %v5607_v42, 2  ;;  %v3602_v37 = vrot.slane %v5611_v3, 9  ;;  %v1736_v14 = vrot.slane %v5607_v42, 3  ;;  %v3604_v47 = vrot.slane %v5611_v3, 10 }
 0x879   :  { %v1802_v26 = vsel %vm617_vm6, %v5607_v42, %v1770_v38  ;;  %v1804_v24 = vsel %vm617_vm6, %v1728_v13, %v5611_v3  ;;  %v1801_v39 = vsel %vm617_vm6, %v5605_v41, %v1769_v50  ;;  %v1803_v32 = vsel %vm617_vm6, %v1727_v23, %v5609_v61  ;;  %v4248_v13 = vld [vmem:[#allocation8 + $0x1a8] sm:$0xff]   ;;  %v4250_v23 = vld [vmem:[#allocation8 + $0x1f0] sm:$0xff]  }
 0x87a   :  { %v1818_v57 = vpack.c.bf16 %v1802_v26, %v1802_v26  ;;  %v1820_v44 = vpack.c.bf16 %v1804_v24, %v1804_v24  ;;  %v1817_v48 = vpack.c.bf16 %v1801_v39, %v1801_v39  ;;  %v1819_v36 = vpack.c.bf16 %v1803_v32, %v1803_v32 }
 0x87b   :  { %v1806_v19 = vsel %vm617_vm6, %v1732_v20, %v3602_v37  ;;  %v1808_v29 = vsel %vm617_vm6, %v1736_v14, %v3604_v47  ;;  %v1739_v46 = vrot.slane %v5605_v41, 4  ;;  %v3605_v11 = vrot.slane %v5609_v61, 11  ;;  %v4251_v20 = vld [vmem:[#allocation8 + $0x130] sm:$0xff]   ;;  %v4253_v14 = vld [vmem:[#allocation8 + $0x178] sm:$0xff]  }
 0x87c   :  { %2896 = vmatprep.mubr.bf16.mxu0 %v1818_v57  ;;  %2936 = vmatprep.mubr.bf16.mxu1 %v1820_v44  ;;  %v1822_v40 = vpack.c.bf16 %v1806_v19, %v1806_v19  ;;  %v1824_v52 = vpack.c.bf16 %v1808_v29, %v1808_v29  ;;  %v1743_v18 = vrot.slane %v5605_v41, 5  ;;  %v3607_v21 = vrot.slane %v5609_v61, 12  ;;  %v4252_v37 = vld [vmem:[#allocation8 + $0x1b0] sm:$0xff]   ;;  %v4254_v47 = vld [vmem:[#allocation8 + $0x1f8] sm:$0xff]   ;;  %v4257_v19 = vld [vmem:[#allocation8 + $0x240] sm:$0xff]  }
 0x87d   :  { %2897 = vmatmul.mubr.bf16.vlgmr.msra.gmra.mrb[4].mxu0 %v1817_v48  ;;  %2937 = vmatmul.mubr.bf16.vlgmr.msra.gmra.mrb[8].mxu1 %v1819_v36  ;;  %v1748_v45 = vrot.slane %v5607_v42, 6  ;;  %v5637_v43 = vsel %vm617_vm6, %v1739_v46, %v3605_v11  ;;  %v3610_v28 = vrot.slane %v5611_v3, 13  ;;  %v1752_v9 = vrot.slane %v5607_v42, 7  ;;  %v4255_v48 = vld [vmem:[#allocation8 + $0x138] sm:$0xff]   ;;  %v4258_v29 = vld [vmem:[#allocation8 + $0x2c0] sm:$0xff]   ;;  %v4262_v46 = vld [vmem:[#allocation8 + $0x2c8] sm:$0xff]  }
 0x87e   :  { %3812 = vmatpush3.bf16.msra.mxu0 %v4227_v16  ;;  %3834 = vmatpush3.bf16.msra.mxu1 %v4228_v17  ;;  %v5641_v8 = vsel %vm617_vm6, %v1743_v18, %v3607_v21  ;;  %v1784_v55 = vrot.slane %v1770_v38, 7  ;;  %v1747_v4 = vrot.slane %v5605_v41, 6  ;;  %v3609_v63 = vrot.slane %v5609_v61, 13  ;;  %v4247_v38 = vld [vmem:[#allocation8 + $0x128] sm:$0xff]   ;;  %v4256_v36 = vld [vmem:[#allocation8 + $0x1b8] sm:$0xff]   ;;  %v4265_v18 = vld [vmem:[#allocation8 + $0x250] sm:$0xff]  }
 0x87f   :  { %2976 = vmatprep.mubr.bf16.mxu0 %v1822_v40  ;;  %3016 = vmatprep.mubr.bf16.mxu1 %v1824_v52  ;;  %v5646_v25 = vsel %vm617_vm6, %v1748_v45, %v3610_v28  ;;  %v1751_v59 = vrot.slane %v5605_v41, 7  ;;  %v1783_v12 = vrot.slane %v1769_v50, 7  ;;  %v4249_v50 = vld [vmem:[#allocation8 + $0x170] sm:$0xff]   ;;  %v1731_v26 = vrot.slane %v5605_v41, 2  ;;  %v4264_v11 = vld [vmem:[#allocation8 + $0x288] sm:$0xff]  }
 0x880   :  { %3813 = vmatprep.subr.bf16.mxu0 %v4229_v56  ;;  %3835 = vmatprep.subr.bf16.mxu1 %v4230_v58  ;;  %v5650_v22 = vsel %vm617_vm6, %v1752_v9, %v1784_v55  ;;  %v5654_v30 = vsel %vm617_vm6, %v1747_v4, %v3609_v63  ;;  %v3601_v24 = vrot.slane %v5609_v61, 9  ;;  %v1735_v39 = vrot.slane %v5605_v41, 3  ;;  %v4259_v58 = vld [vmem:[#allocation8 + $0x200] sm:$0xff]   ;;  %v4266_v21 = vld [vmem:[#allocation8 + $0x2d0] sm:$0xff]   ;;  %v4271_v9 = vld [vmem:[#allocation8 + $0x218] sm:$0xff]  }
 0x881   :  { %v5657_v34 = vsel %vm617_vm6, %v1751_v59, %v1783_v12  ;;  %v3603_v32 = vrot.slane %v5609_v61, 10  ;;  %v1740_v57 = vrot.slane %v5607_v42, 4  ;;  %v3606_v44 = vrot.slane %v5611_v3, 11  ;;  %v4267_v45 = vld [vmem:[#allocation8 + $0x210] sm:$0xff]   ;;  %v4272_v55 = vld [vmem:[#allocation8 + $0x298] sm:$0xff]   ;;  %v4273_v4 = vld [vmem:[#allocation8 + $0x260] sm:$0xff]  }
 0x882   :  { %3814 = vmatpush3.bf16.msra.mxu0 %v4231_v53  ;;  %3836 = vmatpush3.bf16.msra.mxu1 %v4232_v1  ;;  %v1744_v16 = vrot.slane %v5607_v42, 5  ;;  %v3608_v17 = vrot.slane %v5611_v3, 12  ;;  %v1805_v41 = vsel %vm617_vm6, %v1731_v26, %v3601_v24  ;;  %v4260_v42 = vld [vmem:[#allocation8 + $0x280] sm:$0xff]   ;;  %v4261_v1 = vld [vmem:[#allocation8 + $0x248] sm:$0xff]   ;;  %v4268_v28 = vld [vmem:[#allocation8 + $0x290] sm:$0xff]   ;;  %v1830_v24 = vpack.c.bf16 %v5646_v25, %v5646_v25 }
 0x883   :  { %3815 = vmatprep.subr.bf16.mxu0 %v4233_v51  ;;  %3837 = vmatprep.subr.bf16.mxu1 %v4234_v10  ;;  %v1807_v61 = vsel %vm617_vm6, %v1735_v39, %v3603_v32  ;;  %v1810_v56 = vsel %vm617_vm6, %v1740_v57, %v3606_v44  ;;  %v1821_v52 = vpack.c.bf16 %v1805_v41, %v1805_v41  ;;  %v4263_v10 = vld [vmem:[#allocation8 + $0x208] sm:$0xff]   ;;  %v4276_v63 = vld [vmem:[#allocation8 + $0x2a0] sm:$0xff]   ;;  %v4297_v44 = vld [vmem:[#allocation8 + $0x350] sm:$0xff]  }
 0x884   :  { %v1812_v40 = vsel %vm617_vm6, %v1744_v16, %v3608_v17  ;;  %v1823_v53 = vpack.c.bf16 %v1807_v61, %v1807_v61  ;;  %v1826_v3 = vpack.c.bf16 %v1810_v56, %v1810_v56  ;;  %v4277_v59 = vld [vmem:[#allocation8 + $0x268] sm:$0xff]   ;;  %v1832_v32 = vpack.c.bf16 %v5650_v22, %v5650_v22  ;;  %v4300_v25 = vld [vmem:[#allocation8 + $0x390] sm:$0xff]   ;;  %v4302_v16 = vld [vmem:[#allocation8 + $0x3d8] sm:$0xff]  }
 0x885   :  { %v1828_v51 = vpack.c.bf16 %v1812_v40, %v1812_v40  ;;  %v4278_v12 = vld [vmem:[#allocation8 + $0x2e8] sm:$0xff]   ;;  %v4303_v17 = vld [vmem:[#allocation8 + $0x318] sm:$0xff]   ;;  %v4307_v41 = vld [vmem:[#allocation8 + $0x320] sm:$0xff]  }
 0x886   :  { %3816 = vmatpush3.bf16.msra.mxu0 %v4235_v49  ;;  %3838 = vmatpush3.bf16.msra.mxu1 %v4236_v6  ;;  %v4269_v49 = vld [vmem:[#allocation8 + $0x258] sm:$0xff]   ;;  %v4293_v26 = vld [vmem:[#allocation8 + $0x348] sm:$0xff]   ;;  %v4308_v61 = vld [vmem:[#allocation8 + $0x3a0] sm:$0xff]  }
 0x887   :  { %3817 = vmatprep.subr.bf16.mxu0 %v4237_v7  ;;  %3839 = vmatprep.subr.bf16.mxu1 %v4238_v62  ;;  %v4270_v6 = vld [vmem:[#allocation8 + $0x2d8] sm:$0xff]   ;;  %v4274_v7 = vld [vmem:[#allocation8 + $0x2e0] sm:$0xff]   ;;  %v4294_v39 = vld [vmem:[#allocation8 + $0x3c8] sm:$0xff]  }
 0x888   :  { %v4275_v62 = vld [vmem:[#allocation8 + $0x220] sm:$0xff]   ;;  %v4295_v57 = vld [vmem:[#allocation8 + $0x308] sm:$0xff]   ;;  %v4304_v22 = vld [vmem:[#allocation8 + $0x398] sm:$0xff]  }
 0x889   :  { %v4309_v56 = vld [vmem:[#allocation8 + $0x368] sm:$0xff]  }
 0x88a   :  { %3818 = vmatpush3.bf16.msra.mxu0 %v4239_v33  ;;  %3840 = vmatpush3.bf16.msra.mxu1 %v4240_v5  ;;  %v4279_v33 = vld [vmem:[#allocation8 + $0x228] sm:$0xff]  }
 0x88b   :  { %3819 = vmatprep.subr.bf16.mxu0 %v4241_v31  ;;  %3841 = vmatprep.subr.bf16.mxu1 %v4242_v35  ;;  %v4280_v5 = vld [vmem:[#allocation8 + $0x2a8] sm:$0xff]   ;;  %v4281_v31 = vld [vmem:[#allocation8 + $0x270] sm:$0xff]  }
 0x88c   :  { %v4282_v35 = vld [vmem:[#allocation8 + $0x2f0] sm:$0xff]   ;;  %v4311_v40 = vld [vmem:[#allocation8 + $0x328] sm:$0xff]  }
 0x88e   :  { %3820 = vmatpush3.bf16.msra.mxu0 %v4243_v15  ;;  %3842 = vmatpush3.bf16.msra.mxu1 %v4244_v60  ;;  %v4283_v15 = vld [vmem:[#allocation8 + $0x230] sm:$0xff]  }
 0x88f   :  { %3821 = vmatprep.subr.bf16.mxu0 %v4245_v54  ;;  %3843 = vmatprep.subr.bf16.mxu1 %v4246_v2  ;;  %v4284_v60 = vld [vmem:[#allocation8 + $0x2b0] sm:$0xff]   ;;  %v4285_v54 = vld [vmem:[#allocation8 + $0x278] sm:$0xff]  }
 0x890   :  { %v4286_v2 = vld [vmem:[#allocation8 + $0x2f8] sm:$0xff]  }
 0x892   :  { %3822 = vmatpush3.bf16.msra.mxu0 %v4247_v38  ;;  %3844 = vmatpush3.bf16.msra.mxu1 %v4248_v13  ;;  %v4287_v38 = vld [vmem:[#allocation8 + $0x238] sm:$0xff]  }
 0x893   :  { %3823 = vmatprep.subr.bf16.mxu0 %v4249_v50  ;;  %3845 = vmatprep.subr.bf16.mxu1 %v4250_v23  ;;  %v4288_v13 = vld [vmem:[#allocation8 + $0x2b8] sm:$0xff]   ;;  %v4289_v50 = vld [vmem:[#allocation8 + $0x340] sm:$0xff]  }
 0x894   :  { %v4290_v23 = vld [vmem:[#allocation8 + $0x3c0] sm:$0xff]  }
 0x896   :  { %3824 = vmatpush3.bf16.msra.mxu0 %v4251_v20  ;;  %3846 = vmatpush3.bf16.msra.mxu1 %v4252_v37  ;;  %v4291_v20 = vld [vmem:[#allocation8 + $0x300] sm:$0xff]   ;;  %v1825_v37 = vpack.c.bf16 %v5637_v43, %v5637_v43  ;;  %v4296_v43 = vld [vmem:[#allocation8 + $0x388] sm:$0xff]  }
 0x897   :  { %3825 = vmatprep.subr.bf16.mxu0 %v4253_v14  ;;  %3847 = vmatprep.subr.bf16.mxu1 %v4254_v47  ;;  %v4292_v14 = vld [vmem:[#allocation8 + $0x380] sm:$0xff]   ;;  %v1827_v47 = vpack.c.bf16 %v5641_v8, %v5641_v8  ;;  %v4298_v8 = vld [vmem:[#allocation8 + $0x3d0] sm:$0xff]  }
 0x89a   :  { %3826 = vmatpush3.bf16.msra.mxu0 %v4255_v48  ;;  %3848 = vmatpush3.bf16.msra.mxu1 %v4256_v36  ;;  %v4299_v48 = vld [vmem:[#allocation8 + $0x310] sm:$0xff]   ;;  %v4301_v36 = vld [vmem:[#allocation8 + $0x358] sm:$0xff]  }
 0x89b   :  { %3855 = vmatprep.subr.bf16.mxu0 %v4257_v19  ;;  %3877 = vmatprep.subr.bf16.mxu1 %v4258_v29  ;;  %v4305_v19 = vld [vmem:[#allocation8 + $0x360] sm:$0xff]  }
 0x89c   :  { %v4306_v29 = vld [vmem:[#allocation8 + $0x3e0] sm:$0xff]  }
 0x89d   :  { %2977 = vmatmul.mubr.bf16.vlgmr.msra.gmra.mrb[8].mxu0 %v1821_v52  ;;  %3017 = vmatmul.mubr.bf16.vlgmr.msra.gmra.mrb[12].mxu1 %v1823_v53  ;;  %v4312_v52 = vld [vmem:[#allocation8 + $0x3a8] sm:$0xff]   ;;  %v4313_v53 = vld [vmem:[#allocation8 + $0x370] sm:$0xff]  }
 0x89e   :  { %3856 = vmatpush3.bf16.msra.mxu0 %v4259_v58  ;;  %3056 = vmatprep.mubr.bf16.mxu0 %v1826_v3  ;;  %v4310_v58 = vld [vmem:[#allocation8 + $0x3e8] sm:$0xff]   ;;  %v4315_v3 = vld [vmem:[#allocation8 + $0x330] sm:$0xff]  }
 0x89f   :  { %3878 = vmatpush3.bf16.msra.mxu1 %v4260_v42  ;;  %3096 = vmatprep.mubr.bf16.mxu1 %v1828_v51  ;;  %v4314_v42 = vld [vmem:[#allocation8 + $0x3f0] sm:$0xff]   ;;  %v4318_v51 = vld [vmem:[#allocation8 + $0x3f8] sm:$0xff]  }
 0x8a0   :  { %3857 = vmatprep.subr.bf16.mxu0 %v4261_v1  ;;  %3879 = vmatprep.subr.bf16.mxu1 %v4262_v46  ;;  %v4316_v1 = vld [vmem:[#allocation8 + $0x3b0] sm:$0xff]   ;;  %v4317_v46 = vld [vmem:[#allocation8 + $0x378] sm:$0xff]  }
 0x8a2   :  { %3858 = vmatpush3.bf16.msra.mxu0 %v4263_v10  ;;  %v4319_v10 = vld [vmem:[#allocation8 + $0x338] sm:$0xff]  }
 0x8a3   :  { %3880 = vmatpush3.bf16.msra.mxu1 %v4264_v11  ;;  %3859 = vmatprep.subr.bf16.mxu0 %v4265_v18  ;;  %v4320_v11 = vld [vmem:[#allocation8 + $0x3b8] sm:$0xff]   ;;  %v1829_v18 = vpack.c.bf16 %v5654_v30, %v5654_v30 }
 0x8a4   :  { %3881 = vmatprep.subr.bf16.mxu1 %v4266_v21  ;;  %v1831_v21 = vpack.c.bf16 %v5657_v34, %v5657_v34  ;;  %v4323_v30 = vld [vmem:[%s5844_s17 + $0x10] sm:$0xff]   ;;  %v4324_v34 = vld [vmem:[%s5844_s17 + $0x18] sm:$0xff]  }
 0x8a6   :  { %3860 = vmatpush3.bf16.msra.mxu0 %v4267_v45  ;;  %v4321_v45 = vld [vmem:[%s5844_s17] sm:$0xff]  }
 0x8a7   :  { %3882 = vmatpush3.bf16.msra.mxu1 %v4268_v28  ;;  %3861 = vmatprep.subr.bf16.mxu0 %v4269_v49  ;;  %v4322_v28 = vld [vmem:[%s5844_s17 + $0x8] sm:$0xff]   ;;  %v4325_v49 = vld [vmem:[%s5844_s17 + $0x20] sm:$0xff]  }
 0x8a8   :  { %3883 = vmatprep.subr.bf16.mxu1 %v4270_v6  ;;  %v4326_v6 = vld [vmem:[%s5844_s17 + $0x28] sm:$0xff]  }
 0x8aa   :  { %3862 = vmatpush3.bf16.msra.mxu0 %v4271_v9  ;;  %v4327_v9 = vld [vmem:[%s5844_s17 + $0x30] sm:$0xff]  }
 0x8ab   :  { %3884 = vmatpush3.bf16.msra.mxu1 %v4272_v55  ;;  %3863 = vmatprep.subr.bf16.mxu0 %v4273_v4  ;;  %v4329_v55 = vld [vmem:[%s5846_s19] sm:$0xff]   ;;  %v4330_v4 = vld [vmem:[%s5846_s19 + $0x8] sm:$0xff]  }
 0x8ac   :  { %3885 = vmatprep.subr.bf16.mxu1 %v4274_v7  ;;  %v4328_v7 = vld [vmem:[%s5844_s17 + $0x38] sm:$0xff]   ;;  %s3546_s17 = sshll.u32 %s4606_s28, 4  ;;  %s3547_s17 = int_to_ptr.vmem [resolvable:$true] %s3546_s17 }
 0x8ae   :  { %3864 = vmatpush3.bf16.msra.mxu0 %v4275_v62  ;;  %v4331_v62 = vld [vmem:[%s5846_s19 + $0x10] sm:$0xff]  }
 0x8af   :  { %3886 = vmatpush3.bf16.msra.mxu1 %v4276_v63  ;;  %3865 = vmatprep.subr.bf16.mxu0 %v4277_v59  ;;  %v4332_v63 = vld [vmem:[%s5846_s19 + $0x18] sm:$0xff]   ;;  %v4333_v59 = vld [vmem:[%s5846_s19 + $0x20] sm:$0xff]  }
 0x8b0   :  { %3887 = vmatprep.subr.bf16.mxu1 %v4278_v12  ;;  %v4334_v12 = vld [vmem:[%s5846_s19 + $0x28] sm:$0xff]  }
 0x8b2   :  { %3866 = vmatpush3.bf16.msra.mxu0 %v4279_v33 }
 0x8b3   :  { %3888 = vmatpush3.bf16.msra.mxu1 %v4280_v5  ;;  %3867 = vmatprep.subr.bf16.mxu0 %v4281_v31  ;;  %v3611_v31 = vld [vmem:[#allocation10] ss:$0 sm:$0xff] }
 0x8b4   :  { %3889 = vmatprep.subr.bf16.mxu1 %v4282_v35 }
 0x8b6   :  { %3868 = vmatpush3.bf16.msra.mxu0 %v4283_v15 }
 0x8b7   :  { %3890 = vmatpush3.bf16.msra.mxu1 %v4284_v60  ;;  %3869 = vmatprep.subr.bf16.mxu0 %v4285_v54 }
 0x8b8   :  { %3891 = vmatprep.subr.bf16.mxu1 %v4286_v2 }
 0x8ba   :  { %3870 = vmatpush3.bf16.msra.mxu0 %v4287_v38 }
 0x8bb   :  { %3892 = vmatpush3.bf16.msra.mxu1 %v4288_v13  ;;  %3899 = vmatprep.subr.bf16.mxu0 %v4289_v50 }
 0x8bc   :  { %3921 = vmatprep.subr.bf16.mxu1 %v4290_v23 }
 0x8bd   :  { %3057 = vmatmul.mubr.bf16.vlgmr.msra.gmra.mrb[12].mxu0 %v1825_v37 }
 0x8be   :  { %3097 = vmatmul.mubr.bf16.vlgmr.msra.gmra.mrb[16].mxu1 %v1827_v47  ;;  %3900 = vmatpush3.bf16.msra.mxu0 %v4291_v20 }
 0x8bf   :  { %3136 = vmatprep.mubr.bf16.mxu0 %v1830_v24  ;;  %3922 = vmatpush3.bf16.msra.mxu1 %v4292_v14 }
 0x8c0   :  { %3176 = vmatprep.mubr.bf16.mxu1 %v1832_v32  ;;  %3901 = vmatprep.subr.bf16.mxu0 %v4293_v26 }
 0x8c1   :  { %3923 = vmatprep.subr.bf16.mxu1 %v4294_v39 }
 0x8c2   :  { %3902 = vmatpush3.bf16.msra.mxu0 %v4295_v57 }
 0x8c3   :  { %3924 = vmatpush3.bf16.msra.mxu1 %v4296_v43  ;;  %3903 = vmatprep.subr.bf16.mxu0 %v4297_v44 }
 0x8c4   :  { %3925 = vmatprep.subr.bf16.mxu1 %v4298_v8 }
 0x8c6   :  { %3904 = vmatpush3.bf16.msra.mxu0 %v4299_v48 }
 0x8c7   :  { %3926 = vmatpush3.bf16.msra.mxu1 %v4300_v25  ;;  %3905 = vmatprep.subr.bf16.mxu0 %v4301_v36 }
 0x8c8   :  { %3927 = vmatprep.subr.bf16.mxu1 %v4302_v16 }
 0x8ca   :  { %3906 = vmatpush3.bf16.msra.mxu0 %v4303_v17 }
 0x8cb   :  { %3928 = vmatpush3.bf16.msra.mxu1 %v4304_v22  ;;  %3907 = vmatprep.subr.bf16.mxu0 %v4305_v19 }
 0x8cc   :  { %3929 = vmatprep.subr.bf16.mxu1 %v4306_v29 }
 0x8ce   :  { %3908 = vmatpush3.bf16.msra.mxu0 %v4307_v41 }
 0x8cf   :  { %3930 = vmatpush3.bf16.msra.mxu1 %v4308_v61  ;;  %3909 = vmatprep.subr.bf16.mxu0 %v4309_v56 }
 0x8d0   :  { %3931 = vmatprep.subr.bf16.mxu1 %v4310_v58 }
 0x8d2   :  { %3910 = vmatpush3.bf16.msra.mxu0 %v4311_v40 }
 0x8d3   :  { %3932 = vmatpush3.bf16.msra.mxu1 %v4312_v52  ;;  %3911 = vmatprep.subr.bf16.mxu0 %v4313_v53 }
 0x8d4   :  { %3933 = vmatprep.subr.bf16.mxu1 %v4314_v42 }
 0x8d6   :  { %3912 = vmatpush3.bf16.msra.mxu0 %v4315_v3 }
 0x8d7   :  { %3934 = vmatpush3.bf16.msra.mxu1 %v4316_v1  ;;  %3913 = vmatprep.subr.bf16.mxu0 %v4317_v46 }
 0x8d8   :  { %3935 = vmatprep.subr.bf16.mxu1 %v4318_v51 }
 0x8da   :  { %3914 = vmatpush3.bf16.msra.mxu0 %v4319_v10 }
 0x8db   :  { %3936 = vmatpush3.bf16.msra.mxu1 %v4320_v11  ;;  %3970 = vmatprep.subr.bf16.mxu0 %v4600_v27 }
 0x8dc   :  { %3990 = vmatprep.subr.bf16.mxu1 %v4600_v27 }
 0x8dd   :  { %3137 = vmatmul.mubr.bf16.vlgmr.msra.gmra.mrb[16].mxu0 %v1829_v18 }
 0x8de   :  { %3177 = vmatmul.mubr.bf16.vlgmr.msra.gmra.mrb[20].mxu1 %v1831_v21  ;;  %3971 = vmatpush3.bf16.msra.mxu0 %v4321_v45 }
 0x8df   :  { %3972 = vmatprep.subr.bf16.mxu0 %v4600_v27  ;;  %3986 = vmatprep.mubr.msk.bf16.mxu0 %vm4604_vm1, %v4600_v27 }
 0x8e0   :  { %4006 = vmatprep.mubr.msk.bf16.mxu1 %vm4604_vm1, %v4600_v27  ;;  %3991 = vmatpush3.bf16.msra.mxu1 %v4329_v55  ;;  %v4339_v55 = vld [vmem:[%s5848_s21 + $0x10] sm:$0xff]  }
 0x8e1   :  { %3992 = vmatprep.subr.bf16.mxu1 %v4600_v27 }
 0x8e2   :  { %3973 = vmatpush3.bf16.msra.mxu0 %v4322_v28 }
 0x8e3   :  { %3974 = vmatprep.subr.bf16.mxu0 %v4600_v27 }
 0x8e4   :  { %3993 = vmatpush3.bf16.msra.mxu1 %v4330_v4  ;;  %v4340_v4 = vld [vmem:[%s5848_s21 + $0x18] sm:$0xff]  }
 0x8e5   :  { %3994 = vmatprep.subr.bf16.mxu1 %v4600_v27 }
 0x8e6   :  { %3975 = vmatpush3.bf16.msra.mxu0 %v4323_v30 }
 0x8e7   :  { %3976 = vmatprep.subr.bf16.mxu0 %v4600_v27 }
 0x8e8   :  { %3995 = vmatpush3.bf16.msra.mxu1 %v4331_v62  ;;  %v4342_v62 = vld [vmem:[%s5848_s21 + $0x28] sm:$0xff]  }
 0x8e9   :  { %3996 = vmatprep.subr.bf16.mxu1 %v4600_v27 }
 0x8ea   :  { %3977 = vmatpush3.bf16.msra.mxu0 %v4324_v34  ;;  %v4335_v34 = vld [vmem:[%s5846_s19 + $0x30] sm:$0xff]  }
 0x8eb   :  { %3978 = vmatprep.subr.bf16.mxu0 %v4600_v27 }
 0x8ec   :  { %3997 = vmatpush3.bf16.msra.mxu1 %v4332_v63  ;;  %v4343_v63 = vld [vmem:[%s5848_s21 + $0x30] sm:$0xff]  }
 0x8ed   :  { %3998 = vmatprep.subr.bf16.mxu1 %v4600_v27 }
 0x8ee   :  { %3979 = vmatpush3.bf16.msra.mxu0 %v4325_v49  ;;  %v4336_v49 = vld [vmem:[%s5846_s19 + $0x38] sm:$0xff]  }
 0x8ef   :  { %3980 = vmatprep.subr.bf16.mxu0 %v4600_v27 }
 0x8f0   :  { %3999 = vmatpush3.bf16.msra.mxu1 %v4333_v59  ;;  %v3740_v59 = vld [vmem:[#allocation11] ss:$0 sm:$0xff] }
 0x8f1   :  { %4000 = vmatprep.subr.bf16.mxu1 %v4600_v27 }
 0x8f2   :  { %3981 = vmatpush3.bf16.msra.mxu0 %v4326_v6  ;;  %v4337_v6 = vld [vmem:[%s5848_s21] sm:$0xff]  }
 0x8f3   :  { %3982 = vmatprep.subr.bf16.mxu0 %v4600_v27 }
 0x8f4   :  { %4001 = vmatpush3.bf16.msra.mxu1 %v4334_v12 }
 0x8f5   :  { %4002 = vmatprep.subr.bf16.mxu1 %v4600_v27 }
 0x8f6   :  { %3983 = vmatpush3.bf16.msra.mxu0 %v4327_v9  ;;  %v4338_v9 = vld [vmem:[%s5848_s21 + $0x8] sm:$0xff]  }
 0x8f7   :  { %3984 = vmatprep.subr.bf16.mxu0 %v4600_v27 }
 0x8f8   :  { %4003 = vmatpush3.bf16.msra.mxu1 %v4335_v34 }
 0x8f9   :  { %4004 = vmatprep.subr.bf16.mxu1 %v4600_v27 }
 0x8fa   :  { %3985 = vmatpush3.bf16.msra.mxu0 %v4328_v7  ;;  %v4341_v7 = vld [vmem:[%s5848_s21 + $0x20] sm:$0xff]  }
 0x8fb   :  { %4010 = vmatprep.subr.bf16.mxu0 %v4600_v27 }
 0x8fc   :  { %4005 = vmatpush3.bf16.msra.mxu1 %v4336_v49 }
 0x950   :  { %v3783_v33 = vpop.f32.mrb[4].mxu0  ;;  %v3805_v5 = vpop.f32.mrb[8].mxu1 }
 0x951   :  { %v3784_v35 = vpop.f32.mrb[5].mxu0  ;;  %v3806_v15 = vpop.f32.mrb[9].mxu1 }
 0x952   :  { %v3785_v60 = vadd.f32 %v3784_v35, %v3783_v33  ;;  %v3807_v54 = vadd.f32 %v3806_v15, %v3805_v5  ;;  %v3786_v2 = vpop.f32.mrb[6].mxu0  ;;  %v3808_v38 = vpop.f32.mrb[10].mxu1 }
 0x953   :  { %v3787_v13 = vpop.f32.mrb[7].mxu0  ;;  %v3809_v50 = vpop.f32.mrb[11].mxu1  ;;  %v3749_v2 = vld [vmem:[#allocation13] ss:$0 sm:$0xff] }
 0x954   :  { %v2899_v23 = vadd.f32 %v3785_v60, %v3611_v31 }
 0x956   :  { %v2939_v20 = vadd.f32 %v3807_v54, %v2899_v23  ;;  %v4344_v54 = vld [vmem:[%s5848_s21 + $0x38] sm:$0xff]   ;;  %s4605_s21 = smov [#allocation15]  }
 0x970   :  { %v3827_v37 = vpop.f32.mrb[8].mxu0  ;;  %v3849_v14 = vpop.f32.mrb[12].mxu1 }
 0x971   :  { %v3828_v47 = vpop.f32.mrb[9].mxu0  ;;  %v3850_v26 = vpop.f32.mrb[13].mxu1 }
 0x972   :  { %v3829_v24 = vadd.f32 %v3828_v47, %v3827_v37  ;;  %v3851_v39 = vadd.f32 %v3850_v26, %v3849_v14  ;;  %v3830_v32 = vpop.f32.mrb[10].mxu0  ;;  %v3852_v57 = vpop.f32.mrb[14].mxu1  ;;  %v3523_v37 = vand.u32 127, %v173_v0  ;;  %v3758_v14 = vld [vmem:[%s5849_s22] ss:$0 sm:$0xff]  ;;  %s3556_s22 = sshll.u32 %s4605_s21, 4  ;;  %s3557_s22 = int_to_ptr.vmem [resolvable:$true] %s3556_s22 }
 0x973   :  { %v3831_v43 = vpop.f32.mrb[11].mxu0  ;;  %v3853_v44 = vpop.f32.mrb[15].mxu1  ;;  %s4509_s11 = scalar_lea.vmem %s3557_s22, 32  ;;  %p4514_p1 = scmp.lt.s32.totalorder %s3557_s22, %s3557_s22 }
 0x974   :  { %v2979_v8 = vadd.f32 %v3829_v24, %v2939_v20  ;;  %vm3524_vm2 = vcmp.lt.s32.totalorder %v3523_v37, 2  ;;  %p4510_p0 = scmp.ne.s32.totalorder %s3557_s22, %s4509_s11  ;;  %p4515_p2 = scmp.lt.s32.totalorder %s4509_s11, %s4509_s11 }
 0x976   :  { %v3019_v48 = vadd.f32 %v3851_v39, %v2979_v8  ;;  %p4516_p3 = por %p4515_p2, %p4514_p1 }
 0x978   :  { %p4517_p4 = pnand %p4516_p3, %p4510_p0 }
 0x990   :  { %v3871_v25 = vpop.f32.mrb[12].mxu0 }
 0x991   :  { %v3893_v36 = vpop.f32.mrb[16].mxu1  ;;  %v3872_v16 = vpop.f32.mrb[13].mxu0 }
 0x992   :  { %v3873_v17 = vadd.f32 %v3872_v16, %v3871_v25  ;;  %v3894_v22 = vpop.f32.mrb[17].mxu1  ;;  %v3874_v19 = vpop.f32.mrb[14].mxu0 }
 0x993   :  { %v3895_v29 = vadd.f32 %v3894_v22, %v3893_v36  ;;  %v3896_v41 = vpop.f32.mrb[18].mxu1  ;;  %v3875_v61 = vpop.f32.mrb[15].mxu0 }
 0x994   :  { %v3059_v56 = vadd.f32 %v3873_v17, %v3019_v48  ;;  %v3897_v58 = vpop.f32.mrb[19].mxu1 }
 0x996   :  { %v3099_v40 = vadd.f32 %v3895_v29, %v3059_v56 }
 0x9b0   :  { %v3915_v52 = vpop.f32.mrb[16].mxu0 }
 0x9b1   :  { %v3937_v53 = vpop.f32.mrb[20].mxu1  ;;  %v3916_v42 = vpop.f32.mrb[17].mxu0 }
 0x9b2   :  { %v3917_v3 = vadd.f32 %v3916_v42, %v3915_v52  ;;  %v3938_v1 = vpop.f32.mrb[21].mxu1  ;;  %v3918_v46 = vpop.f32.mrb[18].mxu0 }
 0x9b3   :  { %v3939_v51 = vadd.f32 %v3938_v1, %v3937_v53  ;;  %v3940_v10 = vpop.f32.mrb[22].mxu1  ;;  %v3919_v11 = vpop.f32.mrb[19].mxu0 }
 0x9b4   :  { %v3139_v18 = vadd.f32 %v3917_v3, %v3099_v40  ;;  %v3941_v21 = vpop.f32.mrb[23].mxu1 }
 0x9b6   :  { %v3179_v45 = vadd.f32 %v3939_v51, %v3139_v18 }
 0x9b8   :  { %v3184_v28 = vmax.f32 %v3179_v45, 0.0 }
 0x9ba   :  { %v3185_v30 = vpack.c.bf16 %v3184_v28, %v3184_v28 }
 0x9bc   :  { %3987 = vmatmul.mubr.bf16.vlgmr.msra.gmra.mrb[20].mxu0 %v3185_v30 }
 0x9bd   :  { %4026 = vmatprep.mubr.msk.bf16.mxu0 %vm4604_vm1, %v4600_v27  ;;  %4011 = vmatpush3.bf16.msra.mxu0 %v4337_v6 }
 0x9be   :  { %4012 = vmatprep.subr.bf16.mxu0 %v4600_v27 }
 0x9c1   :  { %4013 = vmatpush3.bf16.msra.mxu0 %v4338_v9 }
 0x9c2   :  { %4014 = vmatprep.subr.bf16.mxu0 %v4600_v27 }
 0x9c5   :  { %4015 = vmatpush3.bf16.msra.mxu0 %v4339_v55 }
 0x9c6   :  { %4016 = vmatprep.subr.bf16.mxu0 %v4600_v27 }
 0x9c9   :  { %4017 = vmatpush3.bf16.msra.mxu0 %v4340_v4 }
 0x9ca   :  { %4018 = vmatprep.subr.bf16.mxu0 %v4600_v27 }
 0x9cd   :  { %4019 = vmatpush3.bf16.msra.mxu0 %v4341_v7 }
 0x9ce   :  { %4020 = vmatprep.subr.bf16.mxu0 %v4600_v27 }
 0x9d1   :  { %4021 = vmatpush3.bf16.msra.mxu0 %v4342_v62 }
 0x9d2   :  { %4022 = vmatprep.subr.bf16.mxu0 %v4600_v27 }
 0x9d5   :  { %4023 = vmatpush3.bf16.msra.mxu0 %v4343_v63 }
 0x9d6   :  { %4024 = vmatprep.subr.bf16.mxu0 %v4600_v27 }
 0x9d9   :  { %4025 = vmatpush3.bf16.msra.mxu0 %v4344_v54 }
 0xa8f   :  { %v3291_v12 = vpop.f32.mrb[20].mxu0 }
 0xa90   :  { %v3292_v33 = vadd.f32 %v3740_v59, %v3291_v12  ;;  %v3988_v5 = vpop.f32.mrb[21].mxu0 }
 0xa91   :  { %v3294_v31 = vpop.f32.mrb[22].mxu0 }
 0xa92   :  { %v3297_v35 = vmax.f32 %v3292_v33, 0.0  ;;  %v3989_v15 = vpop.f32.mrb[23].mxu0 }
 0xa94   :  { %v3298_v60 = vpack.c.bf16 %v3297_v35, %v3297_v35 }
 0xa96   :  { %4007 = vmatmul.mubr.bf16.vlgmr.msra.gmra.mrb[24].mxu1 %v3298_v60 }
 0xb69   :  { %v3404_v38 = vpop.f32.mrb[24].mxu1 }
 0xb6a   :  { %v3405_v13 = vadd.f32 %v3749_v2, %v3404_v38  ;;  %v4008_v50 = vpop.f32.mrb[25].mxu1 }
 0xb6b   :  { %v3407_v23 = vpop.f32.mrb[26].mxu1 }
 0xb6c   :  { %v3410_v27 = vpack.c.bf16 %v3405_v13, %v3405_v13  ;;  %3537 = vst [vmem:[#allocation14] sm:$0x3] %v3405_v13  ;;  %v4009_v20 = vpop.f32.mrb[27].mxu1 }
 0xb6e   :  { %4027 = vmatmul.mubr.bf16.vlgmr.msra.gmra.mrb[24].mxu0 %v3410_v27 }
 0xc41   :  { %v3516_v47 = vpop.f32.mrb[24].mxu0 }
 0xc42   :  { %v3517_v26 = vadd.f32 %v3758_v14, %v3516_v47  ;;  %v4028_v24 = vpop.f32.mrb[25].mxu0 }
 0xc43   :  { %v3519_v39 = vpop.f32.mrb[26].mxu0 }
 0xc44   :  { %3538 = vst [vmem:[#allocation15] sm:$0x3] %v3517_v26  ;;  %v4029_v32 = vpop.f32.mrb[27].mxu0  ;;  %v3525_v57 = vsel %vm3524_vm2, %v3517_v26, -1e+30 }
 0xc45   :  { %v3526_v43 = vsel %vm622_vm7, %v3525_v57, -inf }
 0xc46   :  { %3527 = vmax.xlane.f32.xlu0 %v3526_v43 }
 0xcd3   :  { %v3528_v44 = vpop.xlane.xlu0 %3527 }
 0xcd4   :  { %v3529_v8 = vsub.f32 %v3525_v57, %v3528_v44 }
 0xcd6   :  { %v3530_v48 = vmul.f32 1.442695, %v3529_v8 }
 0xcd8   :  { %4351 = vpow2.f32 %v3530_v48 }
 0xce2   :  { %v4352_v0 = vpop.eup %4351 }
 0xce3   :  { %v3532_v25 = vsel %vm622_vm7, %v4352_v0, 0.0 }
 0xce4   :  { %3533 = vadd.xlane.f32.xlu1 %v3532_v25 }
 0xce5   :  { %4520 = shalt.err (!%p4517_p4)
}
 0xce6   :  { %s4521_s5 = scalar_lea.hbm %s5851_s24, 32 }
 0xce7   :  { %p4522_p5 = scmp.ne.s32.totalorder %s5851_s24, %s4521_s5  ;;  %p4525_p6 = scmp.lt.u32.totalorder %s4521_s5, %s5851_s24 }
 0xce9   :  { %p4527_p7 = pnand %p4525_p6, %p4522_p5 }
 0xceb   :  { %4530 = shalt.err (!%p4527_p7)
}
 0xcec   :  { %3559 = dma.vmem_to_hbm [thread:$0]  %s3557_s22, 32, %s5851_s24, [#allocation16]  }
 0xced   :  { %s4531_s0 = scalar_lea.vmem %s3547_s17, 32  ;;  %p4536_p9 = scmp.lt.s32.totalorder %s3547_s17, %s3547_s17 }
 0xcee   :  { %p4532_p8 = scmp.ne.s32.totalorder %s3547_s17, %s4531_s0  ;;  %p4537_p10 = scmp.lt.s32.totalorder %s4531_s0, %s4531_s0 }
 0xcf0   :  { %p4538_p11 = por %p4537_p10, %p4536_p9 }
 0xcf2   :  { %p4539_p12 = pnand %p4538_p11, %p4532_p8 }
 0xcf4   :  { %4542 = shalt.err (!%p4539_p12)
}
 0xcf5   :  { %s4543_s19 = scalar_lea.hbm %s5850_s23, 32 }
 0xcf6   :  { %p4544_p13 = scmp.ne.s32.totalorder %s5850_s23, %s4543_s19  ;;  %p4547_p0 = scmp.lt.u32.totalorder %s4543_s19, %s5850_s23 }
 0xcf8   :  { %p4549_p1 = pnand %p4547_p0, %p4544_p13 }
 0xcfa   :  { %4552 = shalt.err (!%p4549_p1)
}
 0xcfb   :  { %3549 = dma.vmem_to_hbm [thread:$0]  %s3547_s17, 32, %s5850_s23, [#allocation4]  }
 0xcfc   :  { %s4607_s7 = smov [#allocation17]  }
 0xcfd   :  { %s3566_s6 = sshll.u32 %s4607_s7, 4  ;;  %s3567_s6 = int_to_ptr.vmem [resolvable:$true] %s3566_s6 }
 0xcfe   :  { %s4553_s10 = scalar_lea.vmem %s3567_s6, 32  ;;  %p4558_p3 = scmp.lt.s32.totalorder %s3567_s6, %s3567_s6 }
 0xcff   :  { %p4554_p2 = scmp.ne.s32.totalorder %s3567_s6, %s4553_s10  ;;  %p4559_p4 = scmp.lt.s32.totalorder %s4553_s10, %s4553_s10 }
 0xd01   :  { %p4560_p5 = por %p4559_p4, %p4558_p3 }
 0xd03   :  { %p4561_p6 = pnand %p4560_p5, %p4554_p2 }
 0xd71   :  { %v3534_v36 = vpop.xlane.xlu1 %3533 }
 0xd72   :  { %4353 = vrcp.f32 %v3534_v36 }
 0xd7c   :  { %v4354_v16 = vpop.eup %4353 }
 0xd7d   :  { %v3536_v17 = vmul.f32 %v4354_v16, %v4352_v0 }
 0xd7f   :  { %3539 = vst [vmem:[#allocation17] sm:$0x3] %v3536_v17 }
 0xd80   :  { %4564 = shalt.err (!%p4561_p6)
}
 0xd81   :  { %s5893_s26 = sld [smem:[#allocation34_spill]] }
 0xd87   :  { %s4565_s21 = scalar_lea.hbm %s5893_s26, 32 }
 0xd88   :  { %p4566_p7 = scmp.ne.s32.totalorder %s5893_s26, %s4565_s21  ;;  %p4569_p8 = scmp.lt.u32.totalorder %s4565_s21, %s5893_s26 }
 0xd8a   :  { %p4571_p9 = pnand %p4569_p8, %p4566_p7 }
 0xd8c   :  { %4574 = shalt.err (!%p4571_p9)
}
 0xd8d   :  { %3569 = dma.vmem_to_hbm [thread:$0]  %s3567_s6, 32, %s5893_s26, [#allocation16]  }
 0xd8e   :  { %4583 = dma.done.wait [#allocation4], 32  }
 0xd8f   :  { %4584 = vsyncadd [#allocation4], 4294967264 }
 0xd90   :  { %4585 = dma.done.wait [#allocation16], 64  }
 0xd91   :  { %4586 = vsyncadd [#allocation16], 4294967232 }
 0xd92   :  { %3579 = vsyncpa [#allocation3], 1 }
 0xd93   :  { %3580 = vsyncpa [#allocation6], 1 }
 0xd94   :  { %3581 = vsyncpa [#allocation9], 1 }
 0xd95   :  { %3582 = vsyncpa [#allocation12], 1 }
 0xd96   :  { %3583 = vsyncpa [#allocation4], 1 }
 0xd97   :  { %3584 = vsyncpa [#allocation16], 1 }

</bundles_post_ra>
